<compile_context>
chip_gen: v6e
topology: v6e:2x2x1
jax: 0.10.0
libtpu: 0.0.40
codegen_flags: <defaults>
</compile_context>

<pallas_src>
import functools

import jax
import jax.numpy as jnp
from jax.experimental import pallas as pl
from jax.experimental.pallas import tpu as pltpu


_LANE = 128
_BN_EPS = 1e-5


def _round_up(x, m):
    return (x + m - 1) // m * m


def _vmem_capacity_bytes():
    try:
        info = pltpu.get_tpu_info()
        cap = getattr(info, "vmem_capacity_bytes", None)
        if cap:
            return int(cap)
    except Exception:
        pass
    return 64 << 20  # conservative fallback: v7x per-TensorCore VMEM


# ----------------------------- Pallas kernels ------------------------------


def _fused_mlp_kernel(*refs, num_layers):
    """Whole MLP stack in one kernel; activations never leave VMEM.

    refs = [x, (w_i, b_i) * L, (gamma_i, beta_i) * (L-1), out]
    """
    x_ref = refs[0]
    lin = refs[1:1 + 2 * num_layers]
    nrm = refs[1 + 2 * num_layers:-1]
    o_ref = refs[-1]

    inv_n = jnp.float32(1.0 / x_ref.shape[0])

    h = x_ref[...]
    for i in range(num_layers):
        w_ref, b_ref = lin[2 * i], lin[2 * i + 1]
        h = jnp.dot(h.astype(w_ref.dtype), w_ref[...],
                    preferred_element_type=jnp.float32) + b_ref[...]
        if i < num_layers - 1:
            g_ref, bt_ref = nrm[2 * i], nrm[2 * i + 1]
            # Two-pass batch statistics (avoids E[x^2]-mean^2 cancellation).
            mean = jnp.sum(h, axis=0, keepdims=True) * inv_n
            d = h - mean
            var = jnp.sum(d * d, axis=0, keepdims=True) * inv_n
            invstd = jax.lax.rsqrt(var + jnp.float32(_BN_EPS))
            h = jnp.maximum(d * (invstd * g_ref[...]) + bt_ref[...], 0.0)
    o_ref[...] = h


def _write_partial_stats(sum_ref, sq_ref, h, *, n_rows, row_tile, masked):
    """Per-row-tile partial column sum / sum-of-squares (f32).

    The row-padding mask is only needed on the LAST tile and only when
    n % row_tile != 0 (static); all other tiles use plain unmasked sums.
    """

    def write(hm):
        s = jnp.sum(hm, axis=0, keepdims=True)
        q = jnp.sum(hm * hm, axis=0, keepdims=True)
        sum_ref[...] = jnp.broadcast_to(s, sum_ref.shape)
        sq_ref[...] = jnp.broadcast_to(q, sq_ref.shape)

    write(h)
    if masked:
        t = pl.program_id(0)

        @pl.when(t == pl.num_programs(0) - 1)
        def _():
            row = t * row_tile + jax.lax.broadcasted_iota(
                jnp.int32, (row_tile, 1), 0)
            write(jnp.where(row < n_rows, h, 0.0))


def _linear_kernel(x_ref, w_ref, b_ref, o_ref):
    o_ref[...] = (jnp.dot(x_ref[...].astype(w_ref.dtype), w_ref[...],
                          preferred_element_type=jnp.float32)
                  + b_ref[...]).astype(o_ref.dtype)


def _linear_stats_kernel(x_ref, w_ref, b_ref, o_ref, sum_ref, sq_ref,
                         *, n_rows, row_tile, masked):
    h = jnp.dot(x_ref[...].astype(w_ref.dtype), w_ref[...],
                preferred_element_type=jnp.float32) + b_ref[...]
    o_ref[...] = h.astype(o_ref.dtype)      # bf16 intermediate to HBM
    _write_partial_stats(sum_ref, sq_ref, h, n_rows=n_rows,
                         row_tile=row_tile, masked=masked)


def _bn_relu(h, col_sum, col_sq, gamma, beta, inv_n):
    mean = col_sum * inv_n
    var = jnp.maximum(col_sq * inv_n - mean * mean, 0.0)
    invstd = jax.lax.rsqrt(var + jnp.float32(_BN_EPS))
    return jnp.maximum((h - mean) * (invstd * gamma) + beta, 0.0)


def _bn_relu_linear_stats_kernel(h_ref, psum_ref, psq_ref, g_ref, bt_ref,
                                 w_ref, b_ref, o_ref, sum_ref, sq_ref,
                                 *, n_rows, row_tile, masked):
    inv_n = jnp.float32(1.0 / n_rows)
    a = _bn_relu(h_ref[...].astype(jnp.float32), psum_ref[...], psq_ref[...],
                 g_ref[...], bt_ref[...], inv_n)
    h = jnp.dot(a.astype(w_ref.dtype), w_ref[...],
                preferred_element_type=jnp.float32) + b_ref[...]
    o_ref[...] = h.astype(o_ref.dtype)
    _write_partial_stats(sum_ref, sq_ref, h, n_rows=n_rows,
                         row_tile=row_tile, masked=masked)


def _bn_relu_linear_kernel(h_ref, psum_ref, psq_ref, g_ref, bt_ref,
                           w_ref, b_ref, o_ref, *, n_rows):
    inv_n = jnp.float32(1.0 / n_rows)
    a = _bn_relu(h_ref[...].astype(jnp.float32), psum_ref[...], psq_ref[...],
                 g_ref[...], bt_ref[...], inv_n)
    o_ref[...] = (jnp.dot(a.astype(w_ref.dtype), w_ref[...],
                          preferred_element_type=jnp.float32)
                  + b_ref[...]).astype(o_ref.dtype)


# ------------------------------ pallas_call wrappers -------------------------


def _reduce_partial(p):
    """(num_tiles, 8, m) per-tile partials (replicated on sublanes) -> (1, m)."""
    return jnp.sum(p[:, 0, :], axis=0, keepdims=True)


def _fused_forward(params, xp, *, vmem_limit_bytes):
    num_layers = params["num_layers"]
    n = xp.shape[0]
    out_pad = params["linears"][-1][0].shape[1]

    inputs = [xp]
    for w, b in params["linears"]:
        inputs += [w, b]
    for g, bt in params["norms"]:
        inputs += [g, bt]

    kern = functools.partial(_fused_mlp_kernel, num_layers=num_layers)
    return pl.pallas_call(
        kern,
        grid=(1,),
        in_specs=[pl.BlockSpec(a.shape, lambda i: (0, 0)) for a in inputs],
        out_specs=pl.BlockSpec((n, out_pad), lambda i: (0, 0)),
        out_shape=jax.ShapeDtypeStruct((n, out_pad), jnp.float32),
        compiler_params=pltpu.CompilerParams(
            vmem_limit_bytes=int(vmem_limit_bytes)),
    )(*inputs)


def _call_linear(xp, w, b, *, row_tile):
    n_pad, k = xp.shape
    m = w.shape[1]
    return pl.pallas_call(
        _linear_kernel,
        grid=(n_pad // row_tile,),
        in_specs=[pl.BlockSpec((row_tile, k), lambda t: (t, 0)),
                  pl.BlockSpec((k, m), lambda t: (0, 0)),
                  pl.BlockSpec((1, m), lambda t: (0, 0))],
        out_specs=pl.BlockSpec((row_tile, m), lambda t: (t, 0)),
        out_shape=jax.ShapeDtypeStruct((n_pad, m), jnp.float32),
        compiler_params=pltpu.CompilerParams(
            dimension_semantics=("parallel",)),
    )(xp, w, b)


def _call_linear_stats(xp, w, b, *, n_rows, row_tile):
    n_pad, k = xp.shape
    m = w.shape[1]
    nt = n_pad // row_tile
    masked = (n_pad != n_rows)
    kern = functools.partial(_linear_stats_kernel, n_rows=n_rows,
                             row_tile=row_tile, masked=masked)
    h, s, q = pl.pallas_call(
        kern,
        grid=(nt,),
        in_specs=[pl.BlockSpec((row_tile, k), lambda t: (t, 0)),
                  pl.BlockSpec((k, m), lambda t: (0, 0)),
                  pl.BlockSpec((1, m), lambda t: (0, 0))],
        out_specs=[pl.BlockSpec((row_tile, m), lambda t: (t, 0)),
                   pl.BlockSpec((1, 8, m), lambda t: (t, 0, 0)),
                   pl.BlockSpec((1, 8, m), lambda t: (t, 0, 0))],
        out_shape=[jax.ShapeDtypeStruct((n_pad, m), xp.dtype),
                   jax.ShapeDtypeStruct((nt, 8, m), jnp.float32),
                   jax.ShapeDtypeStruct((nt, 8, m), jnp.float32)],
        compiler_params=pltpu.CompilerParams(
            dimension_semantics=("parallel",)),   # per-tile partial stats
    )(xp, w, b)
    return h, _reduce_partial(s), _reduce_partial(q)


def _call_bn_relu_linear_stats(h, psum, psq, g, bt, w, b, *, n_rows, row_tile):
    n_pad, k = h.shape
    m = w.shape[1]
    nt = n_pad // row_tile
    masked = (n_pad != n_rows)
    kern = functools.partial(_bn_relu_linear_stats_kernel, n_rows=n_rows,
                             row_tile=row_tile, masked=masked)
    ho, s, q = pl.pallas_call(
        kern,
        grid=(nt,),
        in_specs=[pl.BlockSpec((row_tile, k), lambda t: (t, 0)),
                  pl.BlockSpec((1, k), lambda t: (0, 0)),
                  pl.BlockSpec((1, k), lambda t: (0, 0)),
                  pl.BlockSpec((1, k), lambda t: (0, 0)),
                  pl.BlockSpec((1, k), lambda t: (0, 0)),
                  pl.BlockSpec((k, m), lambda t: (0, 0)),
                  pl.BlockSpec((1, m), lambda t: (0, 0))],
        out_specs=[pl.BlockSpec((row_tile, m), lambda t: (t, 0)),
                   pl.BlockSpec((1, 8, m), lambda t: (t, 0, 0)),
                   pl.BlockSpec((1, 8, m), lambda t: (t, 0, 0))],
        out_shape=[jax.ShapeDtypeStruct((n_pad, m), h.dtype),
                   jax.ShapeDtypeStruct((nt, 8, m), jnp.float32),
                   jax.ShapeDtypeStruct((nt, 8, m), jnp.float32)],
        compiler_params=pltpu.CompilerParams(
            dimension_semantics=("parallel",)),
    )(h, psum, psq, g, bt, w, b)
    return ho, _reduce_partial(s), _reduce_partial(q)


def _call_bn_relu_linear(h, psum, psq, g, bt, w, b, *, n_rows, row_tile):
    n_pad, k = h.shape
    m = w.shape[1]
    kern = functools.partial(_bn_relu_linear_kernel, n_rows=n_rows)
    return pl.pallas_call(
        kern,
        grid=(n_pad // row_tile,),
        in_specs=[pl.BlockSpec((row_tile, k), lambda t: (t, 0)),
                  pl.BlockSpec((1, k), lambda t: (0, 0)),
                  pl.BlockSpec((1, k), lambda t: (0, 0)),
                  pl.BlockSpec((1, k), lambda t: (0, 0)),
                  pl.BlockSpec((1, k), lambda t: (0, 0)),
                  pl.BlockSpec((k, m), lambda t: (0, 0)),
                  pl.BlockSpec((1, m), lambda t: (0, 0))],
        out_specs=pl.BlockSpec((row_tile, m), lambda t: (t, 0)),
        out_shape=jax.ShapeDtypeStruct((n_pad, m), jnp.float32),
        compiler_params=pltpu.CompilerParams(
            dimension_semantics=("parallel",)),
    )(h, psum, psq, g, bt, w, b)


# ----------------------------- parameter init -------------------------------


def init_mlp_params(key, num_layers, input_dim, hidden_dim, output_dim,
                    matmul_dtype=jnp.bfloat16):
    """Synthetic init mirroring torch shapes; weights stored padded, (in, out), bf16."""
    if num_layers < 1:
        raise ValueError("number of layers should be positive!")
    if num_layers == 1:
        dims = [input_dim, output_dim]
    else:
        dims = [input_dim] + [hidden_dim] * (num_layers - 1) + [output_dim]
    # Lane-dense (128) feature padding.  (If a real dim already exceeds 128,
    # rounding it to 256 would fill the v6e/v7x 2x256x256 MXU; do NOT over-pad
    # tiny dims — the tiled path is mem-bound and padding costs HBM bytes.)
    pdims = [_round_up(d, _LANE) for d in dims]
    mdt = jnp.dtype(matmul_dtype)

    linears, norms = [], []
    for layer in range(num_layers):
        k_in, k_out = dims[layer], dims[layer + 1]
        kp_in, kp_out = pdims[layer], pdims[layer + 1]
        key, kw, kb = jax.random.split(key, 3)
        bound = 1.0 / float(k_in) ** 0.5
        w = jax.random.uniform(kw, (k_in, k_out), jnp.float32, -bound, bound)
        b = jax.random.uniform(kb, (k_out,), jnp.float32, -bound, bound)
        wp = (jnp.zeros((kp_in, kp_out), jnp.float32)
              .at[:k_in, :k_out].set(w).astype(mdt))      # bf16 MXU operand
        bp = jnp.zeros((1, kp_out), jnp.float32).at[0, :k_out].set(b)
        linears.append((wp, bp))
        if layer < num_layers - 1:
            gp = jnp.zeros((1, kp_out), jnp.float32).at[0, :k_out].set(1.0)
            btp = jnp.zeros((1, kp_out), jnp.float32)
            norms.append((gp, btp))
    return {"linears": linears, "norms": norms, "num_layers": num_layers,
            "input_dim": input_dim, "output_dim": output_dim,
            "matmul_dtype": mdt}


# ------------------------------- MLP forward --------------------------------


def _fused_vmem_budget_bytes(params, n):
    in_pad = params["linears"][0][0].shape[0]
    mdt = params["matmul_dtype"]
    x_bytes = n * in_pad * mdt.itemsize
    w_bytes = sum(int(w.size) * w.dtype.itemsize + int(b.size) * 4
                  for w, b in params["linears"])
    bn_bytes = sum(int(g.size) * 4 + int(bt.size) * 4
                   for g, bt in params["norms"])
    max_width = max(max(w.shape[1] for w, _ in params["linears"]), in_pad)
    act_bytes = 2 * n * max_width * 4    # two live f32 activation slabs
    return x_bytes + w_bytes + bn_bytes + act_bytes


def mlp_forward(params, x, *, mode="auto", row_tile=512):
    """Forward pass on (num_nodes, input_dim) float32 input."""
    num_layers = params["num_layers"]
    out_dim = params["output_dim"]
    mdt = params["matmul_dtype"]
    n, in_dim = x.shape
    in_pad = params["linears"][0][0].shape[0]

    vmem_cap = _vmem_capacity_bytes()
    budget = _fused_vmem_budget_bytes(params, n)
    if mode == "auto":
        # Fused path (1 launch, zero HBM round-trips of intermediates) whenever
        # everything fits VMEM with 2x headroom for this generation.
        mode = "fused" if 2 * budget <= vmem_cap else "tiled"

    if mode == "fused":
        xp = jnp.zeros((n, in_pad), mdt).at[:, :in_dim].set(x.astype(mdt))
        limit = int(min(int(0.75 * vmem_cap), max(32 << 20, 2 * budget)))
        out = _fused_forward(params, xp, vmem_limit_bytes=limit)
        return out[:, :out_dim]

    # ---- row-tiled, per-layer-fused path (exact full-batch BatchNorm) ----
    row_tile = max(16, _round_up(min(int(row_tile), _round_up(n, 16)), 16))
    n_pad = _round_up(n, row_tile)
    # Row + feature padding built in one shot, stored in the matmul dtype.
    xp = jnp.zeros((n_pad, in_pad), mdt).at[:n, :in_dim].set(x.astype(mdt))

    if num_layers == 1:
        w, b = params["linears"][0]
        out = _call_linear(xp, w, b, row_tile=row_tile)
        return out[:n, :out_dim]

    w, b = params["linears"][0]
    h, s, q = _call_linear_stats(xp, w, b, n_rows=n, row_tile=row_tile)
    for i in range(1, num_layers - 1):
        g, bt = params["norms"][i - 1]
        w, b = params["linears"][i]
        h, s, q = _call_bn_relu_linear_stats(h, s, q, g, bt, w, b,
                                             n_rows=n, row_tile=row_tile)
    g, bt = params["norms"][-1]
    w, b = params["linears"][-1]
    out = _call_bn_relu_linear(h, s, q, g, bt, w, b, n_rows=n,
                               row_tile=row_tile)
    return out[:n, :out_dim]


# ------------------------------ pure-JAX reference ---------------------------


def mlp_reference(params, x):
    n, in_dim = x.shape
    in_pad = params["linears"][0][0].shape[0]
    h = jnp.zeros((n, in_pad), jnp.float32).at[:, :in_dim].set(x)
    hi = jax.lax.Precision.HIGHEST
    nl = params["num_layers"]
    if nl == 1:
        w, b = params["linears"][0]
        return (jnp.dot(h, w.astype(jnp.float32), precision=hi)
                + b)[:, :params["output_dim"]]
    for i in range(nl - 1):
        w, b = params["linears"][i]
        g, bt = params["norms"][i]
        h = jnp.dot(h, w.astype(jnp.float32), precision=hi) + b
        mean = jnp.mean(h, axis=0, keepdims=True)
        var = jnp.mean((h - mean) ** 2, axis=0, keepdims=True)
        h = (h - mean) * jax.lax.rsqrt(var + _BN_EPS) * g + bt
        h = jnp.maximum(h, 0.0)
    w, b = params["linears"][-1]
    return (jnp.dot(h, w.astype(jnp.float32), precision=hi)
            + b)[:, :params["output_dim"]]


# --------------------------------- main --------------------------------------

if __name__ == "__main__":
    key = jax.random.PRNGKey(0)
    k_x, k_p = jax.random.split(key)

    N = 600           # node count; not a row-tile multiple -> exercises masking
    INPUT_DIM = 16
    HIDDEN_DIM = 32
    OUTPUT_DIM = 8
    NUM_LAYERS = 3
    ROW_TILE = 256    # >= the 256-wide MXU M dim on v6e/v7x; 3 row tiles here

    x = jax.random.normal(k_x, (N, INPUT_DIM), jnp.float32)
    params = init_mlp_params(k_p, NUM_LAYERS, INPUT_DIM, HIDDEN_DIM, OUTPUT_DIM)

    ref = mlp_reference(params, x)

    fused_fn = jax.jit(lambda xx: mlp_forward(params, xx, mode="fused"))
    tiled_fn = jax.jit(lambda xx: mlp_forward(params, xx, mode="tiled",
                                              row_tile=ROW_TILE))
    auto_fn = jax.jit(lambda xx: mlp_forward(params, xx, mode="auto"))

    out_fused = jax.block_until_ready(fused_fn(x))
    out_tiled = jax.block_until_ready(tiled_fn(x))
    out_auto = jax.block_until_ready(auto_fn(x))

    for out in (out_fused, out_tiled, out_auto):
        assert out.shape == (N, OUTPUT_DIM)
        assert bool(jnp.all(jnp.isfinite(out)))
        assert bool(jnp.allclose(out, ref, atol=5e-2, rtol=5e-2)), (
            "max abs err", float(jnp.max(jnp.abs(out - ref))))
    print("KERNEL_OK")
</pallas_src>

<mosaic_0001>
module attributes {stable_mosaic.version = 11 : i64} {
  func.func @_fused_mlp_kernel(%arg0: i32, %arg1: memref<600x128xbf16, #tpu.memory_space<vmem>>, %arg2: memref<128x128xbf16, #tpu.memory_space<vmem>>, %arg3: memref<1x128xf32, #tpu.memory_space<vmem>>, %arg4: memref<128x128xbf16, #tpu.memory_space<vmem>>, %arg5: memref<1x128xf32, #tpu.memory_space<vmem>>, %arg6: memref<128x128xbf16, #tpu.memory_space<vmem>>, %arg7: memref<1x128xf32, #tpu.memory_space<vmem>>, %arg8: memref<1x128xf32, #tpu.memory_space<vmem>>, %arg9: memref<1x128xf32, #tpu.memory_space<vmem>>, %arg10: memref<1x128xf32, #tpu.memory_space<vmem>>, %arg11: memref<1x128xf32, #tpu.memory_space<vmem>>, %arg12: memref<600x128xf32, #tpu.memory_space<vmem>>) attributes {dimension_semantics = [#tpu.dimension_semantics<arbitrary>], iteration_bounds = array<i64: 1>, scalar_prefetch = 0 : i64, scratch_operands = 0 : i64, tpu.core_type = #tpu.core_type<tc>, window_params = [{pipeline_mode = #tpu.pipeline_mode<synchronous>, transform_indices = @transform_0, window_bounds = array<i64: 600, 128>}, {pipeline_mode = #tpu.pipeline_mode<synchronous>, transform_indices = @transform_1, window_bounds = array<i64: 128, 128>}, {pipeline_mode = #tpu.pipeline_mode<synchronous>, transform_indices = @transform_2, window_bounds = array<i64: 1, 128>}, {pipeline_mode = #tpu.pipeline_mode<synchronous>, transform_indices = @transform_3, window_bounds = array<i64: 128, 128>}, {pipeline_mode = #tpu.pipeline_mode<synchronous>, transform_indices = @transform_4, window_bounds = array<i64: 1, 128>}, {pipeline_mode = #tpu.pipeline_mode<synchronous>, transform_indices = @transform_5, window_bounds = array<i64: 128, 128>}, {pipeline_mode = #tpu.pipeline_mode<synchronous>, transform_indices = @transform_6, window_bounds = array<i64: 1, 128>}, {pipeline_mode = #tpu.pipeline_mode<synchronous>, transform_indices = @transform_7, window_bounds = array<i64: 1, 128>}, {pipeline_mode = #tpu.pipeline_mode<synchronous>, transform_indices = @transform_8, window_bounds = array<i64: 1, 128>}, {pipeline_mode = #tpu.pipeline_mode<synchronous>, transform_indices = @transform_9, window_bounds = array<i64: 1, 128>}, {pipeline_mode = #tpu.pipeline_mode<synchronous>, transform_indices = @transform_10, window_bounds = array<i64: 1, 128>}, {pipeline_mode = #tpu.pipeline_mode<synchronous>, transform_indices = @transform_11, window_bounds = array<i64: 600, 128>}]} {
    %c0 = arith.constant 0 : index
    %c0_0 = arith.constant 0 : index
    %0 = vector.load %arg1[%c0, %c0_0] : memref<600x128xbf16, #tpu.memory_space<vmem>>, vector<600x128xbf16>
    %c0_1 = arith.constant 0 : index
    %c0_2 = arith.constant 0 : index
    %1 = vector.load %arg2[%c0_1, %c0_2] : memref<128x128xbf16, #tpu.memory_space<vmem>>, vector<128x128xbf16>
    %cst = arith.constant dense<0.000000e+00> : vector<600x128xf32>
    %2 = tpu.matmul %0, %1, %cst {dimension_numbers = #tpu.dot_dimension_numbers<[1], [0], [0], [1], [0, 0, 1, 1], [], []>} : vector<600x128xbf16>, vector<128x128xbf16>, vector<600x128xf32> -> vector<600x128xf32>
    %c0_3 = arith.constant 0 : index
    %c0_4 = arith.constant 0 : index
    %3 = vector.load %arg3[%c0_3, %c0_4] : memref<1x128xf32, #tpu.memory_space<vmem>>, vector<1x128xf32>
    %4 = vector.broadcast %3 : vector<1x128xf32> to vector<600x128xf32>
    %5 = arith.addf %2, %4 : vector<600x128xf32>
    %cst_5 = arith.constant dense<0.000000e+00> : vector<128xf32>
    %6 = vector.multi_reduction <add>, %5, %cst_5 [0] : vector<600x128xf32> to vector<128xf32>
    %7 = vector.shape_cast %6 : vector<128xf32> to vector<1x128xf32>
    %cst_6 = arith.constant 0.00166666671 : f32
    %8 = vector.broadcast %cst_6 : f32 to vector<1x128xf32>
    %9 = arith.mulf %7, %8 : vector<1x128xf32>
    %10 = vector.broadcast %9 : vector<1x128xf32> to vector<600x128xf32>
    %11 = arith.subf %5, %10 : vector<600x128xf32>
    %12 = arith.mulf %11, %11 : vector<600x128xf32>
    %cst_7 = arith.constant dense<0.000000e+00> : vector<128xf32>
    %13 = vector.multi_reduction <add>, %12, %cst_7 [0] : vector<600x128xf32> to vector<128xf32>
    %14 = vector.shape_cast %13 : vector<128xf32> to vector<1x128xf32>
    %cst_8 = arith.constant 0.00166666671 : f32
    %15 = vector.broadcast %cst_8 : f32 to vector<1x128xf32>
    %16 = arith.mulf %14, %15 : vector<1x128xf32>
    %cst_9 = arith.constant 9.99999974E-6 : f32
    %17 = vector.broadcast %cst_9 : f32 to vector<1x128xf32>
    %18 = arith.addf %16, %17 : vector<1x128xf32>
    %19 = math.rsqrt %18 : vector<1x128xf32>
    %c0_10 = arith.constant 0 : index
    %c0_11 = arith.constant 0 : index
    %20 = vector.load %arg8[%c0_10, %c0_11] : memref<1x128xf32, #tpu.memory_space<vmem>>, vector<1x128xf32>
    %21 = arith.mulf %19, %20 : vector<1x128xf32>
    %22 = vector.broadcast %21 : vector<1x128xf32> to vector<600x128xf32>
    %23 = arith.mulf %11, %22 : vector<600x128xf32>
    %c0_12 = arith.constant 0 : index
    %c0_13 = arith.constant 0 : index
    %24 = vector.load %arg9[%c0_12, %c0_13] : memref<1x128xf32, #tpu.memory_space<vmem>>, vector<1x128xf32>
    %25 = vector.broadcast %24 : vector<1x128xf32> to vector<600x128xf32>
    %26 = arith.addf %23, %25 : vector<600x128xf32>
    %cst_14 = arith.constant 0.000000e+00 : f32
    %27 = vector.broadcast %cst_14 : f32 to vector<600x128xf32>
    %28 = arith.maximumf %26, %27 : vector<600x128xf32>
    %29 = arith.truncf %28 : vector<600x128xf32> to vector<600x128xbf16>
    %c0_15 = arith.constant 0 : index
    %c0_16 = arith.constant 0 : index
    %30 = vector.load %arg4[%c0_15, %c0_16] : memref<128x128xbf16, #tpu.memory_space<vmem>>, vector<128x128xbf16>
    %cst_17 = arith.constant dense<0.000000e+00> : vector<600x128xf32>
    %31 = tpu.matmul %29, %30, %cst_17 {dimension_numbers = #tpu.dot_dimension_numbers<[1], [0], [0], [1], [0, 0, 1, 1], [], []>} : vector<600x128xbf16>, vector<128x128xbf16>, vector<600x128xf32> -> vector<600x128xf32>
    %c0_18 = arith.constant 0 : index
    %c0_19 = arith.constant 0 : index
    %32 = vector.load %arg5[%c0_18, %c0_19] : memref<1x128xf32, #tpu.memory_space<vmem>>, vector<1x128xf32>
    %33 = vector.broadcast %32 : vector<1x128xf32> to vector<600x128xf32>
    %34 = arith.addf %31, %33 : vector<600x128xf32>
    %cst_20 = arith.constant dense<0.000000e+00> : vector<128xf32>
    %35 = vector.multi_reduction <add>, %34, %cst_20 [0] : vector<600x128xf32> to vector<128xf32>
    %36 = vector.shape_cast %35 : vector<128xf32> to vector<1x128xf32>
    %cst_21 = arith.constant 0.00166666671 : f32
    %37 = vector.broadcast %cst_21 : f32 to vector<1x128xf32>
    %38 = arith.mulf %36, %37 : vector<1x128xf32>
    %39 = vector.broadcast %38 : vector<1x128xf32> to vector<600x128xf32>
    %40 = arith.subf %34, %39 : vector<600x128xf32>
    %41 = arith.mulf %40, %40 : vector<600x128xf32>
    %cst_22 = arith.constant dense<0.000000e+00> : vector<128xf32>
    %42 = vector.multi_reduction <add>, %41, %cst_22 [0] : vector<600x128xf32> to vector<128xf32>
    %43 = vector.shape_cast %42 : vector<128xf32> to vector<1x128xf32>
    %cst_23 = arith.constant 0.00166666671 : f32
    %44 = vector.broadcast %cst_23 : f32 to vector<1x128xf32>
    %45 = arith.mulf %43, %44 : vector<1x128xf32>
    %cst_24 = arith.constant 9.99999974E-6 : f32
    %46 = vector.broadcast %cst_24 : f32 to vector<1x128xf32>
    %47 = arith.addf %45, %46 : vector<1x128xf32>
    %48 = math.rsqrt %47 : vector<1x128xf32>
    %c0_25 = arith.constant 0 : index
    %c0_26 = arith.constant 0 : index
    %49 = vector.load %arg10[%c0_25, %c0_26] : memref<1x128xf32, #tpu.memory_space<vmem>>, vector<1x128xf32>
    %50 = arith.mulf %48, %49 : vector<1x128xf32>
    %51 = vector.broadcast %50 : vector<1x128xf32> to vector<600x128xf32>
    %52 = arith.mulf %40, %51 : vector<600x128xf32>
    %c0_27 = arith.constant 0 : index
    %c0_28 = arith.constant 0 : index
    %53 = vector.load %arg11[%c0_27, %c0_28] : memref<1x128xf32, #tpu.memory_space<vmem>>, vector<1x128xf32>
    %54 = vector.broadcast %53 : vector<1x128xf32> to vector<600x128xf32>
    %55 = arith.addf %52, %54 : vector<600x128xf32>
    %cst_29 = arith.constant 0.000000e+00 : f32
    %56 = vector.broadcast %cst_29 : f32 to vector<600x128xf32>
    %57 = arith.maximumf %55, %56 : vector<600x128xf32>
    %58 = arith.truncf %57 : vector<600x128xf32> to vector<600x128xbf16>
    %c0_30 = arith.constant 0 : index
    %c0_31 = arith.constant 0 : index
    %59 = vector.load %arg6[%c0_30, %c0_31] : memref<128x128xbf16, #tpu.memory_space<vmem>>, vector<128x128xbf16>
    %cst_32 = arith.constant dense<0.000000e+00> : vector<600x128xf32>
    %60 = tpu.matmul %58, %59, %cst_32 {dimension_numbers = #tpu.dot_dimension_numbers<[1], [0], [0], [1], [0, 0, 1, 1], [], []>} : vector<600x128xbf16>, vector<128x128xbf16>, vector<600x128xf32> -> vector<600x128xf32>
    %c0_33 = arith.constant 0 : index
    %c0_34 = arith.constant 0 : index
    %61 = vector.load %arg7[%c0_33, %c0_34] : memref<1x128xf32, #tpu.memory_space<vmem>>, vector<1x128xf32>
    %62 = vector.broadcast %61 : vector<1x128xf32> to vector<600x128xf32>
    %63 = arith.addf %60, %62 : vector<600x128xf32>
    %c0_35 = arith.constant 0 : index
    %c0_36 = arith.constant 0 : index
    %64 = vector.load %arg12[%c0_35, %c0_36] : memref<600x128xf32, #tpu.memory_space<vmem>>, vector<600x128xf32>
    tpu.vector_store %arg12[%c0_35, %c0_36], %63 {strides = array<i32>} : memref<600x128xf32, #tpu.memory_space<vmem>>, vector<600x128xf32>,
    return
  }
  func.func @transform_0(%arg0: i32) -> (i32, i32) {
    %c0_i32 = arith.constant 0 : i32
    %c0_i32_0 = arith.constant 0 : i32
    %c0_i32_1 = arith.constant 0 : i32
    return %c0_i32, %c0_i32_0 : i32, i32
  }
  func.func @transform_1(%arg0: i32) -> (i32, i32) {
    %c0_i32 = arith.constant 0 : i32
    %c0_i32_0 = arith.constant 0 : i32
    %c0_i32_1 = arith.constant 0 : i32
    return %c0_i32, %c0_i32_0 : i32, i32
  }
  func.func @transform_2(%arg0: i32) -> (i32, i32) {
    %c0_i32 = arith.constant 0 : i32
    %c0_i32_0 = arith.constant 0 : i32
    %c0_i32_1 = arith.constant 0 : i32
    return %c0_i32, %c0_i32_0 : i32, i32
  }
  func.func @transform_3(%arg0: i32) -> (i32, i32) {
    %c0_i32 = arith.constant 0 : i32
    %c0_i32_0 = arith.constant 0 : i32
    %c0_i32_1 = arith.constant 0 : i32
    return %c0_i32, %c0_i32_0 : i32, i32
  }
  func.func @transform_4(%arg0: i32) -> (i32, i32) {
    %c0_i32 = arith.constant 0 : i32
    %c0_i32_0 = arith.constant 0 : i32
    %c0_i32_1 = arith.constant 0 : i32
    return %c0_i32, %c0_i32_0 : i32, i32
  }
  func.func @transform_5(%arg0: i32) -> (i32, i32) {
    %c0_i32 = arith.constant 0 : i32
    %c0_i32_0 = arith.constant 0 : i32
    %c0_i32_1 = arith.constant 0 : i32
    return %c0_i32, %c0_i32_0 : i32, i32
  }
  func.func @transform_6(%arg0: i32) -> (i32, i32) {
    %c0_i32 = arith.constant 0 : i32
    %c0_i32_0 = arith.constant 0 : i32
    %c0_i32_1 = arith.constant 0 : i32
    return %c0_i32, %c0_i32_0 : i32, i32
  }
  func.func @transform_7(%arg0: i32) -> (i32, i32) {
    %c0_i32 = arith.constant 0 : i32
    %c0_i32_0 = arith.constant 0 : i32
    %c0_i32_1 = arith.constant 0 : i32
    return %c0_i32, %c0_i32_0 : i32, i32
  }
  func.func @transform_8(%arg0: i32) -> (i32, i32) {
    %c0_i32 = arith.constant 0 : i32
    %c0_i32_0 = arith.constant 0 : i32
    %c0_i32_1 = arith.constant 0 : i32
    return %c0_i32, %c0_i32_0 : i32, i32
  }
  func.func @transform_9(%arg0: i32) -> (i32, i32) {
    %c0_i32 = arith.constant 0 : i32
    %c0_i32_0 = arith.constant 0 : i32
    %c0_i32_1 = arith.constant 0 : i32
    return %c0_i32, %c0_i32_0 : i32, i32
  }
  func.func @transform_10(%arg0: i32) -> (i32, i32) {
    %c0_i32 = arith.constant 0 : i32
    %c0_i32_0 = arith.constant 0 : i32
    %c0_i32_1 = arith.constant 0 : i32
    return %c0_i32, %c0_i32_0 : i32, i32
  }
  func.func @transform_11(%arg0: i32) -> (i32, i32) {
    %c0_i32 = arith.constant 0 : i32
    %c0_i32_0 = arith.constant 0 : i32
    %c0_i32_1 = arith.constant 0 : i32
    return %c0_i32, %c0_i32_0 : i32, i32
  }
}

</mosaic_0001>

<bundles_post_ra>
// kernel: _lambda_.1
= control target key start
LH: loop header
LB: loop body
LE: loop exit
PB: predicated region body
PF: predicated region fallthrough
CT: control target
= control target key end

     0   :  { %s6421_s1 = inlined_call_operand.vmem [shape: bf16[128,128], index: 1, kind: input, shape index: {}]   ;;  %s6422_s0 = inlined_call_operand.vmem [shape: bf16[600,128], index: 0, kind: input, shape index: {}]   ;;  %s6423_s2 = inlined_call_operand.vmem [shape: f32[1,128], index: 2, kind: input, shape index: {}]   ;;  %s6424_s3 = inlined_call_operand.vmem [shape: bf16[128,128], index: 3, kind: input, shape index: {}]   ;;  %s6425_s7 = inlined_call_operand.vmem [shape: f32[1,128], index: 7, kind: input, shape index: {}, may-alias: {7,9}]   ;;  %s6426_s8 = inlined_call_operand.vmem [shape: f32[1,128], index: 8, kind: input, shape index: {}, may-alias: {8,10}]   ;;  %s6427_s4 = inlined_call_operand.vmem [shape: f32[1,128], index: 4, kind: input, shape index: {}]   ;;  %s6428_s5 = inlined_call_operand.vmem [shape: bf16[128,128], index: 5, kind: input, shape index: {}]   ;;  %s6429_s9 = inlined_call_operand.vmem [shape: f32[1,128], index: 9, kind: input, shape index: {}, may-alias: {7,9}]   ;;  %s6430_s10 = inlined_call_operand.vmem [shape: f32[1,128], index: 10, kind: input, shape index: {}, may-alias: {8,10}]   ;;  %s6431_s6 = inlined_call_operand.vmem [shape: f32[1,128], index: 6, kind: input, shape index: {}]   ;;  %s6432_s11 = inlined_call_operand.vmem [shape: f32[600,128], index: 11, kind: output, shape index: {}]  }
   0x1   :  { %v3317_v0 = vld [vmem:[%s6421_s1 + $0x38] sm:$0xff]   ;;  %v3318_v1 = vld [vmem:[%s6421_s1 + $0x30] sm:$0xff]   ;;  %v3319_v2 = vld [vmem:[%s6421_s1 + $0x28] sm:$0xff]  }
   0x2   :  { %3025 = vmatprep.subr.bf16.mxu0 %v3317_v0  ;;  %3301 = vmatprep.subr.bf16.mxu1 %v3317_v0  ;;  %v3320_v3 = vld [vmem:[%s6421_s1 + $0x20] sm:$0xff]   ;;  %v3321_v5 = vld [vmem:[%s6421_s1 + $0x18] sm:$0xff]   ;;  %v3322_v6 = vld [vmem:[%s6421_s1 + $0x10] sm:$0xff]  }
   0x3   :  { %3026 = vmatpush3.bf16.msra.mxu0 %v3317_v0  ;;  %3309 = vmatpush3.bf16.msra.mxu1 %v3317_v0  ;;  %v3325_v4 = vld [vmem:[%s6422_s0] sm:$0xff]   ;;  %v3323_v7 = vld [vmem:[%s6421_s1 + $0x8] sm:$0xff]   ;;  %v3327_v11 = vld [vmem:[%s6422_s0 + $0x10] sm:$0xff]  }
   0x4   :  { %3027 = vmatprep.subr.bf16.mxu0 %v3318_v1  ;;  %3302 = vmatprep.subr.bf16.mxu1 %v3318_v1  ;;  %v3324_v8 = vld [vmem:[%s6421_s1] sm:$0xff]   ;;  %v3326_v9 = vld [vmem:[%s6422_s0 + $0x8] sm:$0xff]   ;;  %v3347_v13 = vld [vmem:[%s6422_s0 + $0xb0] sm:$0xff]  }
   0x5   :  { %3041 = vmatprep.mubr.bf16.mxu0 %v3325_v4  ;;  %v3345_v10 = vld [vmem:[%s6422_s0 + $0xa0] sm:$0xff]   ;;  %v3346_v12 = vld [vmem:[%s6422_s0 + $0xa8] sm:$0xff]   ;;  %v3328_v14 = vld [vmem:[%s6422_s0 + $0x18] sm:$0xff]  }
   0x6   :  { %3081 = vmatprep.mubr.bf16.mxu1 %v3345_v10  ;;  %v3329_v15 = vld [vmem:[%s6422_s0 + $0x20] sm:$0xff]   ;;  %v3348_v16 = vld [vmem:[%s6422_s0 + $0xb8] sm:$0xff]   ;;  %v3330_v18 = vld [vmem:[%s6422_s0 + $0x28] sm:$0xff]  }
   0x7   :  { %3028 = vmatpush3.bf16.msra.mxu0 %v3318_v1  ;;  %3310 = vmatpush3.bf16.msra.mxu1 %v3318_v1  ;;  %v3349_v17 = vld [vmem:[%s6422_s0 + $0xc0] sm:$0xff]   ;;  %v3350_v19 = vld [vmem:[%s6422_s0 + $0xc8] sm:$0xff]   ;;  %v3331_v20 = vld [vmem:[%s6422_s0 + $0x30] sm:$0xff]  }
   0x8   :  { %3029 = vmatprep.subr.bf16.mxu0 %v3319_v2  ;;  %3303 = vmatprep.subr.bf16.mxu1 %v3319_v2  ;;  %v3351_v21 = vld [vmem:[%s6422_s0 + $0xd0] sm:$0xff]   ;;  %v3332_v22 = vld [vmem:[%s6422_s0 + $0x38] sm:$0xff]   ;;  %v3333_v24 = vld [vmem:[%s6422_s0 + $0x40] sm:$0xff]  }
   0x9   :  { %v3352_v23 = vld [vmem:[%s6422_s0 + $0xd8] sm:$0xff]   ;;  %v3353_v25 = vld [vmem:[%s6422_s0 + $0xe0] sm:$0xff]   ;;  %v3334_v26 = vld [vmem:[%s6422_s0 + $0x48] sm:$0xff]  }
   0xa   :  { %v3354_v27 = vld [vmem:[%s6422_s0 + $0xe8] sm:$0xff]   ;;  %v3335_v28 = vld [vmem:[%s6422_s0 + $0x50] sm:$0xff]   ;;  %v3336_v30 = vld [vmem:[%s6422_s0 + $0x58] sm:$0xff]  }
   0xb   :  { %3030 = vmatpush3.bf16.msra.mxu0 %v3319_v2  ;;  %3311 = vmatpush3.bf16.msra.mxu1 %v3319_v2  ;;  %v3355_v29 = vld [vmem:[%s6422_s0 + $0xf0] sm:$0xff]   ;;  %v3356_v31 = vld [vmem:[%s6422_s0 + $0xf8] sm:$0xff]   ;;  %v3337_v32 = vld [vmem:[%s6422_s0 + $0x60] sm:$0xff]  }
   0xc   :  { %3031 = vmatprep.subr.bf16.mxu0 %v3320_v3  ;;  %3304 = vmatprep.subr.bf16.mxu1 %v3320_v3  ;;  %v3357_v33 = vld [vmem:[%s6422_s0 + $0x100] sm:$0xff]   ;;  %v3338_v34 = vld [vmem:[%s6422_s0 + $0x68] sm:$0xff]   ;;  %v3339_v36 = vld [vmem:[%s6422_s0 + $0x70] sm:$0xff]  }
   0xd   :  { %v3358_v35 = vld [vmem:[%s6422_s0 + $0x108] sm:$0xff]   ;;  %v3359_v37 = vld [vmem:[%s6422_s0 + $0x110] sm:$0xff]   ;;  %v3340_v38 = vld [vmem:[%s6422_s0 + $0x78] sm:$0xff]  }
   0xe   :  { %v3360_v39 = vld [vmem:[%s6422_s0 + $0x118] sm:$0xff]   ;;  %v3341_v40 = vld [vmem:[%s6422_s0 + $0x80] sm:$0xff]   ;;  %v3342_v42 = vld [vmem:[%s6422_s0 + $0x88] sm:$0xff]  }
   0xf   :  { %3032 = vmatpush3.bf16.msra.mxu0 %v3320_v3  ;;  %3312 = vmatpush3.bf16.msra.mxu1 %v3320_v3  ;;  %v3361_v41 = vld [vmem:[%s6422_s0 + $0x120] sm:$0xff]   ;;  %v3362_v43 = vld [vmem:[%s6422_s0 + $0x128] ss:$0 sps:$4 sm:$0xff]   ;;  %v3343_v44 = vld [vmem:[%s6422_s0 + $0x90] sm:$0xff]  }
  0x10   :  { %3033 = vmatprep.subr.bf16.mxu0 %v3321_v5  ;;  %3305 = vmatprep.subr.bf16.mxu1 %v3321_v5  ;;  %v3344_v45 = vld [vmem:[%s6422_s0 + $0x98] sm:$0xff]   ;;  %v3590_v52 = vld [vmem:[%s6423_s2] ss:$0 sm:$0xff] }
  0x13   :  { %3034 = vmatpush3.bf16.msra.mxu0 %v3321_v5  ;;  %3313 = vmatpush3.bf16.msra.mxu1 %v3321_v5 }
  0x14   :  { %3035 = vmatprep.subr.bf16.mxu0 %v3322_v6  ;;  %3306 = vmatprep.subr.bf16.mxu1 %v3322_v6 }
  0x17   :  { %3036 = vmatpush3.bf16.msra.mxu0 %v3322_v6  ;;  %3314 = vmatpush3.bf16.msra.mxu1 %v3322_v6 }
  0x18   :  { %3037 = vmatprep.subr.bf16.mxu0 %v3323_v7  ;;  %3307 = vmatprep.subr.bf16.mxu1 %v3323_v7 }
  0x1b   :  { %3038 = vmatpush3.bf16.msra.mxu0 %v3323_v7  ;;  %3315 = vmatpush3.bf16.msra.mxu1 %v3323_v7 }
  0x1c   :  { %3039 = vmatprep.subr.bf16.mxu0 %v3324_v8  ;;  %3308 = vmatprep.subr.bf16.mxu1 %v3324_v8 }
  0x1f   :  { %3040 = vmatpush3.bf16.msra.mxu0 %v3324_v8  ;;  %3316 = vmatpush3.bf16.msra.mxu1 %v3324_v8 }
  0x22   :  { %3042 = vmatmul.mubr.bf16.vlgmr.msra.gmra.mxu0 %v3326_v9  ;;  %3082 = vmatmul.mubr.bf16.vlgmr.msra.gmra.mxu1 %v3346_v12 }
  0x23   :  { %3045 = vmatprep.mubr.bf16.mxu0 %v3327_v11  ;;  %3085 = vmatprep.mubr.bf16.mxu1 %v3347_v13 }
  0x2a   :  { %3046 = vmatmul.mubr.bf16.gmra.mxu0 %v3328_v14  ;;  %3086 = vmatmul.mubr.bf16.gmra.mxu1 %v3348_v16 }
  0x2b   :  { %3049 = vmatprep.mubr.bf16.mxu0 %v3329_v15  ;;  %3089 = vmatprep.mubr.bf16.mxu1 %v3349_v17 }
  0x32   :  { %3050 = vmatmul.mubr.bf16.gmra.mxu0 %v3330_v18  ;;  %3090 = vmatmul.mubr.bf16.gmra.mxu1 %v3350_v19 }
  0x33   :  { %3053 = vmatprep.mubr.bf16.mxu0 %v3331_v20  ;;  %3093 = vmatprep.mubr.bf16.mxu1 %v3351_v21 }
  0x3a   :  { %3054 = vmatmul.mubr.bf16.gmra.mxu0 %v3332_v22  ;;  %3094 = vmatmul.mubr.bf16.gmra.mxu1 %v3352_v23 }
  0x3b   :  { %3057 = vmatprep.mubr.bf16.mxu0 %v3333_v24  ;;  %3097 = vmatprep.mubr.bf16.mxu1 %v3353_v25 }
  0x42   :  { %3058 = vmatmul.mubr.bf16.gmra.mxu0 %v3334_v26  ;;  %3098 = vmatmul.mubr.bf16.gmra.mxu1 %v3354_v27 }
  0x43   :  { %3061 = vmatprep.mubr.bf16.mxu0 %v3335_v28  ;;  %3101 = vmatprep.mubr.bf16.mxu1 %v3355_v29 }
  0x4a   :  { %3062 = vmatmul.mubr.bf16.gmra.mxu0 %v3336_v30  ;;  %3102 = vmatmul.mubr.bf16.gmra.mxu1 %v3356_v31 }
  0x4b   :  { %3065 = vmatprep.mubr.bf16.mxu0 %v3337_v32  ;;  %3105 = vmatprep.mubr.bf16.mxu1 %v3357_v33 }
  0x52   :  { %3066 = vmatmul.mubr.bf16.gmra.mxu0 %v3338_v34  ;;  %3106 = vmatmul.mubr.bf16.gmra.mxu1 %v3358_v35 }
  0x53   :  { %3069 = vmatprep.mubr.bf16.mxu0 %v3339_v36  ;;  %3109 = vmatprep.mubr.bf16.mxu1 %v3359_v37 }
  0x5a   :  { %3070 = vmatmul.mubr.bf16.gmra.mxu0 %v3340_v38  ;;  %3110 = vmatmul.mubr.bf16.gmra.mxu1 %v3360_v39 }
  0x5b   :  { %3073 = vmatprep.mubr.bf16.mxu0 %v3341_v40  ;;  %3113 = vmatprep.mubr.bf16.mxu1 %v3361_v41 }
  0x62   :  { %3074 = vmatmul.mubr.bf16.gmra.mxu0 %v3342_v42  ;;  %3114 = vmatmul.mubr.bf16.gmra.mxu1 %v3362_v43 }
  0x63   :  { %3077 = vmatprep.mubr.bf16.mxu0 %v3343_v44 }
  0x6a   :  { %3078 = vmatmul.mubr.bf16.gmra.mxu0 %v3344_v45 }
  0xe2   :  { %v3043_v46 = vpop.f32.mrf.mxu0  ;;  %v3581_v47 = vpop.f32.mrf.mxu1 }
  0xe3   :  { %v3603_v59 = vadd.f32 %v3043_v46, %v3590_v52 }
  0xe4   :  { %v445_v48 = vpop.f32.mrf.mxu0  ;;  %v3583_v49 = vpop.f32.mrf.mxu1 }
  0xe5   :  { %v3595_v55 = vadd.f32 %v3590_v52, %v445_v48 }
  0xe6   :  { %v3044_v50 = vpop.f32.mrf.mxu0  ;;  %v3585_v51 = vpop.f32.mrf.mxu1 }
  0xe7   :  { %v3610_v63 = vadd.f32 %v3044_v50, %v3590_v52 }
  0xe8   :  { %v448_v53 = vpop.f32.mrf.mxu0  ;;  %v3592_v54 = vpop.f32.mrf.mxu1 }
  0xe9   :  { %v3598_v56 = vadd.f32 %v3590_v52, %v448_v53 }
  0xea   :  { %v3047_v57 = vpop.f32.mrf.mxu0  ;;  %v3600_v58 = vpop.f32.mrf.mxu1 }
  0xeb   :  { %v747_v60 = vadd.f32 %v3598_v56, %v3595_v55  ;;  %v3628_v11 = vadd.f32 %v3047_v57, %v3590_v52 }
  0xec   :  { %v461_v61 = vpop.f32.mrf.mxu0  ;;  %v3607_v62 = vpop.f32.mrf.mxu1 }
  0xed   :  { %v748_v0 = vadd.f32 %v747_v60, %v3603_v59  ;;  %v3617_v4 = vadd.f32 %v3590_v52, %v461_v61 }
  0xee   :  { %v3048_v1 = vpop.f32.mrf.mxu0  ;;  %v3613_v2 = vpop.f32.mrf.mxu1 }
  0xef   :  { %v749_v3 = vadd.f32 %v748_v0, %v3610_v63  ;;  %v3634_v15 = vadd.f32 %v3048_v1, %v3590_v52 }
  0xf0   :  { %v464_v5 = vpop.f32.mrf.mxu0  ;;  %v3619_v6 = vpop.f32.mrf.mxu1 }
  0xf1   :  { %v750_v7 = vadd.f32 %v749_v3, %v3617_v4  ;;  %v3623_v8 = vadd.f32 %v3590_v52, %v464_v5 }
  0xf2   :  { %v3051_v9 = vpop.f32.mrf.mxu0  ;;  %v3625_v10 = vpop.f32.mrf.mxu1 }
  0xf3   :  { %v751_v12 = vadd.f32 %v750_v7, %v3623_v8  ;;  %v3652_v27 = vadd.f32 %v3051_v9, %v3590_v52 }
  0xf4   :  { %v477_v13 = vpop.f32.mrf.mxu0  ;;  %v3631_v14 = vpop.f32.mrf.mxu1 }
  0xf5   :  { %v752_v16 = vadd.f32 %v751_v12, %v3628_v11  ;;  %v3641_v20 = vadd.f32 %v3590_v52, %v477_v13 }
  0xf6   :  { %v3052_v17 = vpop.f32.mrf.mxu0  ;;  %v3637_v18 = vpop.f32.mrf.mxu1 }
  0xf7   :  { %v753_v19 = vadd.f32 %v752_v16, %v3634_v15  ;;  %v3658_v31 = vadd.f32 %v3052_v17, %v3590_v52 }
  0xf8   :  { %v480_v21 = vpop.f32.mrf.mxu0  ;;  %v3643_v22 = vpop.f32.mrf.mxu1 }
  0xf9   :  { %v754_v23 = vadd.f32 %v753_v19, %v3641_v20  ;;  %v3647_v24 = vadd.f32 %v3590_v52, %v480_v21 }
  0xfa   :  { %v3055_v25 = vpop.f32.mrf.mxu0  ;;  %v3649_v26 = vpop.f32.mrf.mxu1 }
  0xfb   :  { %v755_v28 = vadd.f32 %v754_v23, %v3647_v24  ;;  %v3676_v43 = vadd.f32 %v3055_v25, %v3590_v52 }
  0xfc   :  { %v493_v29 = vpop.f32.mrf.mxu0  ;;  %v3655_v30 = vpop.f32.mrf.mxu1 }
  0xfd   :  { %v756_v32 = vadd.f32 %v755_v28, %v3652_v27  ;;  %v3665_v36 = vadd.f32 %v3590_v52, %v493_v29  ;;  %6553 = vst [vmem:[#allocation3_spill] sm:$0xff] %v3676_v43 }
  0xfe   :  { %v3056_v33 = vpop.f32.mrf.mxu0  ;;  %v3661_v34 = vpop.f32.mrf.mxu1 }
  0xff   :  { %v757_v35 = vadd.f32 %v756_v32, %v3658_v31  ;;  %v3682_v48 = vadd.f32 %v3056_v33, %v3590_v52 }
 0x100   :  { %v496_v37 = vpop.f32.mrf.mxu0  ;;  %v3667_v38 = vpop.f32.mrf.mxu1 }
 0x101   :  { %v758_v39 = vadd.f32 %v757_v35, %v3665_v36  ;;  %v3671_v40 = vadd.f32 %v3590_v52, %v496_v37  ;;  %6554 = vst [vmem:[#allocation4_spill] sm:$0xff] %v3682_v48 }
 0x102   :  { %v3059_v41 = vpop.f32.mrf.mxu0  ;;  %v3673_v42 = vpop.f32.mrf.mxu1 }
 0x103   :  { %6552 = vst [vmem:[#allocation2_spill] sm:$0xff] %v3671_v40  ;;  %v759_v44 = vadd.f32 %v758_v39, %v3671_v40  ;;  %v3700_v12 = vadd.f32 %v3059_v41, %v3590_v52 }
 0x104   :  { %v509_v45 = vpop.f32.mrf.mxu0  ;;  %v3679_v46 = vpop.f32.mrf.mxu1 }
 0x105   :  { %v760_v50 = vadd.f32 %v759_v44, %v3676_v43  ;;  %v3688_v60 = vadd.f32 %v3590_v52, %v509_v45  ;;  %6557 = vst [vmem:[#allocation7_spill] sm:$0xff] %v3700_v12 }
 0x106   :  { %v3060_v53 = vpop.f32.mrf.mxu0  ;;  %v3685_v57 = vpop.f32.mrf.mxu1 }
 0x107   :  { %6555 = vst [vmem:[#allocation5_spill] sm:$0xff] %v3688_v60  ;;  %v761_v61 = vadd.f32 %v760_v50, %v3682_v48  ;;  %v3706_v19 = vadd.f32 %v3060_v53, %v3590_v52 }
 0x108   :  { %v512_v0 = vpop.f32.mrf.mxu0  ;;  %v3691_v1 = vpop.f32.mrf.mxu1 }
 0x109   :  { %v762_v3 = vadd.f32 %v761_v61, %v3688_v60  ;;  %v3695_v5 = vadd.f32 %v3590_v52, %v512_v0  ;;  %6558 = vst [vmem:[#allocation8_spill] sm:$0xff] %v3706_v19 }
 0x10a   :  { %v3063_v7 = vpop.f32.mrf.mxu0  ;;  %v3697_v9 = vpop.f32.mrf.mxu1 }
 0x10b   :  { %6556 = vst [vmem:[#allocation6_spill] sm:$0xff] %v3695_v5  ;;  %v763_v13 = vadd.f32 %v762_v3, %v3695_v5  ;;  %v3724_v44 = vadd.f32 %v3063_v7, %v3590_v52 }
 0x10c   :  { %v525_v16 = vpop.f32.mrf.mxu0  ;;  %v3703_v17 = vpop.f32.mrf.mxu1 }
 0x10d   :  { %v764_v21 = vadd.f32 %v763_v13, %v3700_v12  ;;  %v3712_v28 = vadd.f32 %v3590_v52, %v525_v16  ;;  %6561 = vst [vmem:[#allocation11_spill] sm:$0xff] %v3724_v44 }
 0x10e   :  { %v3064_v23 = vpop.f32.mrf.mxu0  ;;  %v3709_v25 = vpop.f32.mrf.mxu1 }
 0x10f   :  { %6559 = vst [vmem:[#allocation9_spill] sm:$0xff] %v3712_v28  ;;  %v765_v29 = vadd.f32 %v764_v21, %v3706_v19  ;;  %v3730_v61 = vadd.f32 %v3064_v23, %v3590_v52 }
 0x110   :  { %v528_v32 = vpop.f32.mrf.mxu0  ;;  %v3715_v33 = vpop.f32.mrf.mxu1 }
 0x111   :  { %v766_v35 = vadd.f32 %v765_v29, %v3712_v28  ;;  %v3719_v37 = vadd.f32 %v3590_v52, %v528_v32  ;;  %6562 = vst [vmem:[#allocation12_spill] sm:$0xff] %v3730_v61 }
 0x112   :  { %v3067_v39 = vpop.f32.mrf.mxu0  ;;  %v3721_v41 = vpop.f32.mrf.mxu1 }
 0x113   :  { %6560 = vst [vmem:[#allocation10_spill] sm:$0xff] %v3719_v37  ;;  %v767_v45 = vadd.f32 %v766_v35, %v3719_v37 }
 0x114   :  { %v541_v50 = vpop.f32.mrf.mxu0  ;;  %v3727_v53 = vpop.f32.mrf.mxu1 }
 0x115   :  { %v768_v0 = vadd.f32 %v767_v45, %v3724_v44  ;;  %v3736_v16 = vadd.f32 %v3590_v52, %v541_v50  ;;  %v3748_v45 = vadd.f32 %v3067_v39, %v3590_v52 }
 0x116   :  { %v3068_v3 = vpop.f32.mrf.mxu0  ;;  %v3733_v13 = vpop.f32.mrf.mxu1 }
 0x117   :  { %6563 = vst [vmem:[#allocation13_spill] sm:$0xff] %v3736_v16  ;;  %v769_v21 = vadd.f32 %v768_v0, %v3730_v61  ;;  %6565 = vst [vmem:[#allocation15_spill] sm:$0xff] %v3748_v45  ;;  %v3754_v0 = vadd.f32 %v3068_v3, %v3590_v52 }
 0x118   :  { %v544_v7 = vpop.f32.mrf.mxu0  ;;  %v3739_v29 = vpop.f32.mrf.mxu1 }
 0x119   :  { %v770_v32 = vadd.f32 %v769_v21, %v3736_v16  ;;  %v3743_v35 = vadd.f32 %v3590_v52, %v544_v7  ;;  %6566 = vst [vmem:[#allocation16_spill] sm:$0xff] %v3754_v0 }
 0x11a   :  { %v3071_v23 = vpop.f32.mrf.mxu0  ;;  %v3745_v37 = vpop.f32.mrf.mxu1 }
 0x11b   :  { %6564 = vst [vmem:[#allocation14_spill] sm:$0xff] %v3743_v35  ;;  %v771_v44 = vadd.f32 %v770_v32, %v3743_v35 }
 0x11c   :  { %v557_v50 = vpop.f32.mrf.mxu0  ;;  %v3751_v28 = vpop.f32.mrf.mxu1 }
 0x11d   :  { %v772_v61 = vadd.f32 %v771_v44, %v3748_v45  ;;  %v3760_v7 = vadd.f32 %v3590_v52, %v557_v50  ;;  %v3772_v44 = vadd.f32 %v3071_v23, %v3590_v52 }
 0x11e   :  { %v3072_v21 = vpop.f32.mrf.mxu0  ;;  %v3757_v16 = vpop.f32.mrf.mxu1 }
 0x11f   :  { %6567 = vst [vmem:[#allocation17_spill] sm:$0xff] %v3760_v7  ;;  %v773_v19 = vadd.f32 %v772_v61, %v3754_v0  ;;  %6569 = vst [vmem:[#allocation19_spill] sm:$0xff] %v3772_v44  ;;  %v3778_v61 = vadd.f32 %v3072_v21, %v3590_v52 }
 0x120   :  { %v560_v39 = vpop.f32.mrf.mxu0  ;;  %v3763_v12 = vpop.f32.mrf.mxu1 }
 0x121   :  { %v774_v32 = vadd.f32 %v773_v19, %v3760_v7  ;;  %v3767_v35 = vadd.f32 %v3590_v52, %v560_v39 }
 0x122   :  { %v3075_v3 = vpop.f32.mrf.mxu0  ;;  %v3769_v5 = vpop.f32.mrf.mxu1 }
 0x123   :  { %6568 = vst [vmem:[#allocation18_spill] sm:$0xff] %v3767_v35  ;;  %v775_v45 = vadd.f32 %v774_v32, %v3767_v35  ;;  %v3790_v40 = vadd.f32 %v3075_v3, %v3590_v52 }
 0x124   :  { %v573_v50 = vpop.f32.mrf.mxu0  ;;  %v3775_v60 = vpop.f32.mrf.mxu1 }
 0x125   :  { %v776_v0 = vadd.f32 %v775_v45, %v3772_v44  ;;  %v3782_v39 = vadd.f32 %v3590_v52, %v573_v50 }
 0x126   :  { %v3076_v19 = vpop.f32.mrf.mxu0  ;;  %v3116_v7 = vpop.f32.mrf.mxu1 }
 0x127   :  { %6570 = vst [vmem:[#allocation20_spill] sm:$0xff] %v3782_v39  ;;  %v777_v48 = vadd.f32 %v776_v0, %v3778_v61  ;;  %v3794_v7 = vadd.f32 %v3076_v19, %v3590_v52 }
 0x128   :  { %v576_v43 = vpop.f32.mrf.mxu0 }
 0x129   :  { %v778_v23 = vadd.f32 %v777_v48, %v3782_v39  ;;  %v3787_v32 = vadd.f32 %v3590_v52, %v576_v43 }
 0x12a   :  { %v3079_v35 = vpop.f32.mrf.mxu0 }
 0x12b   :  { %6571 = vst [vmem:[#allocation21_spill] sm:$0xff] %v3787_v32  ;;  %v779_v21 = vadd.f32 %v778_v23, %v3787_v32  ;;  %v3806_v23 = vadd.f32 %v3079_v35, %v3590_v52 }
 0x12c   :  { %v589_v45 = vpop.f32.mrf.mxu0 }
 0x12d   :  { %v780_v50 = vadd.f32 %v779_v21, %v3790_v40  ;;  %v3798_v0 = vadd.f32 %v3590_v52, %v589_v45  ;;  %v3815_v45 = vadd.f32 %v3590_v52, %v3583_v49 }
 0x12e   :  { %v3080_v44 = vpop.f32.mrf.mxu0 }
 0x12f   :  { %v781_v48 = vadd.f32 %v780_v50, %v3794_v7  ;;  %v3810_v32 = vadd.f32 %v3080_v44, %v3590_v52 }
 0x130   :  { %v592_v43 = vpop.f32.mrf.mxu0 }
 0x131   :  { %v782_v39 = vadd.f32 %v781_v48, %v3798_v0  ;;  %v3803_v3 = vadd.f32 %v3590_v52, %v592_v43  ;;  %v3820_v48 = vadd.f32 %v3590_v52, %v3592_v54  ;;  %v3830_v43 = vadd.f32 %v3585_v51, %v3590_v52 }
 0x133   :  { %v783_v19 = vadd.f32 %v782_v39, %v3803_v3  ;;  %v3825_v39 = vadd.f32 %v3581_v47, %v3590_v52  ;;  %v3841_v47 = vadd.f32 %v3590_v52, %v3619_v6 }
 0x135   :  { %v784_v21 = vadd.f32 %v783_v19, %v3806_v23  ;;  %v3835_v19 = vadd.f32 %v3590_v52, %v3607_v62 }
 0x137   :  { %v785_v50 = vadd.f32 %v784_v21, %v3810_v32 }
 0x139   :  { %v786_v35 = vadd.f32 %v785_v50, %v3815_v45  ;;  %v3845_v50 = vadd.f32 %v3600_v58, %v3590_v52  ;;  %v3861_v58 = vadd.f32 %v3590_v52, %v3643_v22 }
 0x13b   :  { %v787_v44 = vadd.f32 %v786_v35, %v3820_v48  ;;  %v3850_v35 = vadd.f32 %v3613_v2, %v3590_v52  ;;  %6572 = vst [vmem:[#allocation22_spill] sm:$0xff] %v3861_v58 }
 0x13d   :  { %v788_v49 = vadd.f32 %v787_v44, %v3825_v39  ;;  %v3855_v44 = vadd.f32 %v3590_v52, %v3631_v14 }
 0x13f   :  { %v789_v54 = vadd.f32 %v788_v49, %v3830_v43 }
 0x141   :  { %v790_v21 = vadd.f32 %v789_v54, %v3835_v19  ;;  %v3865_v54 = vadd.f32 %v3625_v10, %v3590_v52  ;;  %v3881_v10 = vadd.f32 %v3590_v52, %v3667_v38 }
 0x143   :  { %v791_v51 = vadd.f32 %v790_v21, %v3841_v47  ;;  %6573 = vst [vmem:[#allocation23_spill] sm:$0xff] %v3865_v54  ;;  %v3870_v21 = vadd.f32 %v3637_v18, %v3590_v52  ;;  %6576 = vst [vmem:[#allocation26_spill] sm:$0xff] %v3881_v10 }
 0x145   :  { %v792_v62 = vadd.f32 %v791_v51, %v3845_v50  ;;  %6574 = vst [vmem:[#allocation24_spill] sm:$0xff] %v3870_v21  ;;  %v3875_v51 = vadd.f32 %v3590_v52, %v3655_v30 }
 0x147   :  { %v793_v49 = vadd.f32 %v792_v62, %v3850_v35  ;;  %6575 = vst [vmem:[#allocation25_spill] sm:$0xff] %v3875_v51 }
 0x149   :  { %v794_v6 = vadd.f32 %v793_v49, %v3855_v44  ;;  %v3885_v49 = vadd.f32 %v3649_v26, %v3590_v52  ;;  %v673_v26 = vadd.f32 %v3590_v52, %v3691_v1 }
 0x14b   :  { %v795_v2 = vadd.f32 %v794_v6, %v3861_v58  ;;  %6577 = vst [vmem:[#allocation27_spill] sm:$0xff] %v3885_v49  ;;  %v3890_v6 = vadd.f32 %v3661_v34, %v3590_v52  ;;  %v681_v34 = vadd.f32 %v3685_v57, %v3590_v52  ;;  %v702_v57 = vadd.f32 %v3590_v52, %v3727_v53 }
 0x14c   :  { %v721_v53 = vadd.f32 %v3590_v52, %v3763_v12 }
 0x14d   :  { %v796_v14 = vadd.f32 %v795_v2, %v3865_v54  ;;  %6578 = vst [vmem:[#allocation28_spill] sm:$0xff] %v3890_v6  ;;  %v3895_v2 = vadd.f32 %v3590_v52, %v3679_v46 }
 0x14f   :  { %v797_v62 = vadd.f32 %v796_v14, %v3870_v21  ;;  %6579 = vst [vmem:[#allocation29_spill] sm:$0xff] %v3895_v2 }
 0x151   :  { %v798_v22 = vadd.f32 %v797_v62, %v3875_v51  ;;  %v678_v62 = vadd.f32 %v3673_v42, %v3590_v52  ;;  %v697_v42 = vadd.f32 %v3709_v25, %v3590_v52  ;;  %v718_v25 = vadd.f32 %v3590_v52, %v3751_v28 }
 0x153   :  { %v799_v18 = vadd.f32 %v798_v22, %v3881_v10 }
 0x155   :  { %v800_v30 = vadd.f32 %v799_v18, %v3885_v49  ;;  %v686_v18 = vadd.f32 %v3590_v52, %v3703_v17  ;;  %v705_v17 = vadd.f32 %v3590_v52, %v3739_v29 }
 0x157   :  { %v801_v14 = vadd.f32 %v800_v30, %v3890_v6  ;;  %v689_v30 = vadd.f32 %v3590_v52, %v3715_v33 }
 0x159   :  { %v802_v38 = vadd.f32 %v801_v14, %v3895_v2  ;;  %v694_v14 = vadd.f32 %v3697_v9, %v3590_v52  ;;  %v713_v9 = vadd.f32 %v3733_v13, %v3590_v52  ;;  %v734_v13 = vadd.f32 %v3590_v52, %v3775_v60 }
 0x15b   :  { %v803_v22 = vadd.f32 %v802_v38, %v673_v26 }
 0x15d   :  { %v804_v10 = vadd.f32 %v803_v22, %v678_v62 }
 0x15f   :  { %v805_v46 = vadd.f32 %v804_v10, %v681_v34  ;;  %v710_v10 = vadd.f32 %v3721_v41, %v3590_v52  ;;  %v729_v41 = vadd.f32 %v3757_v16, %v3590_v52 }
 0x161   :  { %v806_v49 = vadd.f32 %v805_v46, %v686_v18 }
 0x163   :  { %v807_v1 = vadd.f32 %v806_v49, %v689_v30 }
 0x165   :  { %v808_v38 = vadd.f32 %v807_v1, %v694_v14 }
 0x167   :  { %v809_v22 = vadd.f32 %v808_v38, %v697_v42  ;;  %v726_v38 = vadd.f32 %v3745_v37, %v3590_v52 }
 0x169   :  { %v810_v2 = vadd.f32 %v809_v22, %v702_v57  ;;  %v736_v22 = vpop.f32.mrf.mxu1 }
 0x16a   :  { %v737_v28 = vadd.f32 %v3590_v52, %v736_v22 }
 0x16b   :  { %v811_v33 = vadd.f32 %v810_v2, %v705_v17 }
 0x16d   :  { %v812_v49 = vadd.f32 %v811_v33, %v710_v10 }
 0x16f   :  { %v813_v46 = vadd.f32 %v812_v49, %v713_v9  ;;  %v742_v49 = vadd.f32 %v3769_v5, %v3590_v52 }
 0x171   :  { %v814_v1 = vadd.f32 %v813_v46, %v718_v25 }
 0x173   :  { %v815_v29 = vadd.f32 %v814_v1, %v721_v53 }
 0x175   :  { %v816_v2 = vadd.f32 %v815_v29, %v726_v38 }
 0x177   :  { %v817_v33 = vadd.f32 %v816_v2, %v729_v41 }
 0x179   :  { %v818_v6 = vadd.f32 %v817_v33, %v734_v13 }
 0x17b   :  { %v819_v12 = vadd.f32 %v818_v6, %v737_v28 }
 0x17d   :  { %v820_v46 = vadd.f32 %v819_v12, %v742_v49 }
 0x17f   :  { %v821_v51 = vrot.slane %v820_v46, 4 }
 0x181   :  { %v822_v37 = vadd.f32 %v821_v51, %v820_v46 }
 0x183   :  { %v823_v1 = vrot.slane %v822_v37, 2 }
 0x185   :  { %v824_v21 = vadd.f32 %v823_v1, %v822_v37 }
 0x187   :  { %v825_v54 = vrot.slane %v824_v21, 1 }
 0x189   :  { %v826_v16 = vadd.f32 %v825_v54, %v824_v21 }
 0x18b   :  { %v3934_v29 = vmul.f32 0.0016666667, %v826_v16 }
 0x18d   :  { %v3937_v58 = vsub.f32 %v673_v26, %v3934_v29  ;;  %v3940_v60 = vsub.f32 %v678_v62, %v3934_v29  ;;  %v3943_v2 = vsub.f32 %v681_v34, %v3934_v29  ;;  %v3946_v52 = vsub.f32 %v686_v18, %v3934_v29 }
 0x18e   :  { %v3949_v5 = vsub.f32 %v689_v30, %v3934_v29  ;;  %v3952_v51 = vsub.f32 %v694_v14, %v3934_v29  ;;  %v3955_v54 = vsub.f32 %v697_v42, %v3934_v29  ;;  %v3958_v21 = vsub.f32 %v702_v57, %v3934_v29 }
 0x18f   :  { %v3961_v6 = vsub.f32 %v705_v17, %v3934_v29  ;;  %v3964_v26 = vsub.f32 %v710_v10, %v3934_v29  ;;  %v3967_v62 = vsub.f32 %v713_v9, %v3934_v29  ;;  %v3970_v34 = vsub.f32 %v718_v25, %v3934_v29 }
 0x190   :  { %v3973_v18 = vsub.f32 %v721_v53, %v3934_v29  ;;  %v3976_v30 = vsub.f32 %v726_v38, %v3934_v29  ;;  %v3979_v14 = vsub.f32 %v729_v41, %v3934_v29  ;;  %v3982_v42 = vsub.f32 %v734_v13, %v3934_v29 }
 0x191   :  { %6580 = vst [vmem:[#allocation30_spill] sm:$0xff] %v3970_v34  ;;  %v3985_v57 = vsub.f32 %v737_v28, %v3934_v29  ;;  %v3988_v17 = vsub.f32 %v742_v49, %v3934_v29  ;;  %v3992_v10 = vsub.f32 %v3595_v55, %v3934_v29  ;;  %v3996_v9 = vsub.f32 %v3598_v56, %v3934_v29 }
 0x192   :  { %6581 = vst [vmem:[#allocation31_spill] sm:$0xff] %v3973_v18  ;;  %6582 = vst [vmem:[#allocation32_spill] sm:$0xff] %v3976_v30  ;;  %v4000_v25 = vsub.f32 %v3603_v59, %v3934_v29  ;;  %v4008_v41 = vsub.f32 %v3610_v63, %v3934_v29  ;;  %v4012_v55 = vsub.f32 %v3617_v4, %v3934_v29 }
 0x193   :  { %6583 = vst [vmem:[#allocation33_spill] sm:$0xff] %v3979_v14  ;;  %6584 = vst [vmem:[#allocation34_spill] sm:$0xff] %v3982_v42  ;;  %v903_v53 = vmul.f32 %v3992_v10, %v3992_v10  ;;  %v904_v38 = vmul.f32 %v3996_v9, %v3996_v9  ;;  %v4018_v59 = vsub.f32 %v3623_v8, %v3934_v29 }
 0x194   :  { %6585 = vst [vmem:[#allocation35_spill] sm:$0xff] %v3988_v17  ;;  %v905_v56 = vmul.f32 %v4000_v25, %v4000_v25  ;;  %v906_v13 = vmul.f32 %v4008_v41, %v4008_v41  ;;  %v4024_v63 = vsub.f32 %v3628_v11, %v3934_v29  ;;  %v907_v4 = vmul.f32 %v4012_v55, %v4012_v55 }
 0x195   :  { %v978_v22 = vadd.f32 %v904_v38, %v903_v53  ;;  %v4030_v49 = vsub.f32 %v3634_v15, %v3934_v29  ;;  %v908_v8 = vmul.f32 %v4018_v59, %v4018_v59  ;;  %v4036_v46 = vsub.f32 %v3641_v20, %v3934_v29 }
 0x196   :  { %v909_v11 = vmul.f32 %v4024_v63, %v4024_v63  ;;  %v4042_v1 = vsub.f32 %v3647_v24, %v3934_v29  ;;  %v4048_v53 = vsub.f32 %v3652_v27, %v3934_v29 }
 0x197   :  { %v979_v33 = vadd.f32 %v978_v22, %v905_v56  ;;  %v910_v15 = vmul.f32 %v4030_v49, %v4030_v49  ;;  %v911_v20 = vmul.f32 %v4036_v46, %v4036_v46  ;;  %v4054_v56 = vsub.f32 %v3658_v31, %v3934_v29 }
 0x198   :  { %v912_v24 = vmul.f32 %v4042_v1, %v4042_v1  ;;  %v913_v27 = vmul.f32 %v4048_v53, %v4048_v53 }
 0x199   :  { %v980_v28 = vadd.f32 %v979_v33, %v906_v13  ;;  %v4060_v13 = vsub.f32 %v3665_v36, %v3934_v29  ;;  %v914_v31 = vmul.f32 %v4054_v56, %v4054_v56 }
 0x19b   :  { %v981_v12 = vadd.f32 %v980_v28, %v907_v4  ;;  %v6586_v4 = vld [vmem:[#allocation2_spill] sm:$0xff]  ;;  %v915_v36 = vmul.f32 %v4060_v13, %v4060_v13 }
 0x19c   :  { %v4066_v28 = vsub.f32 %v6586_v4, %v3934_v29  ;;  %v6594_v4 = vld [vmem:[#allocation6_spill] sm:$0xff] }
 0x19d   :  { %v982_v37 = vadd.f32 %v981_v12, %v908_v8  ;;  %v6588_v12 = vld [vmem:[#allocation3_spill] sm:$0xff] }
 0x19e   :  { %6587 = vst [vmem:[#allocation2_spill] sm:$0xff] %v4066_v28 }
 0x19f   :  { %v983_v16 = vadd.f32 %v982_v37, %v909_v11  ;;  %v4072_v11 = vsub.f32 %v6588_v12, %v3934_v29  ;;  %v4090_v12 = vsub.f32 %v6594_v4, %v3934_v29  ;;  %v6600_v4 = vld [vmem:[#allocation9_spill] sm:$0xff] }
 0x1a1   :  { %v984_v38 = vadd.f32 %v983_v16, %v910_v15  ;;  %6589 = vst [vmem:[#allocation3_spill] sm:$0xff] %v4072_v11  ;;  %v6590_v15 = vld [vmem:[#allocation4_spill] sm:$0xff]  ;;  %6595 = vst [vmem:[#allocation6_spill] sm:$0xff] %v4090_v12 }
 0x1a2   :  { %v4078_v16 = vsub.f32 %v6590_v15, %v3934_v29  ;;  %v6596_v15 = vld [vmem:[#allocation7_spill] sm:$0xff] }
 0x1a3   :  { %v985_v22 = vadd.f32 %v984_v38, %v911_v20  ;;  %v916_v20 = vmul.f32 %v4066_v28, %v4066_v28  ;;  %v4096_v28 = vsub.f32 %v6596_v15, %v3934_v29  ;;  %v6602_v15 = vld [vmem:[#allocation10_spill] sm:$0xff] }
 0x1a4   :  { %6591 = vst [vmem:[#allocation4_spill] sm:$0xff] %v4078_v16 }
 0x1a5   :  { %v986_v33 = vadd.f32 %v985_v22, %v912_v24  ;;  %v6592_v24 = vld [vmem:[#allocation5_spill] sm:$0xff]  ;;  %6597 = vst [vmem:[#allocation7_spill] sm:$0xff] %v4096_v28 }
 0x1a6   :  { %v4084_v22 = vsub.f32 %v6592_v24, %v3934_v29  ;;  %v6598_v24 = vld [vmem:[#allocation8_spill] sm:$0xff] }
 0x1a7   :  { %v987_v8 = vadd.f32 %v986_v33, %v913_v27  ;;  %v917_v27 = vmul.f32 %v4072_v11, %v4072_v11  ;;  %v4102_v11 = vsub.f32 %v6598_v24, %v3934_v29  ;;  %v6604_v24 = vld [vmem:[#allocation11_spill] sm:$0xff] }
 0x1a8   :  { %6593 = vst [vmem:[#allocation5_spill] sm:$0xff] %v4084_v22 }
 0x1a9   :  { %v988_v37 = vadd.f32 %v987_v8, %v914_v31  ;;  %v918_v31 = vmul.f32 %v4078_v16, %v4078_v16  ;;  %6599 = vst [vmem:[#allocation8_spill] sm:$0xff] %v4102_v11  ;;  %v4108_v16 = vsub.f32 %v6600_v4, %v3934_v29  ;;  %v6606_v4 = vld [vmem:[#allocation12_spill] sm:$0xff] }
 0x1ab   :  { %v989_v38 = vadd.f32 %v988_v37, %v915_v36  ;;  %v919_v36 = vmul.f32 %v4084_v22, %v4084_v22  ;;  %6601 = vst [vmem:[#allocation9_spill] sm:$0xff] %v4108_v16  ;;  %v4114_v22 = vsub.f32 %v6602_v15, %v3934_v29  ;;  %v6607_v15 = vld [vmem:[#allocation13_spill] sm:$0xff] }
 0x1ad   :  { %v990_v33 = vadd.f32 %v989_v38, %v916_v20  ;;  %v920_v20 = vmul.f32 %v4090_v12, %v4090_v12  ;;  %6603 = vst [vmem:[#allocation10_spill] sm:$0xff] %v4114_v22  ;;  %v4120_v12 = vsub.f32 %v6604_v24, %v3934_v29  ;;  %v6609_v24 = vld [vmem:[#allocation14_spill] sm:$0xff] }
 0x1af   :  { %v991_v8 = vadd.f32 %v990_v33, %v917_v27  ;;  %v921_v27 = vmul.f32 %v4096_v28, %v4096_v28  ;;  %6605 = vst [vmem:[#allocation11_spill] sm:$0xff] %v4120_v12  ;;  %v4126_v28 = vsub.f32 %v6606_v4, %v3934_v29  ;;  %v6611_v4 = vld [vmem:[#allocation15_spill] sm:$0xff] }
 0x1b1   :  { %v992_v37 = vadd.f32 %v991_v8, %v918_v31  ;;  %v922_v31 = vmul.f32 %v4102_v11, %v4102_v11  ;;  %v4132_v11 = vsub.f32 %v6607_v15, %v3934_v29  ;;  %v6612_v15 = vld [vmem:[#allocation16_spill] sm:$0xff] }
 0x1b3   :  { %v993_v38 = vadd.f32 %v992_v37, %v919_v36  ;;  %v923_v36 = vmul.f32 %v4108_v16, %v4108_v16  ;;  %6608 = vst [vmem:[#allocation12_spill] sm:$0xff] %v4132_v11  ;;  %v4138_v16 = vsub.f32 %v6609_v24, %v3934_v29 }
 0x1b5   :  { %v994_v33 = vadd.f32 %v993_v38, %v920_v20  ;;  %v924_v20 = vmul.f32 %v4114_v22, %v4114_v22  ;;  %6610 = vst [vmem:[#allocation13_spill] sm:$0xff] %v4138_v16  ;;  %v4144_v22 = vsub.f32 %v6611_v4, %v3934_v29 }
 0x1b7   :  { %v995_v8 = vadd.f32 %v994_v33, %v921_v27  ;;  %v925_v27 = vmul.f32 %v4120_v12, %v4120_v12  ;;  %v4150_v12 = vsub.f32 %v6612_v15, %v3934_v29  ;;  %v929_v4 = vmul.f32 %v4144_v22, %v4144_v22 }
 0x1b9   :  { %v996_v37 = vadd.f32 %v995_v8, %v922_v31  ;;  %v926_v31 = vmul.f32 %v4126_v28, %v4126_v28  ;;  %6613 = vst [vmem:[#allocation14_spill] sm:$0xff] %v4150_v12 }
 0x1bb   :  { %v997_v38 = vadd.f32 %v996_v37, %v923_v36  ;;  %v927_v36 = vmul.f32 %v4132_v11, %v4132_v11 }
 0x1bd   :  { %v998_v33 = vadd.f32 %v997_v38, %v924_v20  ;;  %v928_v20 = vmul.f32 %v4138_v16, %v4138_v16  ;;  %v3364_v16 = vld [vmem:[%s6424_s3 + $0x30] sm:$0xff]  }
 0x1bf   :  { %v999_v8 = vadd.f32 %v998_v33, %v925_v27  ;;  %v3363_v27 = vld [vmem:[%s6424_s3 + $0x38] sm:$0xff]  }
 0x1c0   :  { %v6614_v33 = vld [vmem:[#allocation17_spill] sm:$0xff]  ;;  %3117 = vmatprep.subr.bf16.mxu1 %v3363_v27 }
 0x1c1   :  { %v1000_v37 = vadd.f32 %v999_v8, %v926_v31  ;;  %v4159_v24 = vsub.f32 %v6614_v33, %v3934_v29  ;;  %v6616_v8 = vld [vmem:[#allocation18_spill] sm:$0xff]  ;;  %3118 = vmatpush3.bf16.msra.mxu1 %v3363_v27  ;;  %v6617_v33 = vld [vmem:[#allocation19_spill] sm:$0xff] }
 0x1c2   :  { %v4165_v15 = vsub.f32 %v6616_v8, %v3934_v29  ;;  %v4174_v11 = vsub.f32 %v6617_v33, %v3934_v29  ;;  %3119 = vmatprep.subr.bf16.mxu1 %v3364_v16  ;;  %v4180_v8 = vsub.f32 %v3778_v61, %v3934_v29  ;;  %v6620_v33 = vld [vmem:[#allocation20_spill] sm:$0xff]  ;;  %v6622_v61 = vld [vmem:[#allocation21_spill] sm:$0xff] }
 0x1c3   :  { %v1001_v38 = vadd.f32 %v1000_v37, %v927_v36  ;;  %6615 = vst [vmem:[#allocation15_spill] sm:$0xff] %v4159_v24  ;;  %v930_v36 = vmul.f32 %v4150_v12, %v4150_v12  ;;  %v4189_v12 = vsub.f32 %v6620_v33, %v3934_v29  ;;  %v4204_v33 = vsub.f32 %v3790_v40, %v3934_v29 }
 0x1c4   :  { %6618 = vst [vmem:[#allocation16_spill] sm:$0xff] %v4174_v11  ;;  %6619 = vst [vmem:[#allocation17_spill] sm:$0xff] %v4180_v8  ;;  %v932_v27 = vmul.f32 %v4165_v15, %v4165_v15  ;;  %v4219_v40 = vsub.f32 %v3798_v0, %v3934_v29  ;;  %v4234_v0 = vsub.f32 %v3806_v23, %v3934_v29 }
 0x1c5   :  { %v1002_v31 = vadd.f32 %v1001_v38, %v928_v20  ;;  %v931_v20 = vmul.f32 %v4159_v24, %v4159_v24  ;;  %3120 = vmatpush3.bf16.msra.mxu1 %v3364_v16  ;;  %6621 = vst [vmem:[#allocation18_spill] sm:$0xff] %v4189_v12  ;;  %v4195_v24 = vsub.f32 %v6622_v61, %v3934_v29 }
 0x1c6   :  { %v934_v16 = vmul.f32 %v4180_v8, %v4180_v8  ;;  %v4210_v61 = vsub.f32 %v3794_v7, %v3934_v29  ;;  %v4225_v7 = vsub.f32 %v3803_v3, %v3934_v29  ;;  %v4240_v3 = vsub.f32 %v3810_v32, %v3934_v29 }
 0x1c7   :  { %v1003_v37 = vadd.f32 %v1002_v31, %v929_v4  ;;  %v3365_v31 = vld [vmem:[%s6424_s3 + $0x28] sm:$0xff]   ;;  %6623 = vst [vmem:[#allocation19_spill] sm:$0xff] %v4195_v24  ;;  %v4249_v23 = vsub.f32 %v3815_v45, %v3934_v29  ;;  %v4255_v32 = vsub.f32 %v3820_v48, %v3934_v29  ;;  %v4264_v45 = vsub.f32 %v3825_v39, %v3934_v29 }
 0x1c8   :  { %3121 = vmatprep.subr.bf16.mxu1 %v3365_v31  ;;  %v4270_v48 = vsub.f32 %v3830_v43, %v3934_v29 }
 0x1c9   :  { %v1004_v38 = vadd.f32 %v1003_v37, %v930_v36  ;;  %v933_v36 = vmul.f32 %v4174_v11, %v4174_v11  ;;  %3122 = vmatpush3.bf16.msra.mxu1 %v3365_v31  ;;  %v936_v31 = vmul.f32 %v4195_v24, %v4195_v24  ;;  %v945_v39 = vmul.f32 %v4264_v45, %v4264_v45 }
 0x1ca   :  { %v946_v43 = vmul.f32 %v4270_v48, %v4270_v48 }
 0x1cb   :  { %v1005_v4 = vadd.f32 %v1004_v38, %v931_v20  ;;  %v3366_v38 = vld [vmem:[%s6424_s3 + $0x20] sm:$0xff]  }
 0x1cc   :  { %3123 = vmatprep.subr.bf16.mxu1 %v3366_v38 }
 0x1cd   :  { %v1006_v37 = vadd.f32 %v1005_v4, %v932_v27  ;;  %v935_v27 = vmul.f32 %v4189_v12, %v4189_v12  ;;  %3124 = vmatpush3.bf16.msra.mxu1 %v3366_v38  ;;  %v938_v38 = vmul.f32 %v4210_v61, %v4210_v61 }
 0x1cf   :  { %v1007_v20 = vadd.f32 %v1006_v37, %v933_v36  ;;  %v3367_v37 = vld [vmem:[%s6424_s3 + $0x18] sm:$0xff]  }
 0x1d0   :  { %3125 = vmatprep.subr.bf16.mxu1 %v3367_v37 }
 0x1d1   :  { %v1008_v4 = vadd.f32 %v1007_v20, %v934_v16  ;;  %v937_v16 = vmul.f32 %v4204_v33, %v4204_v33  ;;  %3126 = vmatpush3.bf16.msra.mxu1 %v3367_v37  ;;  %v940_v37 = vmul.f32 %v4225_v7, %v4225_v7 }
 0x1d3   :  { %v1009_v36 = vadd.f32 %v1008_v4, %v935_v27  ;;  %v3368_v4 = vld [vmem:[%s6424_s3 + $0x10] sm:$0xff]  }
 0x1d4   :  { %3127 = vmatprep.subr.bf16.mxu1 %v3368_v4 }
 0x1d5   :  { %v1010_v20 = vadd.f32 %v1009_v36, %v936_v31  ;;  %v939_v31 = vmul.f32 %v4219_v40, %v4219_v40  ;;  %3128 = vmatpush3.bf16.msra.mxu1 %v3368_v4  ;;  %v942_v4 = vmul.f32 %v4240_v3, %v4240_v3 }
 0x1d7   :  { %v1011_v27 = vadd.f32 %v1010_v20, %v937_v16  ;;  %v3369_v20 = vld [vmem:[%s6424_s3 + $0x8] sm:$0xff]  }
 0x1d8   :  { %3129 = vmatprep.subr.bf16.mxu1 %v3369_v20 }
 0x1d9   :  { %v1012_v36 = vadd.f32 %v1011_v27, %v938_v38  ;;  %v941_v38 = vmul.f32 %v4234_v0, %v4234_v0  ;;  %3130 = vmatpush3.bf16.msra.mxu1 %v3369_v20  ;;  %v944_v20 = vmul.f32 %v4255_v32, %v4255_v32 }
 0x1db   :  { %v1013_v16 = vadd.f32 %v1012_v36, %v939_v31  ;;  %v3370_v36 = vld [vmem:[%s6424_s3] sm:$0xff]  }
 0x1dc   :  { %3131 = vmatprep.subr.bf16.mxu1 %v3370_v36 }
 0x1dd   :  { %v1014_v27 = vadd.f32 %v1013_v16, %v940_v37  ;;  %v943_v37 = vmul.f32 %v4249_v23, %v4249_v23  ;;  %3132 = vmatpush3.bf16.msra.mxu1 %v3370_v36 }
 0x1df   :  { %v1015_v31 = vadd.f32 %v1014_v27, %v941_v38  ;;  %v4276_v27 = vsub.f32 %v3835_v19, %v3934_v29 }
 0x1e1   :  { %v1016_v16 = vadd.f32 %v1015_v31, %v942_v4  ;;  %v4282_v4 = vsub.f32 %v3841_v47, %v3934_v29  ;;  %v947_v19 = vmul.f32 %v4276_v27, %v4276_v27 }
 0x1e3   :  { %v1017_v38 = vadd.f32 %v1016_v16, %v943_v37  ;;  %v4288_v37 = vsub.f32 %v3845_v50, %v3934_v29  ;;  %v4294_v16 = vsub.f32 %v3850_v35, %v3934_v29  ;;  %v948_v47 = vmul.f32 %v4282_v4, %v4282_v4 }
 0x1e5   :  { %v1018_v24 = vadd.f32 %v1017_v38, %v944_v20  ;;  %6624 = vst [vmem:[#allocation20_spill] sm:$0xff] %v4294_v16  ;;  %v4300_v38 = vsub.f32 %v3855_v44, %v3934_v29  ;;  %v949_v50 = vmul.f32 %v4288_v37, %v4288_v37  ;;  %v950_v35 = vmul.f32 %v4294_v16, %v4294_v16 }
 0x1e7   :  { %v1019_v31 = vadd.f32 %v1018_v24, %v945_v39  ;;  %6625 = vst [vmem:[#allocation21_spill] sm:$0xff] %v4300_v38  ;;  %v6626_v39 = vld [vmem:[#allocation22_spill] sm:$0xff]  ;;  %v951_v44 = vmul.f32 %v4300_v38, %v4300_v38 }
 0x1e8   :  { %v4306_v12 = vsub.f32 %v6626_v39, %v3934_v29  ;;  %v6632_v39 = vld [vmem:[#allocation25_spill] sm:$0xff] }
 0x1e9   :  { %v1020_v36 = vadd.f32 %v1019_v31, %v946_v43  ;;  %v6628_v31 = vld [vmem:[#allocation23_spill] sm:$0xff]  ;;  %v4324_v16 = vsub.f32 %v6632_v39, %v3934_v29  ;;  %v6636_v39 = vld [vmem:[#allocation28_spill] sm:$0xff] }
 0x1ea   :  { %6627 = vst [vmem:[#allocation22_spill] sm:$0xff] %v4306_v12  ;;  %v4312_v8 = vsub.f32 %v6628_v31, %v3934_v29  ;;  %v6633_v31 = vld [vmem:[#allocation26_spill] sm:$0xff] }
 0x1eb   :  { %v1021_v20 = vadd.f32 %v1020_v36, %v947_v19  ;;  %v6630_v36 = vld [vmem:[#allocation24_spill] sm:$0xff]  ;;  %v4330_v38 = vsub.f32 %v6633_v31, %v3934_v29  ;;  %v6637_v31 = vld [vmem:[#allocation29_spill] sm:$0xff] }
 0x1ec   :  { %6629 = vst [vmem:[#allocation23_spill] sm:$0xff] %v4312_v8  ;;  %v4318_v11 = vsub.f32 %v6630_v36, %v3934_v29  ;;  %v6635_v36 = vld [vmem:[#allocation27_spill] sm:$0xff] }
 0x1ed   :  { %v1022_v24 = vadd.f32 %v1021_v20, %v948_v47  ;;  %v952_v47 = vmul.f32 %v4306_v12, %v4306_v12  ;;  %6634 = vst [vmem:[#allocation25_spill] sm:$0xff] %v4330_v38  ;;  %v4336_v12 = vsub.f32 %v6635_v36, %v3934_v29 }
 0x1ee   :  { %6631 = vst [vmem:[#allocation24_spill] sm:$0xff] %v4318_v11 }
 0x1ef   :  { %v1023_v43 = vadd.f32 %v1022_v24, %v949_v50  ;;  %v953_v50 = vmul.f32 %v4312_v8, %v4312_v8  ;;  %v4342_v8 = vsub.f32 %v6636_v39, %v3934_v29 }
 0x1f1   :  { %v1024_v19 = vadd.f32 %v1023_v43, %v950_v35  ;;  %v954_v35 = vmul.f32 %v4318_v11, %v4318_v11  ;;  %v4348_v11 = vsub.f32 %v6637_v31, %v3934_v29  ;;  %v958_v36 = vmul.f32 %v4342_v8, %v4342_v8 }
 0x1f2   :  { %v961_v29 = vmul.f32 %v3940_v60, %v3940_v60  ;;  %v962_v31 = vmul.f32 %v3943_v2, %v3943_v2 }
 0x1f3   :  { %v1025_v20 = vadd.f32 %v1024_v19, %v951_v44  ;;  %v955_v44 = vmul.f32 %v4324_v16, %v4324_v16 }
 0x1f5   :  { %v1026_v24 = vadd.f32 %v1025_v20, %v952_v47  ;;  %v956_v47 = vmul.f32 %v4330_v38, %v4330_v38  ;;  %v960_v38 = vmul.f32 %v3937_v58, %v3937_v58 }
 0x1f7   :  { %v1027_v43 = vadd.f32 %v1026_v24, %v953_v50  ;;  %v957_v50 = vmul.f32 %v4336_v12, %v4336_v12 }
 0x1f9   :  { %v1028_v19 = vadd.f32 %v1027_v43, %v954_v35  ;;  %v959_v43 = vmul.f32 %v4348_v11, %v4348_v11 }
 0x1fb   :  { %v1029_v20 = vadd.f32 %v1028_v19, %v955_v44 }
 0x1fd   :  { %v1030_v24 = vadd.f32 %v1029_v20, %v956_v47  ;;  %v963_v20 = vmul.f32 %v3946_v52, %v3946_v52 }
 0x1ff   :  { %v1031_v35 = vadd.f32 %v1030_v24, %v957_v50  ;;  %v964_v24 = vmul.f32 %v3949_v5, %v3949_v5 }
 0x201   :  { %v1032_v39 = vadd.f32 %v1031_v35, %v958_v36  ;;  %v965_v35 = vmul.f32 %v3952_v51, %v3952_v51 }
 0x203   :  { %v1033_v44 = vadd.f32 %v1032_v39, %v959_v43  ;;  %v966_v39 = vmul.f32 %v3955_v54, %v3955_v54 }
 0x205   :  { %v1034_v19 = vadd.f32 %v1033_v44, %v960_v38  ;;  %v967_v44 = vmul.f32 %v3958_v21, %v3958_v21 }
 0x207   :  { %v1035_v47 = vadd.f32 %v1034_v19, %v961_v29  ;;  %v968_v19 = vmul.f32 %v3961_v6, %v3961_v6 }
 0x209   :  { %v1036_v50 = vadd.f32 %v1035_v47, %v962_v31  ;;  %v969_v47 = vmul.f32 %v3964_v26, %v3964_v26 }
 0x20b   :  { %v1037_v36 = vadd.f32 %v1036_v50, %v963_v20  ;;  %v970_v50 = vmul.f32 %v3967_v62, %v3967_v62 }
 0x20d   :  { %v1038_v43 = vadd.f32 %v1037_v36, %v964_v24  ;;  %v971_v36 = vmul.f32 %v3970_v34, %v3970_v34 }
 0x20f   :  { %v1039_v38 = vadd.f32 %v1038_v43, %v965_v35  ;;  %v972_v43 = vmul.f32 %v3973_v18, %v3973_v18 }
 0x211   :  { %v1040_v29 = vadd.f32 %v1039_v38, %v966_v39  ;;  %v973_v38 = vmul.f32 %v3976_v30, %v3976_v30 }
 0x213   :  { %v1041_v31 = vadd.f32 %v1040_v29, %v967_v44  ;;  %v974_v29 = vmul.f32 %v3979_v14, %v3979_v14 }
 0x215   :  { %v1042_v20 = vadd.f32 %v1041_v31, %v968_v19  ;;  %v975_v31 = vmul.f32 %v3982_v42, %v3982_v42  ;;  %v1063_v42 = vlaneseq }
 0x217   :  { %v1043_v24 = vadd.f32 %v1042_v20, %v969_v47  ;;  %v976_v20 = vmul.f32 %v3985_v57, %v3985_v57 }
 0x219   :  { %v1044_v35 = vadd.f32 %v1043_v24, %v970_v50  ;;  %v977_v24 = vmul.f32 %v3988_v17, %v3988_v17  ;;  %v6653_v17 = vld [vmem:[#allocation15_spill] sm:$0xff] }
 0x21b   :  { %v1045_v39 = vadd.f32 %v1044_v35, %v971_v36 }
 0x21d   :  { %v1046_v44 = vadd.f32 %v1045_v39, %v972_v43 }
 0x21f   :  { %v1047_v19 = vadd.f32 %v1046_v44, %v973_v38 }
 0x221   :  { %v1048_v47 = vadd.f32 %v1047_v19, %v974_v29  ;;  %v4392_v29 = vshrl.u32 %v1063_v42, 7 }
 0x223   :  { %v1049_v50 = vadd.f32 %v1048_v47, %v975_v31  ;;  %6638 = vst [vmem:[#allocation26_spill] sm:$0xff] %v4392_v29  ;;  %v1061_v31 = vld [vmem:[%s6425_s7] sm:$0x1] }
 0x225   :  { %v1050_v36 = vadd.f32 %v1049_v50, %v976_v20  ;;  %v6490_v20 = vsub.s32 0, %v4392_v29  ;;  %v6651_v29 = vld [vmem:[#allocation13_spill] sm:$0xff] }
 0x227   :  { %v1051_v35 = vadd.f32 %v1050_v36, %v977_v24 }
 0x229   :  { %v1052_v18 = vrot.slane %v1051_v35, 4 }
 0x22b   :  { %v1053_v30 = vadd.f32 %v1052_v18, %v1051_v35  ;;  %v6642_v35 = vld [vmem:[#allocation4_spill] sm:$0xff] }
 0x22d   :  { %v1054_v43 = vrot.slane %v1053_v30, 2 }
 0x22f   :  { %v1055_v39 = vadd.f32 %v1054_v43, %v1053_v30  ;;  %v6643_v43 = vld [vmem:[#allocation5_spill] sm:$0xff] }
 0x231   :  { %v1056_v34 = vrot.slane %v1055_v39, 1 }
 0x233   :  { %v1057_v14 = vadd.f32 %v1056_v34, %v1055_v39  ;;  %v6644_v39 = vld [vmem:[#allocation6_spill] sm:$0xff] }
 0x235   :  { %v1058_v38 = vmul.f32 0.0016666667, %v1057_v14 }
 0x237   :  { %v1059_v44 = vadd.f32 1e-05, %v1058_v38  ;;  %v6645_v38 = vld [vmem:[#allocation7_spill] sm:$0xff] }
 0x239   :  { %3379 = vrsqrt.f32 %v1059_v44 }
 0x246   :  { %v3380_v19 = vpop.eup %3379 }
 0x247   :  { %v1062_v47 = vmul.f32 %v3380_v19, %v1061_v31  ;;  %v6646_v19 = vld [vmem:[#allocation8_spill] sm:$0xff] }
 0x249   :  { %v4400_v18 = vrot.slane %v1062_v47, %v6490_v20  ;;  %v6647_v47 = vld [vmem:[#allocation9_spill] sm:$0xff]  ;;  %v6650_v20 = vld [vmem:[#allocation12_spill] sm:$0xff] }
 0x24b   :  { %v4404_v34 = vmul.f32 %v4400_v18, %v3985_v57  ;;  %v1067_v30 = vmul.f32 %v4400_v18, %v3992_v10  ;;  %v1068_v14 = vmul.f32 %v4400_v18, %v3996_v9  ;;  %v1069_v42 = vmul.f32 %v4400_v18, %v4000_v25 }
 0x24c   :  { %v1070_v50 = vmul.f32 %v4400_v18, %v4008_v41  ;;  %v1071_v24 = vmul.f32 %v4400_v18, %v4012_v55  ;;  %v1072_v36 = vmul.f32 %v4400_v18, %v4018_v59  ;;  %v1073_v57 = vmul.f32 %v4400_v18, %v4024_v63  ;;  %v6640_v63 = vld [vmem:[#allocation2_spill] sm:$0xff] }
 0x24d   :  { %6639 = vst [vmem:[#allocation27_spill] sm:$0xff] %v4404_v34  ;;  %v4422_v10 = vmul.f32 %v4400_v18, %v4030_v49  ;;  %v4426_v9 = vmul.f32 %v4400_v18, %v4036_v46  ;;  %v4430_v25 = vmul.f32 %v4400_v18, %v4042_v1  ;;  %v4434_v41 = vmul.f32 %v4400_v18, %v4048_v53  ;;  %v6641_v46 = vld [vmem:[#allocation3_spill] sm:$0xff]  ;;  %v6652_v34 = vld [vmem:[#allocation14_spill] sm:$0xff] }
 0x24e   :  { %v4438_v55 = vmul.f32 %v4400_v18, %v4054_v56  ;;  %v4442_v59 = vmul.f32 %v4400_v18, %v4060_v13  ;;  %v4446_v49 = vmul.f32 %v4400_v18, %v6640_v63  ;;  %v4450_v1 = vmul.f32 %v4400_v18, %v6641_v46  ;;  %v6648_v46 = vld [vmem:[#allocation10_spill] sm:$0xff] }
 0x24f   :  { %v4454_v53 = vmul.f32 %v4400_v18, %v6642_v35  ;;  %v4458_v56 = vmul.f32 %v4400_v18, %v6643_v43  ;;  %v4462_v13 = vmul.f32 %v4400_v18, %v6644_v39  ;;  %v4466_v44 = vmul.f32 %v4400_v18, %v6645_v38  ;;  %v6649_v43 = vld [vmem:[#allocation11_spill] sm:$0xff] }
 0x250   :  { %v4470_v31 = vmul.f32 %v4400_v18, %v6646_v19  ;;  %v4474_v63 = vmul.f32 %v4400_v18, %v6647_v47  ;;  %v4478_v35 = vmul.f32 %v4400_v18, %v6648_v46  ;;  %v4482_v39 = vmul.f32 %v4400_v18, %v6649_v43 }
 0x251   :  { %v4486_v38 = vmul.f32 %v4400_v18, %v4126_v28  ;;  %v4490_v19 = vmul.f32 %v4400_v18, %v6650_v20  ;;  %v4494_v47 = vmul.f32 %v4400_v18, %v6651_v29  ;;  %v4498_v46 = vmul.f32 %v4400_v18, %v4144_v22 }
 0x252   :  { %v4502_v43 = vmul.f32 %v4400_v18, %v6652_v34  ;;  %v4506_v28 = vmul.f32 %v4400_v18, %v6653_v17  ;;  %v4510_v20 = vmul.f32 %v4400_v18, %v4165_v15  ;;  %v4514_v29 = vmul.f32 %v4400_v18, %v4204_v33  ;;  %v4535_v33 = vld [vmem:[%s6426_s8] ss:$0 sm:$0xff] }
 0x253   :  { %v4518_v22 = vmul.f32 %v4400_v18, %v4210_v61  ;;  %v4522_v34 = vmul.f32 %v4400_v18, %v4219_v40  ;;  %v4526_v17 = vmul.f32 %v4400_v18, %v4225_v7  ;;  %v4530_v15 = vmul.f32 %v4400_v18, %v4234_v0 }
 0x254   :  { %6654 = vst [vmem:[#allocation28_spill] sm:$0xff] %v4506_v28  ;;  %6655 = vst [vmem:[#allocation29_spill] sm:$0xff] %v4510_v20  ;;  %v4539_v61 = vmul.f32 %v4400_v18, %v4240_v3  ;;  %v4543_v40 = vmul.f32 %v4400_v18, %v4249_v23  ;;  %v4547_v7 = vmul.f32 %v4400_v18, %v4255_v32  ;;  %v6660_v28 = vld [vmem:[#allocation20_spill] sm:$0xff] }
 0x255   :  { %v4551_v0 = vmul.f32 %v4400_v18, %v4264_v45  ;;  %v4555_v20 = vmul.f32 %v4400_v18, %v4270_v48  ;;  %v4559_v3 = vmul.f32 %v4400_v18, %v4276_v27  ;;  %v4563_v23 = vmul.f32 %v4400_v18, %v4282_v4 }
 0x256   :  { %v4567_v32 = vmul.f32 %v4400_v18, %v4288_v37  ;;  %v4571_v45 = vmul.f32 %v4400_v18, %v6660_v28  ;;  %v4591_v28 = vmul.f32 %v4400_v18, %v4324_v16  ;;  %v4608_v16 = vmul.f32 %v4400_v18, %v4342_v8 }
 0x257   :  { %6656 = vst [vmem:[#allocation2_spill] sm:$0xff] %v4551_v0  ;;  %6657 = vst [vmem:[#allocation3_spill] sm:$0xff] %v4555_v20  ;;  %v6662_v0 = vld [vmem:[#allocation21_spill] sm:$0xff]  ;;  %v6664_v20 = vld [vmem:[#allocation22_spill] sm:$0xff] }
 0x258   :  { %6658 = vst [vmem:[#allocation4_spill] sm:$0xff] %v4559_v3  ;;  %6659 = vst [vmem:[#allocation5_spill] sm:$0xff] %v4563_v23  ;;  %v4575_v48 = vmul.f32 %v4400_v18, %v6662_v0  ;;  %v4579_v27 = vmul.f32 %v4400_v18, %v6664_v20  ;;  %v6666_v3 = vld [vmem:[#allocation23_spill] sm:$0xff]  ;;  %v6668_v23 = vld [vmem:[#allocation24_spill] sm:$0xff]  ;;  %v1152_v20 = vadd.f32 %v4535_v33, %v1070_v50 }
 0x259   :  { %6661 = vst [vmem:[#allocation6_spill] sm:$0xff] %v4571_v45  ;;  %v4583_v4 = vmul.f32 %v4400_v18, %v6666_v3  ;;  %v4587_v37 = vmul.f32 %v4400_v18, %v6668_v23  ;;  %6670 = vst [vmem:[#allocation11_spill] sm:$0xff] %v4591_v28  ;;  %v6671_v45 = vld [vmem:[#allocation25_spill] sm:$0xff]  ;;  %v1150_v3 = vadd.f32 %v4535_v33, %v1068_v14 }
 0x25a   :  { %6663 = vst [vmem:[#allocation7_spill] sm:$0xff] %v4575_v48  ;;  %6665 = vst [vmem:[#allocation8_spill] sm:$0xff] %v4579_v27  ;;  %v4595_v0 = vmul.f32 %v4400_v18, %v6671_v45  ;;  %v1151_v48 = vadd.f32 %v4535_v33, %v1069_v42  ;;  %v1149_v27 = vadd.f32 %v4535_v33, %v1067_v30  ;;  %v1227_v42 = vmax.f32 %v1152_v20, 0.0 }
 0x25b   :  { %6667 = vst [vmem:[#allocation9_spill] sm:$0xff] %v4583_v4  ;;  %6669 = vst [vmem:[#allocation10_spill] sm:$0xff] %v4587_v37  ;;  %v1153_v4 = vadd.f32 %v4535_v33, %v1071_v24  ;;  %v4604_v23 = vmul.f32 %v4400_v18, %v4336_v12  ;;  %v1225_v50 = vmax.f32 %v1150_v3, 0.0  ;;  %v4613_v30 = vmul.f32 %v4400_v18, %v4348_v11 }
 0x25c   :  { %6672 = vst [vmem:[#allocation12_spill] sm:$0xff] %v4595_v0  ;;  %6673 = vst [vmem:[#allocation13_spill] sm:$0xff] %v4608_v16  ;;  %v1226_v45 = vmax.f32 %v1151_v48, 0.0  ;;  %v1154_v0 = vadd.f32 %v4535_v33, %v1072_v36  ;;  %v1224_v28 = vmax.f32 %v1149_v27, 0.0  ;;  %v4617_v14 = vmul.f32 %v4400_v18, %v3937_v58 }
 0x25d   :  { %v1228_v37 = vmax.f32 %v1153_v4, 0.0  ;;  %v1155_v24 = vadd.f32 %v4535_v33, %v1073_v57  ;;  %v1156_v36 = vadd.f32 %v4535_v33, %v4422_v10  ;;  %v1157_v48 = vadd.f32 %v4535_v33, %v4426_v9 }
 0x25e   :  { %v1229_v12 = vmax.f32 %v1154_v0, 0.0  ;;  %v1300_v8 = vpack.c.bf16 %v1227_v42, %v1226_v45  ;;  %v1299_v16 = vpack.c.bf16 %v1225_v50, %v1224_v28  ;;  %v4626_v27 = vmul.f32 %v4400_v18, %v3940_v60 }
 0x25f   :  { %v4630_v11 = vmul.f32 %v4400_v18, %v3943_v2  ;;  %v4634_v58 = vmul.f32 %v4400_v18, %v3946_v52  ;;  %v1158_v57 = vadd.f32 %v4535_v33, %v4430_v25  ;;  %v4640_v10 = vmul.f32 %v4400_v18, %v3949_v5 }
 0x260   :  { %v4644_v9 = vmul.f32 %v4400_v18, %v3952_v51  ;;  %v4648_v60 = vmul.f32 %v4400_v18, %v3955_v54  ;;  %3133 = vmatprep.mubr.bf16.mxu1 %v1299_v16  ;;  %v1301_v2 = vpack.c.bf16 %v1229_v12, %v1228_v37  ;;  %v4652_v52 = vmul.f32 %v4400_v18, %v3958_v21  ;;  %v6674_v16 = vld [vmem:[#allocation30_spill] sm:$0xff] }
 0x261   :  { %v4656_v25 = vmul.f32 %v4400_v18, %v3961_v6  ;;  %v4660_v5 = vmul.f32 %v4400_v18, %v3964_v26  ;;  %v4664_v51 = vmul.f32 %v4400_v18, %v3967_v62  ;;  %3134 = vmatmul.mubr.bf16.vlgmr.msra.gmra.mxu1 %v1300_v8  ;;  %v1230_v54 = vmax.f32 %v1155_v24, 0.0 }
 0x262   :  { %3137 = vmatprep.mubr.bf16.mxu1 %v1301_v2  ;;  %v1231_v4 = vmax.f32 %v1156_v36, 0.0  ;;  %v1232_v37 = vmax.f32 %v1157_v48, 0.0  ;;  %v1159_v21 = vadd.f32 %v4535_v33, %v4434_v41  ;;  %v1233_v28 = vmax.f32 %v1158_v57, 0.0 }
 0x263   :  { %v1160_v6 = vadd.f32 %v4535_v33, %v4438_v55  ;;  %v1161_v26 = vadd.f32 %v4535_v33, %v4442_v59  ;;  %v1162_v0 = vadd.f32 %v4535_v33, %v4446_v49  ;;  %v1163_v62 = vadd.f32 %v4535_v33, %v4450_v1  ;;  %v6675_v59 = vld [vmem:[#allocation31_spill] sm:$0xff] }
 0x264   :  { %v1164_v20 = vadd.f32 %v4535_v33, %v4454_v53  ;;  %v1165_v3 = vadd.f32 %v4535_v33, %v4458_v56  ;;  %v1166_v41 = vadd.f32 %v4535_v33, %v4462_v13  ;;  %v4684_v55 = vmul.f32 %v4400_v18, %v6674_v16 }
 0x265   :  { %v4688_v45 = vmul.f32 %v4400_v18, %v6675_v59  ;;  %v1167_v49 = vadd.f32 %v4535_v33, %v4466_v44  ;;  %v1168_v1 = vadd.f32 %v4535_v33, %v4470_v31  ;;  %v1302_v53 = vpack.c.bf16 %v1231_v4, %v1230_v54 }
 0x266   :  { %v1234_v42 = vmax.f32 %v1159_v21, 0.0  ;;  %v1169_v56 = vadd.f32 %v4535_v33, %v4474_v63  ;;  %v1170_v13 = vadd.f32 %v4535_v33, %v4478_v35  ;;  %v1303_v50 = vpack.c.bf16 %v1233_v28, %v1232_v37  ;;  %v6676_v35 = vld [vmem:[#allocation32_spill] sm:$0xff]  ;;  %v6677_v28 = vld [vmem:[#allocation33_spill] sm:$0xff] }
 0x267   :  { %v1235_v12 = vmax.f32 %v1160_v6, 0.0  ;;  %v1236_v24 = vmax.f32 %v1161_v26, 0.0  ;;  %v1237_v8 = vmax.f32 %v1162_v0, 0.0  ;;  %v1238_v36 = vmax.f32 %v1163_v62, 0.0 }
 0x268   :  { %v1239_v48 = vmax.f32 %v1164_v20, 0.0  ;;  %v1240_v57 = vmax.f32 %v1165_v3, 0.0  ;;  %v1241_v2 = vmax.f32 %v1166_v41, 0.0  ;;  %v1242_v44 = vmax.f32 %v1167_v49, 0.0 }
 0x269   :  { %3138 = vmatmul.mubr.bf16.gmra.mxu1 %v1302_v53  ;;  %v1243_v16 = vmax.f32 %v1168_v1, 0.0  ;;  %v4700_v31 = vadd.f32 %v4535_v33, %v4482_v39  ;;  %v4704_v63 = vadd.f32 %v4535_v33, %v4486_v38  ;;  %v4708_v54 = vmul.f32 %v4400_v18, %v6676_v35  ;;  %v6678_v39 = vld [vmem:[#allocation34_spill] sm:$0xff]  ;;  %v6679_v38 = vld [vmem:[#allocation35_spill] sm:$0xff] }
 0x26a   :  { %3141 = vmatprep.mubr.bf16.mxu1 %v1303_v50  ;;  %v1244_v4 = vmax.f32 %v1169_v56, 0.0  ;;  %v1245_v37 = vmax.f32 %v1170_v13, 0.0  ;;  %v4712_v21 = vadd.f32 %v4535_v33, %v4490_v19  ;;  %v4716_v6 = vmul.f32 %v4400_v18, %v6677_v28 }
 0x26b   :  { %v4720_v26 = vmul.f32 %v4400_v18, %v6678_v39  ;;  %v4724_v0 = vmul.f32 %v4400_v18, %v6679_v38  ;;  %v1304_v62 = vpack.c.bf16 %v1235_v12, %v1234_v42  ;;  %v1305_v20 = vpack.c.bf16 %v1237_v8, %v1236_v24  ;;  %v6682_v38 = vld [vmem:[#allocation4_spill] sm:$0xff] }
 0x26c   :  { %v1306_v3 = vpack.c.bf16 %v1239_v48, %v1238_v36  ;;  %v1307_v41 = vpack.c.bf16 %v1241_v2, %v1240_v57  ;;  %v4728_v19 = vadd.f32 %v4535_v33, %v4494_v47  ;;  %v4730_v59 = vpack.c.bf16 %v1243_v16, %v1242_v44  ;;  %v6680_v16 = vld [vmem:[#allocation2_spill] sm:$0xff] }
 0x26d   :  { %v1246_v49 = vmax.f32 %v4700_v31, 0.0  ;;  %v1247_v1 = vmax.f32 %v4704_v63, 0.0  ;;  %v1183_v53 = vadd.f32 %v4535_v33, %v4514_v29  ;;  %v4736_v56 = vpack.c.bf16 %v1245_v37, %v1244_v4  ;;  %v6681_v37 = vld [vmem:[#allocation3_spill] sm:$0xff]  ;;  %v6695_v63 = vld [vmem:[#allocation16_spill] sm:$0xff] }
 0x26e   :  { %v1248_v42 = vmax.f32 %v4712_v21, 0.0  ;;  %v4741_v13 = vadd.f32 %v4535_v33, %v4498_v46  ;;  %v1184_v47 = vadd.f32 %v4535_v33, %v4518_v22  ;;  %v4747_v50 = vadd.f32 %v4535_v33, %v4502_v43 }
 0x26f   :  { %v1258_v12 = vmax.f32 %v1183_v53, 0.0  ;;  %v1185_v24 = vadd.f32 %v4535_v33, %v4522_v34  ;;  %v1186_v29 = vadd.f32 %v4535_v33, %v4526_v17  ;;  %v1249_v8 = vmax.f32 %v4728_v19, 0.0 }
 0x270   :  { %v1259_v36 = vmax.f32 %v1184_v47, 0.0  ;;  %v1187_v46 = vadd.f32 %v4535_v33, %v4530_v15  ;;  %v1188_v22 = vadd.f32 %v4535_v33, %v4539_v61  ;;  %v1189_v57 = vadd.f32 %v4535_v33, %v4543_v40 }
 0x271   :  { %3142 = vmatmul.mubr.bf16.gmra.mxu1 %v1304_v62  ;;  %v1260_v48 = vmax.f32 %v1185_v24, 0.0  ;;  %v1261_v43 = vmax.f32 %v1186_v29, 0.0  ;;  %v1190_v34 = vadd.f32 %v4535_v33, %v4547_v7  ;;  %v1191_v15 = vadd.f32 %v4535_v33, %v6680_v16  ;;  %v6683_v62 = vld [vmem:[#allocation5_spill] sm:$0xff]  ;;  %v6684_v24 = vld [vmem:[#allocation6_spill] sm:$0xff] }
 0x272   :  { %3145 = vmatprep.mubr.bf16.mxu1 %v1305_v20  ;;  %v4762_v17 = vpack.c.bf16 %v1259_v36, %v1258_v12  ;;  %v1262_v2 = vmax.f32 %v1187_v46, 0.0  ;;  %v1263_v44 = vmax.f32 %v1188_v22, 0.0  ;;  %v1264_v61 = vmax.f32 %v1189_v57, 0.0  ;;  %v6685_v22 = vld [vmem:[#allocation7_spill] sm:$0xff]  ;;  %v6687_v16 = vld [vmem:[#allocation9_spill] sm:$0xff] }
 0x273   :  { %v4766_v35 = vpack.c.bf16 %v1261_v43, %v1260_v48  ;;  %v1265_v4 = vmax.f32 %v1190_v34, 0.0  ;;  %v1192_v28 = vadd.f32 %v4535_v33, %v6681_v37  ;;  %v1266_v40 = vmax.f32 %v1191_v15, 0.0  ;;  %v6686_v43 = vld [vmem:[#allocation8_spill] sm:$0xff]  ;;  %v6688_v37 = vld [vmem:[#allocation10_spill] sm:$0xff] }
 0x274   :  { %v4770_v39 = vpack.c.bf16 %v1263_v44, %v1262_v2  ;;  %v1193_v7 = vadd.f32 %v4535_v33, %v6682_v38  ;;  %v1194_v20 = vadd.f32 %v4535_v33, %v6683_v62  ;;  %v1195_v12 = vadd.f32 %v4535_v33, %v4567_v32  ;;  %v6689_v62 = vld [vmem:[#allocation11_spill] sm:$0xff] }
 0x275   :  { %v4776_v53 = vpack.c.bf16 %v1265_v4, %v1264_v61  ;;  %v1267_v47 = vmax.f32 %v1192_v28, 0.0  ;;  %v1196_v29 = vadd.f32 %v4535_v33, %v6684_v24  ;;  %v1197_v48 = vadd.f32 %v4535_v33, %v6685_v22 }
 0x276   :  { %v1268_v36 = vmax.f32 %v1193_v7, 0.0  ;;  %v1269_v46 = vmax.f32 %v1194_v20, 0.0  ;;  %v1198_v57 = vadd.f32 %v4535_v33, %v6686_v43  ;;  %v1270_v2 = vmax.f32 %v1195_v12, 0.0  ;;  %v6690_v20 = vld [vmem:[#allocation12_spill] sm:$0xff] }
 0x277   :  { %v4786_v34 = vpack.c.bf16 %v1267_v47, %v1266_v40  ;;  %v1271_v44 = vmax.f32 %v1196_v29, 0.0  ;;  %v1199_v15 = vadd.f32 %v4535_v33, %v6687_v16  ;;  %v1272_v32 = vmax.f32 %v1197_v48, 0.0 }
 0x278   :  { %v4790_v61 = vpack.c.bf16 %v1269_v46, %v1268_v36  ;;  %v1273_v4 = vmax.f32 %v1198_v57, 0.0  ;;  %v1200_v28 = vadd.f32 %v4535_v33, %v6688_v37  ;;  %v1201_v40 = vadd.f32 %v4535_v33, %v6689_v62  ;;  %v6691_v36 = vld [vmem:[#allocation13_spill] sm:$0xff] }
 0x279   :  { %3146 = vmatmul.mubr.bf16.gmra.mxu1 %v1306_v3  ;;  %v4794_v38 = vpack.c.bf16 %v1271_v44, %v1270_v2  ;;  %v1274_v7 = vmax.f32 %v1199_v15, 0.0  ;;  %v1202_v47 = vadd.f32 %v4535_v33, %v6690_v20  ;;  %v1203_v29 = vadd.f32 %v4535_v33, %v4604_v23 }
 0x27a   :  { %3149 = vmatprep.mubr.bf16.mxu1 %v1307_v41  ;;  %v4800_v12 = vpack.c.bf16 %v1273_v4, %v1272_v32  ;;  %v1275_v24 = vmax.f32 %v1200_v28, 0.0  ;;  %v1204_v46 = vadd.f32 %v4535_v33, %v6691_v36  ;;  %v1276_v3 = vmax.f32 %v1201_v40, 0.0 }
 0x27b   :  { %v1277_v22 = vmax.f32 %v1202_v47, 0.0  ;;  %v1205_v48 = vadd.f32 %v4535_v33, %v4613_v30  ;;  %v1206_v43 = vadd.f32 %v4535_v33, %v4617_v14  ;;  %v1278_v41 = vmax.f32 %v1203_v29, 0.0 }
 0x27c   :  { %v4810_v57 = vpack.c.bf16 %v1275_v24, %v1274_v7  ;;  %v1279_v2 = vmax.f32 %v1204_v46, 0.0  ;;  %v1207_v44 = vadd.f32 %v4535_v33, %v4626_v27  ;;  %v1208_v32 = vadd.f32 %v4535_v33, %v4630_v11 }
 0x27d   :  { %v4814_v16 = vpack.c.bf16 %v1277_v22, %v1276_v3  ;;  %v1280_v23 = vmax.f32 %v1205_v48, 0.0  ;;  %v1281_v15 = vmax.f32 %v1206_v43, 0.0  ;;  %v1209_v14 = vadd.f32 %v4535_v33, %v4634_v58 }
 0x27e   :  { %v4818_v4 = vpack.c.bf16 %v1279_v2, %v1278_v41  ;;  %v1282_v30 = vmax.f32 %v1207_v44, 0.0  ;;  %v1210_v37 = vadd.f32 %v4535_v33, %v4640_v10  ;;  %v1283_v7 = vmax.f32 %v1208_v32, 0.0  ;;  %v6692_v2 = vld [vmem:[#allocation27_spill] sm:$0xff] }
 0x27f   :  { %v4824_v28 = vpack.c.bf16 %v1281_v15, %v1280_v23  ;;  %v1211_v27 = vadd.f32 %v4535_v33, %v4644_v9  ;;  %v1212_v62 = vadd.f32 %v4535_v33, %v4648_v60  ;;  %v1284_v40 = vmax.f32 %v1209_v14, 0.0  ;;  %v6693_v14 = vld [vmem:[#allocation28_spill] sm:$0xff] }
 0x280   :  { %v1285_v11 = vmax.f32 %v1210_v37, 0.0  ;;  %v1213_v20 = vadd.f32 %v4535_v33, %v4652_v52  ;;  %v1214_v58 = vadd.f32 %v4535_v33, %v4656_v25  ;;  %v4835_v10 = vpack.c.bf16 %v1283_v7, %v1282_v30  ;;  %v6694_v7 = vld [vmem:[#allocation29_spill] sm:$0xff] }
 0x281   :  { %3150 = vmatmul.mubr.bf16.gmra.mxu1 %v4730_v59  ;;  %v1286_v47 = vmax.f32 %v1211_v27, 0.0  ;;  %v1287_v24 = vmax.f32 %v1212_v62, 0.0  ;;  %v1215_v9 = vadd.f32 %v4535_v33, %v4660_v5  ;;  %v1216_v52 = vadd.f32 %v4535_v33, %v4664_v51 }
 0x282   :  { %3153 = vmatprep.mubr.bf16.mxu1 %v4736_v56  ;;  %v4840_v60 = vpack.c.bf16 %v1285_v11, %v1284_v40  ;;  %v1288_v29 = vmax.f32 %v1213_v20, 0.0  ;;  %v1289_v36 = vmax.f32 %v1214_v58, 0.0  ;;  %v1217_v59 = vadd.f32 %v4535_v33, %v4684_v55  ;;  %v6698_v40 = vld [vmem:[#allocation19_spill] sm:$0xff] }
 0x283   :  { %v4844_v46 = vpack.c.bf16 %v1287_v24, %v1286_v47  ;;  %v1290_v25 = vmax.f32 %v1215_v9, 0.0  ;;  %v1218_v3 = vadd.f32 %v4535_v33, %v4688_v45  ;;  %v1291_v5 = vmax.f32 %v1216_v52, 0.0 }
 0x284   :  { %v1331_v22 = vpack.c.bf16 %v1289_v36, %v1288_v29  ;;  %v1219_v56 = vadd.f32 %v4535_v33, %v4708_v54  ;;  %v1220_v48 = vadd.f32 %v4535_v33, %v4716_v6  ;;  %v1292_v43 = vmax.f32 %v1217_v59, 0.0 }
 0x285   :  { %v1293_v41 = vmax.f32 %v1218_v3, 0.0  ;;  %v1221_v51 = vadd.f32 %v4535_v33, %v4720_v26  ;;  %v1222_v44 = vadd.f32 %v4535_v33, %v6692_v2  ;;  %v1332_v55 = vpack.c.bf16 %v1291_v5, %v1290_v25 }
 0x286   :  { %v1294_v23 = vmax.f32 %v1219_v56, 0.0  ;;  %v1295_v15 = vmax.f32 %v1220_v48, 0.0  ;;  %v1223_v45 = vadd.f32 %v4535_v33, %v4724_v0  ;;  %v1310_v54 = vpack.c.bf16 %v1247_v1, %v1246_v49  ;;  %v6696_v1 = vld [vmem:[#allocation17_spill] sm:$0xff] }
 0x287   :  { %v1333_v6 = vpack.c.bf16 %v1293_v41, %v1292_v43  ;;  %v1296_v32 = vmax.f32 %v1221_v51, 0.0  ;;  %v1297_v30 = vmax.f32 %v1222_v44, 0.0  ;;  %v1311_v26 = vpack.c.bf16 %v1249_v8, %v1248_v42  ;;  %v6697_v42 = vld [vmem:[#allocation18_spill] sm:$0xff] }
 0x288   :  { %v1177_v37 = vadd.f32 %v4535_v33, %v6693_v14  ;;  %v1178_v27 = vadd.f32 %v4535_v33, %v6694_v7  ;;  %v1334_v0 = vpack.c.bf16 %v1295_v15, %v1294_v23  ;;  %v1097_v49 = vmul.f32 %v4400_v18, %v6695_v63 }
 0x289   :  { %3154 = vmatmul.mubr.bf16.gmra.mxu1 %v1310_v54  ;;  %v1335_v31 = vpack.c.bf16 %v1297_v30, %v1296_v32  ;;  %v1098_v62 = vmul.f32 %v4400_v18, %v6696_v1  ;;  %v1250_v21 = vmax.f32 %v4741_v13, 0.0  ;;  %v1251_v19 = vmax.f32 %v4747_v50, 0.0 }
 0x28a   :  { %3157 = vmatprep.mubr.bf16.mxu1 %v1311_v26  ;;  %v1099_v8 = vmul.f32 %v4400_v18, %v6697_v42  ;;  %v1100_v11 = vmul.f32 %v4400_v18, %v6698_v40  ;;  %v1252_v20 = vmax.f32 %v1177_v37, 0.0  ;;  %v1253_v58 = vmax.f32 %v1178_v27, 0.0 }
 0x28b   :  { %v1312_v47 = vpack.c.bf16 %v1251_v19, %v1250_v21  ;;  %v1179_v24 = vadd.f32 %v4535_v33, %v1097_v49  ;;  %v1180_v9 = vadd.f32 %v4535_v33, %v1098_v62 }
 0x28c   :  { %v1313_v29 = vpack.c.bf16 %v1253_v58, %v1252_v20  ;;  %v1181_v36 = vadd.f32 %v4535_v33, %v1099_v8  ;;  %v1182_v13 = vadd.f32 %v4535_v33, %v1100_v11  ;;  %v1298_v33 = vmax.f32 %v1223_v45, 0.0 }
 0x28d   :  { %v1254_v50 = vmax.f32 %v1179_v24, 0.0  ;;  %v1255_v52 = vmax.f32 %v1180_v9, 0.0 }
 0x28e   :  { %v1256_v25 = vmax.f32 %v1181_v36, 0.0  ;;  %v1257_v59 = vmax.f32 %v1182_v13, 0.0 }
 0x28f   :  { %v1314_v3 = vpack.c.bf16 %v1255_v52, %v1254_v50 }
 0x290   :  { %v1315_v18 = vpack.c.bf16 %v1257_v59, %v1256_v25 }
 0x291   :  { %3158 = vmatmul.mubr.bf16.gmra.mxu1 %v1312_v47 }
 0x292   :  { %3161 = vmatprep.mubr.bf16.mxu1 %v1313_v29 }
 0x299   :  { %3162 = vmatmul.mubr.bf16.gmra.mxu1 %v1314_v3 }
 0x29a   :  { %3165 = vmatprep.mubr.bf16.mxu1 %v1315_v18 }
 0x2a1   :  { %3166 = vmatmul.mubr.bf16.gmra.mxu1 %v4762_v17  ;;  %v1336_v17 = vpack.c.bf16 %v1298_v33, %v1298_v33 }
 0x2a2   :  { %3169 = vmatprep.mubr.bf16.mxu1 %v4766_v35 }
 0x2a9   :  { %3170 = vmatmul.mubr.bf16.gmra.mxu1 %v4770_v39 }
 0x2aa   :  { %3173 = vmatprep.mubr.bf16.mxu1 %v4776_v53 }
 0x2b1   :  { %3174 = vmatmul.mubr.bf16.gmra.mxu1 %v4786_v34  ;;  %v4904_v34 = vld [vmem:[%s6427_s4] ss:$0 sm:$0xff] }
 0x2b2   :  { %3177 = vmatprep.mubr.bf16.mxu1 %v4790_v61 }
 0x2b9   :  { %3178 = vmatmul.mubr.bf16.gmra.mxu1 %v4794_v38 }
 0x2ba   :  { %3181 = vmatprep.mubr.bf16.mxu1 %v4800_v12 }
 0x2c1   :  { %3182 = vmatmul.mubr.bf16.gmra.mxu1 %v4810_v57 }
 0x2c2   :  { %3185 = vmatprep.mubr.bf16.mxu1 %v4814_v16 }
 0x2c9   :  { %3186 = vmatmul.mubr.bf16.gmra.mxu1 %v4818_v4 }
 0x2ca   :  { %3189 = vmatprep.mubr.bf16.mxu1 %v4824_v28 }
 0x2d1   :  { %3190 = vmatmul.mubr.bf16.gmra.mxu1 %v4835_v10 }
 0x2d2   :  { %3193 = vmatprep.mubr.bf16.mxu1 %v4840_v60 }
 0x2d9   :  { %3194 = vmatmul.mubr.bf16.gmra.mxu1 %v4844_v46 }
 0x2da   :  { %3197 = vmatprep.mubr.bf16.mxu1 %v1331_v22 }
 0x2e1   :  { %3198 = vmatmul.mubr.bf16.gmra.mxu1 %v1332_v55 }
 0x2e2   :  { %3201 = vmatprep.mubr.bf16.mxu1 %v1333_v6 }
 0x2e9   :  { %3202 = vmatmul.mubr.bf16.gmra.mxu1 %v1334_v0 }
 0x2ea   :  { %3205 = vmatprep.mubr.bf16.mxu1 %v1335_v31 }
 0x2f1   :  { %3206 = vmatmul.mubr.bf16.gmra.mxu1 %v1336_v17 }
 0x321   :  { %v3135_v35 = vpop.f32.mrf.mxu1 }
 0x322   :  { %v4913_v16 = vadd.f32 %v3135_v35, %v4904_v34 }
 0x323   :  { %v1442_v39 = vpop.f32.mrf.mxu1 }
 0x324   :  { %v4907_v38 = vadd.f32 %v4904_v34, %v1442_v39 }
 0x325   :  { %v3136_v53 = vpop.f32.mrf.mxu1 }
 0x326   :  { %v4918_v10 = vadd.f32 %v3136_v53, %v4904_v34 }
 0x327   :  { %v1445_v61 = vpop.f32.mrf.mxu1 }
 0x328   :  { %v4910_v12 = vadd.f32 %v4904_v34, %v1445_v61 }
 0x329   :  { %v3139_v57 = vpop.f32.mrf.mxu1 }
 0x32a   :  { %v1744_v4 = vadd.f32 %v4910_v12, %v4907_v38  ;;  %v4930_v51 = vadd.f32 %v3139_v57, %v4904_v34 }
 0x32b   :  { %v1458_v28 = vpop.f32.mrf.mxu1 }
 0x32c   :  { %v1745_v60 = vadd.f32 %v1744_v4, %v4913_v16  ;;  %v4923_v5 = vadd.f32 %v4904_v34, %v1458_v28 }
 0x32d   :  { %v3140_v46 = vpop.f32.mrf.mxu1 }
 0x32e   :  { %v1746_v22 = vadd.f32 %v1745_v60, %v4918_v10  ;;  %v4934_v55 = vadd.f32 %v3140_v46, %v4904_v34 }
 0x32f   :  { %v1461_v56 = vpop.f32.mrf.mxu1 }
 0x330   :  { %v1747_v48 = vadd.f32 %v1746_v22, %v4923_v5  ;;  %v4927_v43 = vadd.f32 %v4904_v34, %v1461_v56 }
 0x331   :  { %v3143_v41 = vpop.f32.mrf.mxu1 }
 0x332   :  { %v1748_v2 = vadd.f32 %v1747_v48, %v4927_v43  ;;  %v4946_v14 = vadd.f32 %v3143_v41, %v4904_v34 }
 0x333   :  { %v1474_v44 = vpop.f32.mrf.mxu1 }
 0x334   :  { %v1749_v23 = vadd.f32 %v1748_v2, %v4930_v51  ;;  %v4939_v54 = vadd.f32 %v4904_v34, %v1474_v44 }
 0x335   :  { %v3144_v15 = vpop.f32.mrf.mxu1 }
 0x336   :  { %v1750_v45 = vadd.f32 %v1749_v23, %v4934_v55  ;;  %v4950_v27 = vadd.f32 %v3144_v15, %v4904_v34 }
 0x337   :  { %v1477_v6 = vpop.f32.mrf.mxu1 }
 0x338   :  { %v1751_v32 = vadd.f32 %v1750_v45, %v4939_v54  ;;  %v4943_v30 = vadd.f32 %v4904_v34, %v1477_v6 }
 0x339   :  { %v3147_v26 = vpop.f32.mrf.mxu1 }
 0x33a   :  { %v1752_v37 = vadd.f32 %v1751_v32, %v4943_v30  ;;  %v4962_v42 = vadd.f32 %v3147_v26, %v4904_v34 }
 0x33b   :  { %v1490_v7 = vpop.f32.mrf.mxu1 }
 0x33c   :  { %v1753_v0 = vadd.f32 %v1752_v37, %v4946_v14  ;;  %v4955_v49 = vadd.f32 %v4904_v34, %v1490_v7 }
 0x33d   :  { %v3148_v31 = vpop.f32.mrf.mxu1 }
 0x33e   :  { %v1754_v63 = vadd.f32 %v1753_v0, %v4950_v27  ;;  %v4966_v11 = vadd.f32 %v3148_v31, %v4904_v34 }
 0x33f   :  { %v1493_v1 = vpop.f32.mrf.mxu1 }
 0x340   :  { %v1755_v62 = vadd.f32 %v1754_v63, %v4955_v49  ;;  %v4959_v21 = vadd.f32 %v4904_v34, %v1493_v1 }
 0x341   :  { %v3151_v19 = vpop.f32.mrf.mxu1 }
 0x342   :  { %v1756_v8 = vadd.f32 %v1755_v62, %v4959_v21  ;;  %v4978_v50 = vadd.f32 %v3151_v19, %v4904_v34 }
 0x343   :  { %v1506_v40 = vpop.f32.mrf.mxu1 }
 0x344   :  { %v1757_v20 = vadd.f32 %v1756_v8, %v4962_v42  ;;  %v4970_v47 = vadd.f32 %v4904_v34, %v1506_v40 }
 0x345   :  { %v3152_v58 = vpop.f32.mrf.mxu1 }
 0x346   :  { %v1758_v24 = vadd.f32 %v1757_v20, %v4966_v11  ;;  %v4982_v59 = vadd.f32 %v3152_v58, %v4904_v34 }
 0x347   :  { %v1509_v9 = vpop.f32.mrf.mxu1 }
 0x348   :  { %v1759_v29 = vadd.f32 %v1758_v24, %v4970_v47  ;;  %v4975_v36 = vadd.f32 %v4904_v34, %v1509_v9 }
 0x349   :  { %v3155_v13 = vpop.f32.mrf.mxu1 }
 0x34a   :  { %v1760_v52 = vadd.f32 %v1759_v29, %v4975_v36  ;;  %v4994_v57 = vadd.f32 %v3155_v13, %v4904_v34 }
 0x34b   :  { %v1522_v25 = vpop.f32.mrf.mxu1 }
 0x34c   :  { %v1761_v3 = vadd.f32 %v1760_v52, %v4978_v50  ;;  %v4986_v33 = vadd.f32 %v4904_v34, %v1522_v25 }
 0x34d   :  { %v3156_v18 = vpop.f32.mrf.mxu1 }
 0x34e   :  { %v1762_v17 = vadd.f32 %v1761_v3, %v4982_v59  ;;  %v4998_v60 = vadd.f32 %v3156_v18, %v4904_v34 }
 0x34f   :  { %v1525_v35 = vpop.f32.mrf.mxu1 }
 0x350   :  { %v1763_v39 = vadd.f32 %v1762_v17, %v4986_v33  ;;  %v4991_v53 = vadd.f32 %v4904_v34, %v1525_v35 }
 0x351   :  { %v3159_v61 = vpop.f32.mrf.mxu1 }
 0x352   :  { %v1764_v4 = vadd.f32 %v1763_v39, %v4991_v53  ;;  %v5010_v15 = vadd.f32 %v3159_v61, %v4904_v34 }
 0x353   :  { %v1538_v28 = vpop.f32.mrf.mxu1 }
 0x354   :  { %v1765_v46 = vadd.f32 %v1764_v4, %v4994_v57  ;;  %v5002_v56 = vadd.f32 %v4904_v34, %v1538_v28 }
 0x355   :  { %v3160_v22 = vpop.f32.mrf.mxu1 }
 0x356   :  { %v1766_v48 = vadd.f32 %v1765_v46, %v4998_v60  ;;  %v5014_v32 = vadd.f32 %v3160_v22, %v4904_v34 }
 0x357   :  { %v1541_v41 = vpop.f32.mrf.mxu1 }
 0x358   :  { %v1767_v2 = vadd.f32 %v1766_v48, %v5002_v56  ;;  %v5007_v44 = vadd.f32 %v4904_v34, %v1541_v41 }
 0x359   :  { %v3163_v23 = vpop.f32.mrf.mxu1 }
 0x35a   :  { %v1768_v45 = vadd.f32 %v1767_v2, %v5007_v44  ;;  %v5026_v19 = vadd.f32 %v3163_v23, %v4904_v34 }
 0x35b   :  { %v1554_v6 = vpop.f32.mrf.mxu1 }
 0x35c   :  { %v1769_v26 = vadd.f32 %v1768_v45, %v5010_v15  ;;  %v5018_v7 = vadd.f32 %v4904_v34, %v1554_v6  ;;  %6701 = vst [vmem:[#allocation20_spill] sm:$0xff] %v5026_v19 }
 0x35d   :  { %v3164_v37 = vpop.f32.mrf.mxu1 }
 0x35e   :  { %6699 = vst [vmem:[#allocation14_spill] sm:$0xff] %v5018_v7  ;;  %v1770_v0 = vadd.f32 %v1769_v26, %v5014_v32  ;;  %v5030_v20 = vadd.f32 %v3164_v37, %v4904_v34 }
 0x35f   :  { %v1557_v31 = vpop.f32.mrf.mxu1 }
 0x360   :  { %v1771_v63 = vadd.f32 %v1770_v0, %v5018_v7  ;;  %v5023_v1 = vadd.f32 %v4904_v34, %v1557_v31  ;;  %6702 = vst [vmem:[#allocation21_spill] sm:$0xff] %v5030_v20 }
 0x361   :  { %v3167_v62 = vpop.f32.mrf.mxu1 }
 0x362   :  { %6700 = vst [vmem:[#allocation15_spill] sm:$0xff] %v5023_v1  ;;  %v1772_v8 = vadd.f32 %v1771_v63, %v5023_v1  ;;  %v5042_v18 = vadd.f32 %v3167_v62, %v4904_v34 }
 0x363   :  { %v1570_v40 = vpop.f32.mrf.mxu1 }
 0x364   :  { %v1773_v58 = vadd.f32 %v1772_v8, %v5026_v19  ;;  %v5034_v9 = vadd.f32 %v4904_v34, %v1570_v40  ;;  %6705 = vst [vmem:[#allocation24_spill] sm:$0xff] %v5042_v18 }
 0x365   :  { %v3168_v24 = vpop.f32.mrf.mxu1 }
 0x366   :  { %6703 = vst [vmem:[#allocation22_spill] sm:$0xff] %v5034_v9  ;;  %v1774_v29 = vadd.f32 %v1773_v58, %v5030_v20  ;;  %v5046_v39 = vadd.f32 %v3168_v24, %v4904_v34 }
 0x367   :  { %v1573_v13 = vpop.f32.mrf.mxu1 }
 0x368   :  { %v1775_v52 = vadd.f32 %v1774_v29, %v5034_v9  ;;  %v5039_v25 = vadd.f32 %v4904_v34, %v1573_v13  ;;  %6706 = vst [vmem:[#allocation25_spill] sm:$0xff] %v5046_v39 }
 0x369   :  { %v3171_v3 = vpop.f32.mrf.mxu1 }
 0x36a   :  { %6704 = vst [vmem:[#allocation23_spill] sm:$0xff] %v5039_v25  ;;  %v1776_v17 = vadd.f32 %v1775_v52, %v5039_v25  ;;  %v5058_v23 = vadd.f32 %v3171_v3, %v4904_v34 }
 0x36b   :  { %v1586_v35 = vpop.f32.mrf.mxu1 }
 0x36c   :  { %v1777_v61 = vadd.f32 %v1776_v17, %v5042_v18  ;;  %v5050_v28 = vadd.f32 %v4904_v34, %v1586_v35  ;;  %6709 = vst [vmem:[#allocation32_spill] sm:$0xff] %v5058_v23 }
 0x36d   :  { %v3172_v4 = vpop.f32.mrf.mxu1 }
 0x36e   :  { %6707 = vst [vmem:[#allocation30_spill] sm:$0xff] %v5050_v28  ;;  %v1778_v46 = vadd.f32 %v1777_v61, %v5046_v39  ;;  %v5062_v26 = vadd.f32 %v3172_v4, %v4904_v34 }
 0x36f   :  { %v1589_v22 = vpop.f32.mrf.mxu1 }
 0x370   :  { %v1779_v48 = vadd.f32 %v1778_v46, %v5050_v28  ;;  %v5055_v41 = vadd.f32 %v4904_v34, %v1589_v22  ;;  %6710 = vst [vmem:[#allocation33_spill] sm:$0xff] %v5062_v26 }
 0x371   :  { %v3175_v2 = vpop.f32.mrf.mxu1 }
 0x372   :  { %6708 = vst [vmem:[#allocation31_spill] sm:$0xff] %v5055_v41  ;;  %v1780_v45 = vadd.f32 %v1779_v48, %v5055_v41  ;;  %v5074_v24 = vadd.f32 %v3175_v2, %v4904_v34 }
 0x373   :  { %v1602_v6 = vpop.f32.mrf.mxu1 }
 0x374   :  { %v1781_v37 = vadd.f32 %v1780_v45, %v5058_v23  ;;  %v5066_v31 = vadd.f32 %v4904_v34, %v1602_v6  ;;  %6713 = vst [vmem:[#allocation2_spill] sm:$0xff] %v5074_v24 }
 0x375   :  { %v3176_v0 = vpop.f32.mrf.mxu1 }
 0x376   :  { %6711 = vst [vmem:[#allocation34_spill] sm:$0xff] %v5066_v31  ;;  %v1782_v63 = vadd.f32 %v1781_v37, %v5062_v26  ;;  %v5078_v52 = vadd.f32 %v3176_v0, %v4904_v34 }
 0x377   :  { %v1605_v62 = vpop.f32.mrf.mxu1 }
 0x378   :  { %v1783_v8 = vadd.f32 %v1782_v63, %v5066_v31  ;;  %v5071_v40 = vadd.f32 %v4904_v34, %v1605_v62  ;;  %6714 = vst [vmem:[#allocation3_spill] sm:$0xff] %v5078_v52 }
 0x379   :  { %v3179_v58 = vpop.f32.mrf.mxu1 }
 0x37a   :  { %6712 = vst [vmem:[#allocation35_spill] sm:$0xff] %v5071_v40  ;;  %v1784_v29 = vadd.f32 %v1783_v8, %v5071_v40  ;;  %v5090_v2 = vadd.f32 %v3179_v58, %v4904_v34 }
 0x37b   :  { %v1618_v13 = vpop.f32.mrf.mxu1 }
 0x37c   :  { %v1785_v3 = vadd.f32 %v1784_v29, %v5074_v24  ;;  %v5082_v35 = vadd.f32 %v4904_v34, %v1618_v13  ;;  %6717 = vst [vmem:[#allocation6_spill] sm:$0xff] %v5090_v2 }
 0x37d   :  { %v3180_v17 = vpop.f32.mrf.mxu1 }
 0x37e   :  { %6715 = vst [vmem:[#allocation4_spill] sm:$0xff] %v5082_v35  ;;  %v1786_v61 = vadd.f32 %v1785_v3, %v5078_v52  ;;  %v5094_v37 = vadd.f32 %v3180_v17, %v4904_v34 }
 0x37f   :  { %v1621_v4 = vpop.f32.mrf.mxu1 }
 0x380   :  { %v1787_v46 = vadd.f32 %v1786_v61, %v5082_v35  ;;  %v5087_v22 = vadd.f32 %v4904_v34, %v1621_v4  ;;  %6718 = vst [vmem:[#allocation7_spill] sm:$0xff] %v5094_v37 }
 0x381   :  { %v3183_v48 = vpop.f32.mrf.mxu1 }
 0x382   :  { %6716 = vst [vmem:[#allocation5_spill] sm:$0xff] %v5087_v22  ;;  %v1788_v45 = vadd.f32 %v1787_v46, %v5087_v22  ;;  %v5106_v61 = vadd.f32 %v3183_v48, %v4904_v34 }
 0x383   :  { %v1634_v6 = vpop.f32.mrf.mxu1 }
 0x384   :  { %v1789_v0 = vadd.f32 %v1788_v45, %v5090_v2  ;;  %v5098_v62 = vadd.f32 %v4904_v34, %v1634_v6  ;;  %6721 = vst [vmem:[#allocation10_spill] sm:$0xff] %v5106_v61 }
 0x385   :  { %v3184_v63 = vpop.f32.mrf.mxu1 }
 0x386   :  { %6719 = vst [vmem:[#allocation8_spill] sm:$0xff] %v5098_v62  ;;  %v1790_v8 = vadd.f32 %v1789_v0, %v5094_v37  ;;  %v5110_v46 = vadd.f32 %v3184_v63, %v4904_v34 }
 0x387   :  { %v1637_v29 = vpop.f32.mrf.mxu1 }
 0x388   :  { %v1791_v13 = vadd.f32 %v1790_v8, %v5098_v62  ;;  %v5103_v58 = vadd.f32 %v4904_v34, %v1637_v29  ;;  %6722 = vst [vmem:[#allocation11_spill] sm:$0xff] %v5110_v46 }
 0x389   :  { %v3187_v3 = vpop.f32.mrf.mxu1 }
 0x38a   :  { %6720 = vst [vmem:[#allocation9_spill] sm:$0xff] %v5103_v58  ;;  %v1792_v17 = vadd.f32 %v1791_v13, %v5103_v58  ;;  %v5122_v13 = vadd.f32 %v3187_v3, %v4904_v34 }
 0x38b   :  { %v1650_v4 = vpop.f32.mrf.mxu1 }
 0x38c   :  { %v1793_v45 = vadd.f32 %v1792_v17, %v5106_v61  ;;  %v5114_v0 = vadd.f32 %v4904_v34, %v1650_v4  ;;  %6725 = vst [vmem:[#allocation27_spill] sm:$0xff] %v5122_v13 }
 0x38d   :  { %v3188_v6 = vpop.f32.mrf.mxu1 }
 0x38e   :  { %6723 = vst [vmem:[#allocation12_spill] sm:$0xff] %v5114_v0  ;;  %v1794_v8 = vadd.f32 %v1793_v45, %v5110_v46  ;;  %v5126_v17 = vadd.f32 %v3188_v6, %v4904_v34 }
 0x38f   :  { %v1653_v29 = vpop.f32.mrf.mxu1 }
 0x390   :  { %v1795_v62 = vadd.f32 %v1794_v8, %v5114_v0  ;;  %v5119_v48 = vadd.f32 %v4904_v34, %v1653_v29  ;;  %6726 = vst [vmem:[#allocation28_spill] sm:$0xff] %v5126_v17 }
 0x391   :  { %v3191_v37 = vpop.f32.mrf.mxu1 }
 0x392   :  { %6724 = vst [vmem:[#allocation13_spill] sm:$0xff] %v5119_v48  ;;  %v1796_v63 = vadd.f32 %v1795_v62, %v5119_v48  ;;  %v1675_v62 = vadd.f32 %v3191_v37, %v4904_v34 }
 0x393   :  { %v1666_v58 = vpop.f32.mrf.mxu1 }
 0x394   :  { %v1797_v4 = vadd.f32 %v1796_v63, %v5122_v13  ;;  %v5130_v45 = vadd.f32 %v4904_v34, %v1666_v58 }
 0x395   :  { %v3192_v61 = vpop.f32.mrf.mxu1 }
 0x396   :  { %6727 = vst [vmem:[#allocation29_spill] sm:$0xff] %v5130_v45  ;;  %v1798_v8 = vadd.f32 %v1797_v4, %v5126_v17  ;;  %v1678_v6 = vadd.f32 %v3192_v61, %v4904_v34 }
 0x397   :  { %v1669_v29 = vpop.f32.mrf.mxu1 }
 0x398   :  { %v1799_v0 = vadd.f32 %v1798_v8, %v5130_v45  ;;  %v1670_v3 = vadd.f32 %v4904_v34, %v1669_v29 }
 0x399   :  { %v3195_v46 = vpop.f32.mrf.mxu1 }
 0x39a   :  { %v1800_v48 = vadd.f32 %v1799_v0, %v1670_v3  ;;  %v1691_v8 = vadd.f32 %v3195_v46, %v4904_v34 }
 0x39b   :  { %v1682_v2 = vpop.f32.mrf.mxu1 }
 0x39c   :  { %v1801_v22 = vadd.f32 %v1800_v48, %v1675_v62  ;;  %v1683_v13 = vadd.f32 %v4904_v34, %v1682_v2 }
 0x39d   :  { %v3196_v63 = vpop.f32.mrf.mxu1 }
 0x39e   :  { %v1802_v58 = vadd.f32 %v1801_v22, %v1678_v6  ;;  %v1694_v37 = vadd.f32 %v3196_v63, %v4904_v34 }
 0x39f   :  { %v1685_v35 = vpop.f32.mrf.mxu1 }
 0x3a0   :  { %v1803_v52 = vadd.f32 %v1802_v58, %v1683_v13  ;;  %v1686_v4 = vadd.f32 %v4904_v34, %v1685_v35 }
 0x3a1   :  { %v3199_v17 = vpop.f32.mrf.mxu1 }
 0x3a2   :  { %v1804_v29 = vadd.f32 %v1803_v52, %v1686_v4  ;;  %v1707_v58 = vadd.f32 %v3199_v17, %v4904_v34 }
 0x3a3   :  { %v1698_v45 = vpop.f32.mrf.mxu1 }
 0x3a4   :  { %v1805_v0 = vadd.f32 %v1804_v29, %v1691_v8  ;;  %v1699_v61 = vadd.f32 %v4904_v34, %v1698_v45 }
 0x3a5   :  { %v3200_v24 = vpop.f32.mrf.mxu1 }
 0x3a6   :  { %v1806_v48 = vadd.f32 %v1805_v0, %v1694_v37  ;;  %v1710_v46 = vadd.f32 %v3200_v24, %v4904_v34 }
 0x3a7   :  { %v1701_v40 = vpop.f32.mrf.mxu1 }
 0x3a8   :  { %v1807_v31 = vadd.f32 %v1806_v48, %v1699_v61  ;;  %v1702_v22 = vadd.f32 %v4904_v34, %v1701_v40 }
 0x3a9   :  { %v3203_v2 = vpop.f32.mrf.mxu1 }
 0x3aa   :  { %v1808_v35 = vadd.f32 %v1807_v31, %v1702_v22  ;;  %v1723_v48 = vadd.f32 %v3203_v2, %v4904_v34 }
 0x3ab   :  { %v1714_v26 = vpop.f32.mrf.mxu1 }
 0x3ac   :  { %v1809_v52 = vadd.f32 %v1808_v35, %v1707_v58  ;;  %v1715_v63 = vadd.f32 %v4904_v34, %v1714_v26 }
 0x3ad   :  { %v3204_v23 = vpop.f32.mrf.mxu1 }
 0x3ae   :  { %v1810_v29 = vadd.f32 %v1809_v52, %v1710_v46  ;;  %v1726_v17 = vadd.f32 %v3204_v23, %v4904_v34 }
 0x3af   :  { %v1717_v41 = vpop.f32.mrf.mxu1 }
 0x3b0   :  { %v1811_v28 = vadd.f32 %v1810_v29, %v1715_v63  ;;  %v1718_v45 = vadd.f32 %v4904_v34, %v1717_v41 }
 0x3b1   :  { %v3207_v0 = vpop.f32.mrf.mxu1 }
 0x3b2   :  { %v1812_v40 = vadd.f32 %v1811_v28, %v1718_v45  ;;  %v1739_v52 = vadd.f32 %v3207_v0, %v4904_v34 }
 0x3b3   :  { %v1730_v39 = vpop.f32.mrf.mxu1 }
 0x3b4   :  { %v1813_v31 = vadd.f32 %v1812_v40, %v1723_v48  ;;  %v1731_v24 = vadd.f32 %v4904_v34, %v1730_v39 }
 0x3b5   :  { %v3208_v18 = vpop.f32.mrf.mxu1 }
 0x3b6   :  { %v1814_v35 = vadd.f32 %v1813_v31, %v1726_v17 }
 0x3b7   :  { %v1733_v25 = vpop.f32.mrf.mxu1 }
 0x3b8   :  { %v1815_v9 = vadd.f32 %v1814_v35, %v1731_v24  ;;  %v1734_v26 = vadd.f32 %v4904_v34, %v1733_v25 }
 0x3ba   :  { %v1816_v29 = vadd.f32 %v1815_v9, %v1734_v26 }
 0x3bc   :  { %v1817_v41 = vadd.f32 %v1816_v29, %v1739_v52 }
 0x3be   :  { %v1818_v20 = vrot.slane %v1817_v41, 4 }
 0x3c0   :  { %v1819_v19 = vadd.f32 %v1818_v20, %v1817_v41 }
 0x3c2   :  { %v1820_v2 = vrot.slane %v1819_v19, 2 }
 0x3c4   :  { %v1821_v28 = vadd.f32 %v1820_v2, %v1819_v19 }
 0x3c6   :  { %v1822_v1 = vrot.slane %v1821_v28, 1 }
 0x3c8   :  { %v1823_v7 = vadd.f32 %v1822_v1, %v1821_v28 }
 0x3ca   :  { %v5152_v23 = vmul.f32 0.0016666667, %v1823_v7 }
 0x3cc   :  { %v5155_v18 = vsub.f32 %v1670_v3, %v5152_v23  ;;  %v5158_v39 = vsub.f32 %v1675_v62, %v5152_v23  ;;  %v5161_v25 = vsub.f32 %v1678_v6, %v5152_v23  ;;  %v5164_v34 = vsub.f32 %v1683_v13, %v5152_v23 }
 0x3cd   :  { %v5167_v20 = vsub.f32 %v1686_v4, %v5152_v23  ;;  %v5170_v19 = vsub.f32 %v1691_v8, %v5152_v23  ;;  %v5173_v7 = vsub.f32 %v1694_v37, %v5152_v23  ;;  %v5176_v1 = vsub.f32 %v1699_v61, %v5152_v23 }
 0x3ce   :  { %v5179_v9 = vsub.f32 %v1702_v22, %v5152_v23  ;;  %v5182_v3 = vsub.f32 %v1707_v58, %v5152_v23  ;;  %v5185_v13 = vsub.f32 %v1710_v46, %v5152_v23  ;;  %v5188_v62 = vsub.f32 %v1715_v63, %v5152_v23 }
 0x3cf   :  { %v5191_v6 = vsub.f32 %v1718_v45, %v5152_v23  ;;  %v5194_v4 = vsub.f32 %v1723_v48, %v5152_v23  ;;  %v5197_v8 = vsub.f32 %v1726_v17, %v5152_v23  ;;  %v5200_v37 = vsub.f32 %v1731_v24, %v5152_v23 }
 0x3d0   :  { %6728 = vst [vmem:[#allocation16_spill] sm:$0xff] %v5185_v13  ;;  %6729 = vst [vmem:[#allocation17_spill] sm:$0xff] %v5188_v62  ;;  %v5203_v61 = vsub.f32 %v1734_v26, %v5152_v23  ;;  %v5206_v22 = vsub.f32 %v1739_v52, %v5152_v23  ;;  %v5210_v58 = vsub.f32 %v4907_v38, %v5152_v23 }
 0x3d1   :  { %6730 = vst [vmem:[#allocation18_spill] sm:$0xff] %v5191_v6  ;;  %6731 = vst [vmem:[#allocation19_spill] sm:$0xff] %v5194_v4  ;;  %v5214_v46 = vsub.f32 %v4910_v12, %v5152_v23  ;;  %v5218_v63 = vsub.f32 %v4913_v16, %v5152_v23  ;;  %v5226_v48 = vsub.f32 %v4918_v10, %v5152_v23 }
 0x3d2   :  { %6732 = vst [vmem:[#allocation36_spill] sm:$0xff] %v5197_v8  ;;  %6733 = vst [vmem:[#allocation37_spill] sm:$0xff] %v5200_v37  ;;  %v1900_v45 = vmul.f32 %v5210_v58, %v5210_v58  ;;  %v5230_v38 = vsub.f32 %v4923_v5, %v5152_v23  ;;  %v5236_v16 = vsub.f32 %v4927_v43, %v5152_v23 }
 0x3d3   :  { %v1901_v0 = vmul.f32 %v5214_v46, %v5214_v46  ;;  %v1902_v12 = vmul.f32 %v5218_v63, %v5218_v63  ;;  %v1903_v17 = vmul.f32 %v5226_v48, %v5226_v48  ;;  %v5242_v10 = vsub.f32 %v4930_v51, %v5152_v23 }
 0x3d4   :  { %v1904_v5 = vmul.f32 %v5230_v38, %v5230_v38  ;;  %v5248_v35 = vsub.f32 %v4934_v55, %v5152_v23  ;;  %v1905_v43 = vmul.f32 %v5236_v16, %v5236_v16  ;;  %v5254_v52 = vsub.f32 %v4939_v54, %v5152_v23 }
 0x3d5   :  { %v1975_v40 = vadd.f32 %v1901_v0, %v1900_v45  ;;  %v1906_v51 = vmul.f32 %v5242_v10, %v5242_v10  ;;  %v5260_v41 = vsub.f32 %v4943_v30, %v5152_v23  ;;  %v5266_v28 = vsub.f32 %v4946_v14, %v5152_v23 }
 0x3d6   :  { %v1907_v55 = vmul.f32 %v5248_v35, %v5248_v35  ;;  %v1908_v54 = vmul.f32 %v5254_v52, %v5254_v52  ;;  %v5272_v0 = vsub.f32 %v4950_v27, %v5152_v23 }
 0x3d7   :  { %v1976_v31 = vadd.f32 %v1975_v40, %v1902_v12  ;;  %v1909_v30 = vmul.f32 %v5260_v41, %v5260_v41  ;;  %v5278_v40 = vsub.f32 %v4955_v49, %v5152_v23  ;;  %v1910_v14 = vmul.f32 %v5266_v28, %v5266_v28 }
 0x3d8   :  { %v1911_v27 = vmul.f32 %v5272_v0, %v5272_v0 }
 0x3d9   :  { %v1977_v24 = vadd.f32 %v1976_v31, %v1903_v17  ;;  %v5284_v31 = vsub.f32 %v4959_v21, %v5152_v23  ;;  %v1912_v49 = vmul.f32 %v5278_v40, %v5278_v40 }
 0x3db   :  { %v1978_v26 = vadd.f32 %v1977_v24, %v1904_v5  ;;  %v5290_v24 = vsub.f32 %v4962_v42, %v5152_v23  ;;  %v1913_v21 = vmul.f32 %v5284_v31, %v5284_v31 }
 0x3dd   :  { %v1979_v29 = vadd.f32 %v1978_v26, %v1905_v43  ;;  %v5296_v26 = vsub.f32 %v4966_v11, %v5152_v23  ;;  %v1914_v42 = vmul.f32 %v5290_v24, %v5290_v24 }
 0x3df   :  { %v1980_v2 = vadd.f32 %v1979_v29, %v1906_v51  ;;  %v5302_v29 = vsub.f32 %v4970_v47, %v5152_v23  ;;  %v1915_v11 = vmul.f32 %v5296_v26, %v5296_v26 }
 0x3e1   :  { %v1981_v45 = vadd.f32 %v1980_v2, %v1907_v55  ;;  %v5308_v2 = vsub.f32 %v4975_v36, %v5152_v23  ;;  %v1916_v47 = vmul.f32 %v5302_v29, %v5302_v29 }
 0x3e3   :  { %v1982_v12 = vadd.f32 %v1981_v45, %v1908_v54  ;;  %v5314_v45 = vsub.f32 %v4978_v50, %v5152_v23  ;;  %v1917_v36 = vmul.f32 %v5308_v2, %v5308_v2 }
 0x3e5   :  { %v1983_v17 = vadd.f32 %v1982_v12, %v1909_v30  ;;  %v5320_v12 = vsub.f32 %v4982_v59, %v5152_v23  ;;  %v1918_v50 = vmul.f32 %v5314_v45, %v5314_v45 }
 0x3e7   :  { %v1984_v5 = vadd.f32 %v1983_v17, %v1910_v14  ;;  %v5326_v17 = vsub.f32 %v4986_v33, %v5152_v23  ;;  %v1919_v59 = vmul.f32 %v5320_v12, %v5320_v12 }
 0x3e9   :  { %v1985_v43 = vadd.f32 %v1984_v5, %v1911_v27  ;;  %v5332_v5 = vsub.f32 %v4991_v53, %v5152_v23  ;;  %v1920_v33 = vmul.f32 %v5326_v17, %v5326_v17 }
 0x3eb   :  { %v1986_v51 = vadd.f32 %v1985_v43, %v1912_v49  ;;  %v5338_v43 = vsub.f32 %v4994_v57, %v5152_v23  ;;  %v1921_v53 = vmul.f32 %v5332_v5, %v5332_v5 }
 0x3ed   :  { %v1987_v55 = vadd.f32 %v1986_v51, %v1913_v21  ;;  %v5344_v51 = vsub.f32 %v4998_v60, %v5152_v23  ;;  %v1922_v57 = vmul.f32 %v5338_v43, %v5338_v43 }
 0x3ef   :  { %v1988_v54 = vadd.f32 %v1987_v55, %v1914_v42  ;;  %v5350_v55 = vsub.f32 %v5002_v56, %v5152_v23  ;;  %v1923_v60 = vmul.f32 %v5344_v51, %v5344_v51 }
 0x3f1   :  { %v1989_v30 = vadd.f32 %v1988_v54, %v1915_v11  ;;  %v5356_v54 = vsub.f32 %v5007_v44, %v5152_v23  ;;  %v1924_v56 = vmul.f32 %v5350_v55, %v5350_v55 }
 0x3f3   :  { %v1990_v14 = vadd.f32 %v1989_v30, %v1916_v47  ;;  %v5362_v30 = vsub.f32 %v5010_v15, %v5152_v23  ;;  %v1925_v44 = vmul.f32 %v5356_v54, %v5356_v54 }
 0x3f5   :  { %v1991_v27 = vadd.f32 %v1990_v14, %v1917_v36  ;;  %v5368_v14 = vsub.f32 %v5014_v32, %v5152_v23  ;;  %v6735_v32 = vld [vmem:[#allocation15_spill] sm:$0xff] }
 0x3f7   :  { %v1992_v49 = vadd.f32 %v1991_v27, %v1918_v50  ;;  %v3371_v27 = vld [vmem:[%s6428_s5 + $0x38] sm:$0xff]  }
 0x3f8   :  { %3209 = vmatprep.subr.bf16.mxu0 %v3371_v27 }
 0x3f9   :  { %v1993_v21 = vadd.f32 %v1992_v49, %v1919_v59  ;;  %v6734_v59 = vld [vmem:[#allocation14_spill] sm:$0xff]  ;;  %v1926_v49 = vmul.f32 %v5362_v30, %v5362_v30  ;;  %3210 = vmatpush3.bf16.msra.mxu0 %v3371_v27 }
 0x3fa   :  { %v5377_v15 = vsub.f32 %v6734_v59, %v5152_v23  ;;  %v3373_v59 = vld [vmem:[%s6428_s5 + $0x28] sm:$0xff]  }
 0x3fb   :  { %v1994_v42 = vadd.f32 %v1993_v21, %v1920_v33  ;;  %v5383_v21 = vsub.f32 %v6735_v32, %v5152_v23 }
 0x3fd   :  { %v1995_v11 = vadd.f32 %v1994_v42, %v1921_v53  ;;  %6736 = vst [vmem:[#allocation14_spill] sm:$0xff] %v5383_v21  ;;  %v1927_v53 = vmul.f32 %v5368_v14, %v5368_v14 }
 0x3ff   :  { %v1996_v47 = vadd.f32 %v1995_v11, %v1922_v57  ;;  %v3372_v57 = vld [vmem:[%s6428_s5 + $0x30] sm:$0xff]  }
 0x400   :  { %v6737_v11 = vld [vmem:[#allocation20_spill] sm:$0xff]  ;;  %3211 = vmatprep.subr.bf16.mxu0 %v3372_v57 }
 0x401   :  { %v1997_v36 = vadd.f32 %v1996_v47, %v1923_v60  ;;  %v5392_v60 = vsub.f32 %v6737_v11, %v5152_v23  ;;  %v1928_v47 = vmul.f32 %v5377_v15, %v5377_v15  ;;  %3212 = vmatpush3.bf16.msra.mxu0 %v3372_v57 }
 0x402   :  { %3213 = vmatprep.subr.bf16.mxu0 %v3373_v59 }
 0x403   :  { %v1998_v50 = vadd.f32 %v1997_v36, %v1924_v56  ;;  %6738 = vst [vmem:[#allocation15_spill] sm:$0xff] %v5392_v60  ;;  %v6739_v36 = vld [vmem:[#allocation21_spill] sm:$0xff]  ;;  %v1930_v32 = vmul.f32 %v5392_v60, %v5392_v60 }
 0x405   :  { %v1999_v33 = vadd.f32 %v1998_v50, %v1925_v44  ;;  %v5398_v44 = vsub.f32 %v6739_v36, %v5152_v23  ;;  %v1929_v50 = vmul.f32 %v5383_v21, %v5383_v21  ;;  %3214 = vmatpush3.bf16.msra.mxu0 %v3373_v59  ;;  %v6745_v36 = vld [vmem:[#allocation24_spill] sm:$0xff] }
 0x407   :  { %v2000_v42 = vadd.f32 %v1999_v33, %v1926_v49  ;;  %6740 = vst [vmem:[#allocation20_spill] sm:$0xff] %v5398_v44  ;;  %v6741_v49 = vld [vmem:[#allocation22_spill] sm:$0xff]  ;;  %v1931_v57 = vmul.f32 %v5398_v44, %v5398_v44 }
 0x408   :  { %v5407_v33 = vsub.f32 %v6741_v49, %v5152_v23  ;;  %v5422_v49 = vsub.f32 %v6745_v36, %v5152_v23  ;;  %v6749_v36 = vld [vmem:[#allocation30_spill] sm:$0xff] }
 0x409   :  { %v2001_v56 = vadd.f32 %v2000_v42, %v1927_v53  ;;  %v6743_v42 = vld [vmem:[#allocation23_spill] sm:$0xff]  ;;  %v5437_v44 = vsub.f32 %v6749_v36, %v5152_v23  ;;  %v6753_v36 = vld [vmem:[#allocation32_spill] sm:$0xff] }
 0x40a   :  { %6742 = vst [vmem:[#allocation21_spill] sm:$0xff] %v5407_v33  ;;  %v5413_v11 = vsub.f32 %v6743_v42, %v5152_v23  ;;  %6746 = vst [vmem:[#allocation23_spill] sm:$0xff] %v5422_v49  ;;  %v6747_v42 = vld [vmem:[#allocation25_spill] sm:$0xff] }
 0x40b   :  { %v2002_v27 = vadd.f32 %v2001_v56, %v1928_v47  ;;  %v3374_v56 = vld [vmem:[%s6428_s5 + $0x20] sm:$0xff]   ;;  %v5428_v60 = vsub.f32 %v6747_v42, %v5152_v23  ;;  %6750 = vst [vmem:[#allocation25_spill] sm:$0xff] %v5437_v44  ;;  %v6751_v42 = vld [vmem:[#allocation31_spill] sm:$0xff] }
 0x40c   :  { %6744 = vst [vmem:[#allocation22_spill] sm:$0xff] %v5413_v11  ;;  %3215 = vmatprep.subr.bf16.mxu0 %v3374_v56  ;;  %v1933_v59 = vmul.f32 %v5413_v11, %v5413_v11  ;;  %v5452_v11 = vsub.f32 %v6753_v36, %v5152_v23  ;;  %v6757_v36 = vld [vmem:[#allocation34_spill] sm:$0xff] }
 0x40d   :  { %v2003_v53 = vadd.f32 %v2002_v27, %v1929_v50  ;;  %v1932_v50 = vmul.f32 %v5407_v33, %v5407_v33  ;;  %6748 = vst [vmem:[#allocation24_spill] sm:$0xff] %v5428_v60  ;;  %3216 = vmatpush3.bf16.msra.mxu0 %v3374_v56  ;;  %v5443_v33 = vsub.f32 %v6751_v42, %v5152_v23  ;;  %v6755_v42 = vld [vmem:[#allocation33_spill] sm:$0xff] }
 0x40e   :  { %v1935_v56 = vmul.f32 %v5428_v60, %v5428_v60  ;;  %6754 = vst [vmem:[#allocation31_spill] sm:$0xff] %v5452_v11  ;;  %v5467_v60 = vsub.f32 %v6757_v36, %v5152_v23  ;;  %v6761_v36 = vld [vmem:[#allocation2_spill] sm:$0xff] }
 0x40f   :  { %v2004_v47 = vadd.f32 %v2003_v53, %v1930_v32  ;;  %v3375_v53 = vld [vmem:[%s6428_s5 + $0x18] sm:$0xff]   ;;  %6752 = vst [vmem:[#allocation30_spill] sm:$0xff] %v5443_v33 }
 0x410   :  { %3217 = vmatprep.subr.bf16.mxu0 %v3375_v53  ;;  %6758 = vst [vmem:[#allocation33_spill] sm:$0xff] %v5467_v60 }
 0x411   :  { %v2005_v27 = vadd.f32 %v2004_v47, %v1931_v57  ;;  %v1934_v57 = vmul.f32 %v5422_v49, %v5422_v49  ;;  %3218 = vmatpush3.bf16.msra.mxu0 %v3375_v53  ;;  %v5458_v49 = vsub.f32 %v6755_v42, %v5152_v23  ;;  %v1937_v53 = vmul.f32 %v5443_v33, %v5443_v33  ;;  %v6759_v42 = vld [vmem:[#allocation35_spill] sm:$0xff] }
 0x412   :  { %v5482_v33 = vsub.f32 %v6761_v36, %v5152_v23 }
 0x413   :  { %v2006_v32 = vadd.f32 %v2005_v27, %v1932_v50  ;;  %v3376_v27 = vld [vmem:[%s6428_s5 + $0x10] sm:$0xff]   ;;  %6756 = vst [vmem:[#allocation32_spill] sm:$0xff] %v5458_v49 }
 0x414   :  { %3219 = vmatprep.subr.bf16.mxu0 %v3376_v27  ;;  %6762 = vst [vmem:[#allocation35_spill] sm:$0xff] %v5482_v33  ;;  %v1942_v36 = vmul.f32 %v5482_v33, %v5482_v33 }
 0x415   :  { %v2007_v47 = vadd.f32 %v2006_v32, %v1933_v59  ;;  %v1936_v59 = vmul.f32 %v5437_v44, %v5437_v44  ;;  %3220 = vmatpush3.bf16.msra.mxu0 %v3376_v27  ;;  %v5473_v44 = vsub.f32 %v6759_v42, %v5152_v23  ;;  %v1939_v27 = vmul.f32 %v5458_v49, %v5458_v49  ;;  %v6763_v42 = vld [vmem:[#allocation3_spill] sm:$0xff] }
 0x417   :  { %v2008_v50 = vadd.f32 %v2007_v47, %v1934_v57  ;;  %v3377_v47 = vld [vmem:[%s6428_s5 + $0x8] sm:$0xff]   ;;  %6760 = vst [vmem:[#allocation34_spill] sm:$0xff] %v5473_v44 }
 0x418   :  { %3221 = vmatprep.subr.bf16.mxu0 %v3377_v47 }
 0x419   :  { %v2009_v32 = vadd.f32 %v2008_v50, %v1935_v56  ;;  %v1938_v56 = vmul.f32 %v5452_v11, %v5452_v11  ;;  %3222 = vmatpush3.bf16.msra.mxu0 %v3377_v47  ;;  %v5488_v11 = vsub.f32 %v6763_v42, %v5152_v23  ;;  %v1941_v47 = vmul.f32 %v5473_v44, %v5473_v44  ;;  %v6769_v44 = vld [vmem:[#allocation6_spill] sm:$0xff] }
 0x41b   :  { %v2010_v57 = vadd.f32 %v2009_v32, %v1936_v59  ;;  %v3378_v32 = vld [vmem:[%s6428_s5] sm:$0xff]   ;;  %6764 = vst [vmem:[#allocation2_spill] sm:$0xff] %v5488_v11  ;;  %v1943_v42 = vmul.f32 %v5488_v11, %v5488_v11 }
 0x41c   :  { %3223 = vmatprep.subr.bf16.mxu0 %v3378_v32 }
 0x41d   :  { %v2011_v50 = vadd.f32 %v2010_v57, %v1937_v53  ;;  %v1940_v53 = vmul.f32 %v5467_v60, %v5467_v60  ;;  %3224 = vmatpush3.bf16.msra.mxu0 %v3378_v32 }
 0x41f   :  { %v2012_v59 = vadd.f32 %v2011_v50, %v1938_v56  ;;  %v6765_v50 = vld [vmem:[#allocation4_spill] sm:$0xff] }
 0x420   :  { %v5494_v49 = vsub.f32 %v6765_v50, %v5152_v23  ;;  %v6771_v50 = vld [vmem:[#allocation7_spill] sm:$0xff] }
 0x421   :  { %v2013_v57 = vadd.f32 %v2012_v59, %v1939_v27  ;;  %v6767_v27 = vld [vmem:[#allocation5_spill] sm:$0xff]  ;;  %v5512_v33 = vsub.f32 %v6771_v50, %v5152_v23  ;;  %v6777_v50 = vld [vmem:[#allocation10_spill] sm:$0xff] }
 0x422   :  { %6766 = vst [vmem:[#allocation3_spill] sm:$0xff] %v5494_v49  ;;  %v5500_v59 = vsub.f32 %v6767_v27, %v5152_v23  ;;  %v1944_v32 = vmul.f32 %v5494_v49, %v5494_v49  ;;  %v6773_v27 = vld [vmem:[#allocation8_spill] sm:$0xff] }
 0x423   :  { %v2014_v56 = vadd.f32 %v2013_v57, %v1940_v53  ;;  %v5506_v53 = vsub.f32 %v6769_v44, %v5152_v23  ;;  %6772 = vst [vmem:[#allocation6_spill] sm:$0xff] %v5512_v33  ;;  %v5518_v11 = vsub.f32 %v6773_v27, %v5152_v23  ;;  %v6779_v27 = vld [vmem:[#allocation11_spill] sm:$0xff] }
 0x424   :  { %6768 = vst [vmem:[#allocation4_spill] sm:$0xff] %v5500_v59 }
 0x425   :  { %v2015_v21 = vadd.f32 %v2014_v56, %v1941_v47  ;;  %6770 = vst [vmem:[#allocation5_spill] sm:$0xff] %v5506_v53  ;;  %v1945_v47 = vmul.f32 %v5500_v59, %v5500_v59  ;;  %6774 = vst [vmem:[#allocation7_spill] sm:$0xff] %v5518_v11  ;;  %v5530_v59 = vsub.f32 %v6777_v50, %v5152_v23  ;;  %v6782_v50 = vld [vmem:[#allocation13_spill] sm:$0xff] }
 0x427   :  { %v2016_v60 = vadd.f32 %v2015_v21, %v1942_v36  ;;  %v1946_v21 = vmul.f32 %v5506_v53, %v5506_v53  ;;  %v6775_v36 = vld [vmem:[#allocation9_spill] sm:$0xff]  ;;  %v5536_v53 = vsub.f32 %v6779_v27, %v5152_v23  ;;  %v6784_v27 = vld [vmem:[#allocation27_spill] sm:$0xff] }
 0x428   :  { %v5524_v49 = vsub.f32 %v6775_v36, %v5152_v23  ;;  %6778 = vst [vmem:[#allocation9_spill] sm:$0xff] %v5530_v59  ;;  %v6781_v36 = vld [vmem:[#allocation12_spill] sm:$0xff] }
 0x429   :  { %v2017_v57 = vadd.f32 %v2016_v60, %v1943_v42  ;;  %v1947_v60 = vmul.f32 %v5512_v33, %v5512_v33  ;;  %6780 = vst [vmem:[#allocation10_spill] sm:$0xff] %v5536_v53  ;;  %v5542_v33 = vsub.f32 %v6781_v36, %v5152_v23  ;;  %v6785_v36 = vld [vmem:[#allocation28_spill] sm:$0xff] }
 0x42a   :  { %6776 = vst [vmem:[#allocation8_spill] sm:$0xff] %v5524_v49 }
 0x42b   :  { %v2018_v56 = vadd.f32 %v2017_v57, %v1944_v32  ;;  %v1948_v32 = vmul.f32 %v5518_v11, %v5518_v11  ;;  %v5548_v11 = vsub.f32 %v6782_v50, %v5152_v23  ;;  %v6786_v50 = vld [vmem:[#allocation29_spill] sm:$0xff] }
 0x42d   :  { %v2019_v44 = vadd.f32 %v2018_v56, %v1945_v47  ;;  %v1949_v47 = vmul.f32 %v5524_v49, %v5524_v49  ;;  %6783 = vst [vmem:[#allocation11_spill] sm:$0xff] %v5548_v11  ;;  %v5554_v49 = vsub.f32 %v6784_v27, %v5152_v23 }
 0x42f   :  { %v2020_v42 = vadd.f32 %v2019_v44, %v1946_v21  ;;  %v1950_v21 = vmul.f32 %v5530_v59, %v5530_v59  ;;  %v5560_v59 = vsub.f32 %v6785_v36, %v5152_v23 }
 0x431   :  { %v2021_v57 = vadd.f32 %v2020_v42, %v1947_v60  ;;  %v1951_v60 = vmul.f32 %v5536_v53, %v5536_v53  ;;  %v5566_v53 = vsub.f32 %v6786_v50, %v5152_v23  ;;  %v1955_v27 = vmul.f32 %v5560_v59, %v5560_v59 }
 0x432   :  { %v1958_v23 = vmul.f32 %v5158_v39, %v5158_v39  ;;  %v1959_v50 = vmul.f32 %v5161_v25, %v5161_v25 }
 0x433   :  { %v2022_v56 = vadd.f32 %v2021_v57, %v1948_v32  ;;  %v1952_v32 = vmul.f32 %v5542_v33, %v5542_v33 }
 0x435   :  { %v2023_v44 = vadd.f32 %v2022_v56, %v1949_v47  ;;  %v1953_v47 = vmul.f32 %v5548_v11, %v5548_v11  ;;  %v1957_v11 = vmul.f32 %v5155_v18, %v5155_v18 }
 0x437   :  { %v2024_v42 = vadd.f32 %v2023_v44, %v1950_v21  ;;  %v1954_v21 = vmul.f32 %v5554_v49, %v5554_v49 }
 0x439   :  { %v2025_v57 = vadd.f32 %v2024_v42, %v1951_v60  ;;  %v1956_v42 = vmul.f32 %v5566_v53, %v5566_v53 }
 0x43b   :  { %v2026_v56 = vadd.f32 %v2025_v57, %v1952_v32 }
 0x43d   :  { %v2027_v44 = vadd.f32 %v2026_v56, %v1953_v47  ;;  %v1960_v56 = vmul.f32 %v5164_v34, %v5164_v34 }
 0x43f   :  { %v2028_v60 = vadd.f32 %v2027_v44, %v1954_v21  ;;  %v1961_v44 = vmul.f32 %v5167_v20, %v5167_v20 }
 0x441   :  { %v2029_v36 = vadd.f32 %v2028_v60, %v1955_v27  ;;  %v1962_v60 = vmul.f32 %v5170_v19, %v5170_v19 }
 0x443   :  { %v2030_v32 = vadd.f32 %v2029_v36, %v1956_v42  ;;  %v1963_v36 = vmul.f32 %v5173_v7, %v5173_v7 }
 0x445   :  { %v2031_v57 = vadd.f32 %v2030_v32, %v1957_v11  ;;  %v1964_v32 = vmul.f32 %v5176_v1, %v5176_v1 }
 0x447   :  { %v2032_v47 = vadd.f32 %v2031_v57, %v1958_v23  ;;  %v1965_v57 = vmul.f32 %v5179_v9, %v5179_v9 }
 0x449   :  { %v2033_v21 = vadd.f32 %v2032_v47, %v1959_v50  ;;  %v1966_v47 = vmul.f32 %v5182_v3, %v5182_v3 }
 0x44b   :  { %v2034_v27 = vadd.f32 %v2033_v21, %v1960_v56  ;;  %v1967_v21 = vmul.f32 %v5185_v13, %v5185_v13 }
 0x44d   :  { %v2035_v42 = vadd.f32 %v2034_v27, %v1961_v44  ;;  %v1968_v27 = vmul.f32 %v5188_v62, %v5188_v62 }
 0x44f   :  { %v2036_v11 = vadd.f32 %v2035_v42, %v1962_v60  ;;  %v1969_v42 = vmul.f32 %v5191_v6, %v5191_v6 }
 0x451   :  { %v2037_v23 = vadd.f32 %v2036_v11, %v1963_v36  ;;  %v1970_v11 = vmul.f32 %v5194_v4, %v5194_v4 }
 0x453   :  { %v2038_v50 = vadd.f32 %v2037_v23, %v1964_v32  ;;  %v1971_v23 = vmul.f32 %v5197_v8, %v5197_v8 }
 0x455   :  { %v2039_v56 = vadd.f32 %v2038_v50, %v1965_v57  ;;  %v1972_v50 = vmul.f32 %v5200_v37, %v5200_v37 }
 0x457   :  { %v2040_v44 = vadd.f32 %v2039_v56, %v1966_v47  ;;  %v1973_v56 = vmul.f32 %v5203_v61, %v5203_v61 }
 0x459   :  { %v2041_v60 = vadd.f32 %v2040_v44, %v1967_v21  ;;  %v1974_v44 = vmul.f32 %v5206_v22, %v5206_v22 }
 0x45b   :  { %v2042_v36 = vadd.f32 %v2041_v60, %v1968_v27 }
 0x45d   :  { %v2043_v32 = vadd.f32 %v2042_v36, %v1969_v42 }
 0x45f   :  { %v2044_v57 = vadd.f32 %v2043_v32, %v1970_v11 }
 0x461   :  { %v2045_v47 = vadd.f32 %v2044_v57, %v1971_v23  ;;  %v2058_v23 = vld [vmem:[%s6429_s9] sm:$0x1] }
 0x463   :  { %v2046_v21 = vadd.f32 %v2045_v47, %v1972_v50  ;;  %v6787_v50 = vld [vmem:[#allocation26_spill] sm:$0xff] }
 0x464   :  { %v6788_v47 = vsub.s32 0, %v6787_v50 }
 0x465   :  { %v2047_v27 = vadd.f32 %v2046_v21, %v1973_v56 }
 0x467   :  { %v2048_v60 = vadd.f32 %v2047_v27, %v1974_v44  ;;  %v6794_v44 = vld [vmem:[#allocation24_spill] sm:$0xff]  ;;  %v6795_v27 = vld [vmem:[#allocation25_spill] sm:$0xff] }
 0x469   :  { %v2049_v6 = vrot.slane %v2048_v60, 4 }
 0x46b   :  { %v2050_v4 = vadd.f32 %v2049_v6, %v2048_v60  ;;  %v6796_v60 = vld [vmem:[#allocation30_spill] sm:$0xff] }
 0x46d   :  { %v2051_v42 = vrot.slane %v2050_v4, 2 }
 0x46f   :  { %v2052_v36 = vadd.f32 %v2051_v42, %v2050_v4  ;;  %v5748_v42 = vld [vmem:[%s6430_s10] ss:$0 sm:$0xff] }
 0x471   :  { %v2053_v62 = vrot.slane %v2052_v36, 1 }
 0x473   :  { %v2054_v8 = vadd.f32 %v2053_v62, %v2052_v36  ;;  %v6797_v36 = vld [vmem:[#allocation31_spill] sm:$0xff] }
 0x475   :  { %v2055_v11 = vmul.f32 0.0016666667, %v2054_v8 }
 0x477   :  { %v2056_v32 = vadd.f32 1e-05, %v2055_v11 }
 0x479   :  { %3381 = vrsqrt.f32 %v2056_v32  ;;  %v6798_v32 = vld [vmem:[#allocation32_spill] sm:$0xff] }
 0x486   :  { %v3382_v37 = vpop.eup %3381 }
 0x487   :  { %v2059_v57 = vmul.f32 %v3382_v37, %v2058_v23 }
 0x489   :  { %v5615_v13 = vrot.slane %v2059_v57, %v6788_v47  ;;  %v6799_v57 = vld [vmem:[#allocation33_spill] sm:$0xff]  ;;  %v6800_v47 = vld [vmem:[#allocation34_spill] sm:$0xff] }
 0x48b   :  { %v5619_v6 = vmul.f32 %v5615_v13, %v5203_v61  ;;  %v2064_v62 = vmul.f32 %v5615_v13, %v5210_v58  ;;  %v2065_v4 = vmul.f32 %v5615_v13, %v5214_v46  ;;  %v2066_v8 = vmul.f32 %v5615_v13, %v5218_v63 }
 0x48c   :  { %v2067_v37 = vmul.f32 %v5615_v13, %v5226_v48  ;;  %v2068_v56 = vmul.f32 %v5615_v13, %v5230_v38  ;;  %v2069_v21 = vmul.f32 %v5615_v13, %v5236_v16  ;;  %v5635_v61 = vmul.f32 %v5615_v13, %v5242_v10 }
 0x48d   :  { %6789 = vst [vmem:[#allocation12_spill] sm:$0xff] %v5619_v6  ;;  %v5639_v58 = vmul.f32 %v5615_v13, %v5248_v35  ;;  %v5643_v46 = vmul.f32 %v5615_v13, %v5254_v52  ;;  %v5647_v63 = vmul.f32 %v5615_v13, %v5260_v41  ;;  %v5651_v48 = vmul.f32 %v5615_v13, %v5266_v28  ;;  %v6812_v6 = vld [vmem:[#allocation6_spill] sm:$0xff] }
 0x48e   :  { %v5655_v38 = vmul.f32 %v5615_v13, %v5272_v0  ;;  %v5659_v16 = vmul.f32 %v5615_v13, %v5278_v40  ;;  %v5663_v10 = vmul.f32 %v5615_v13, %v5284_v31  ;;  %v5667_v35 = vmul.f32 %v5615_v13, %v5290_v24 }
 0x48f   :  { %v5671_v52 = vmul.f32 %v5615_v13, %v5296_v26  ;;  %v5675_v41 = vmul.f32 %v5615_v13, %v5302_v29  ;;  %v5679_v28 = vmul.f32 %v5615_v13, %v5308_v2  ;;  %v5683_v0 = vmul.f32 %v5615_v13, %v5314_v45 }
 0x490   :  { %v5687_v40 = vmul.f32 %v5615_v13, %v5320_v12  ;;  %v5691_v31 = vmul.f32 %v5615_v13, %v5326_v17  ;;  %v5695_v24 = vmul.f32 %v5615_v13, %v5332_v5  ;;  %v5699_v26 = vmul.f32 %v5615_v13, %v5338_v43  ;;  %v6791_v43 = vld [vmem:[#allocation14_spill] sm:$0xff] }
 0x491   :  { %v5703_v29 = vmul.f32 %v5615_v13, %v5344_v51  ;;  %v5707_v2 = vmul.f32 %v5615_v13, %v5350_v55  ;;  %v5711_v45 = vmul.f32 %v5615_v13, %v5356_v54  ;;  %v5715_v12 = vmul.f32 %v5615_v13, %v5362_v30  ;;  %v6793_v55 = vld [vmem:[#allocation23_spill] sm:$0xff] }
 0x492   :  { %v5719_v17 = vmul.f32 %v5615_v13, %v5368_v14  ;;  %v5723_v5 = vmul.f32 %v5615_v13, %v5377_v15  ;;  %v5727_v51 = vmul.f32 %v5615_v13, %v6791_v43  ;;  %v5731_v54 = vmul.f32 %v5615_v13, %v6793_v55  ;;  %v6802_v55 = vld [vmem:[#allocation35_spill] sm:$0xff] }
 0x493   :  { %v5735_v30 = vmul.f32 %v5615_v13, %v6794_v44  ;;  %v5739_v14 = vmul.f32 %v5615_v13, %v6795_v27  ;;  %v5743_v15 = vmul.f32 %v5615_v13, %v6796_v60  ;;  %v5752_v11 = vmul.f32 %v5615_v13, %v6797_v36  ;;  %v6804_v27 = vld [vmem:[#allocation2_spill] sm:$0xff]  ;;  %v6806_v36 = vld [vmem:[#allocation3_spill] sm:$0xff] }
 0x494   :  { %6790 = vst [vmem:[#allocation13_spill] sm:$0xff] %v5723_v5  ;;  %6792 = vst [vmem:[#allocation27_spill] sm:$0xff] %v5727_v51  ;;  %v5756_v23 = vmul.f32 %v5615_v13, %v6798_v32  ;;  %v5760_v50 = vmul.f32 %v5615_v13, %v6799_v57  ;;  %v5764_v43 = vmul.f32 %v5615_v13, %v6800_v47  ;;  %v6808_v51 = vld [vmem:[#allocation4_spill] sm:$0xff]  ;;  %v6810_v5 = vld [vmem:[#allocation5_spill] sm:$0xff] }
 0x495   :  { %v5768_v44 = vmul.f32 %v5615_v13, %v6802_v55  ;;  %v5772_v60 = vmul.f32 %v5615_v13, %v6804_v27  ;;  %v5776_v32 = vmul.f32 %v5615_v13, %v6806_v36  ;;  %v5780_v57 = vmul.f32 %v5615_v13, %v6808_v51 }
 0x496   :  { %6801 = vst [vmem:[#allocation28_spill] sm:$0xff] %v5764_v43  ;;  %v5784_v47 = vmul.f32 %v5615_v13, %v6810_v5  ;;  %v5788_v55 = vmul.f32 %v5615_v13, %v6812_v6  ;;  %v2138_v6 = vmul.f32 %v5615_v13, %v5206_v22  ;;  %v2151_v22 = vadd.f32 %v5748_v42, %v2069_v21  ;;  %v6822_v43 = vld [vmem:[#allocation11_spill] sm:$0xff] }
 0x497   :  { %6803 = vst [vmem:[#allocation29_spill] sm:$0xff] %v5768_v44  ;;  %6805 = vst [vmem:[#allocation26_spill] sm:$0xff] %v5772_v60  ;;  %v6814_v44 = vld [vmem:[#allocation7_spill] sm:$0xff]  ;;  %v6816_v60 = vld [vmem:[#allocation8_spill] sm:$0xff]  ;;  %v2152_v21 = vadd.f32 %v5748_v42, %v5635_v61  ;;  %v5851_v61 = vmul.f32 %v5615_v13, %v5158_v39  ;;  %v5871_v39 = vmul.f32 %v5615_v13, %v5173_v7 }
 0x498   :  { %6807 = vst [vmem:[#allocation14_spill] sm:$0xff] %v5776_v32  ;;  %6809 = vst [vmem:[#allocation23_spill] sm:$0xff] %v5780_v57  ;;  %v5792_v27 = vmul.f32 %v5615_v13, %v6814_v44  ;;  %v5796_v36 = vmul.f32 %v5615_v13, %v6816_v60  ;;  %v6818_v32 = vld [vmem:[#allocation9_spill] sm:$0xff]  ;;  %v6820_v57 = vld [vmem:[#allocation10_spill] sm:$0xff]  ;;  %v2149_v44 = vadd.f32 %v5748_v42, %v2067_v37 }
 0x499   :  { %6811 = vst [vmem:[#allocation24_spill] sm:$0xff] %v5784_v47  ;;  %6813 = vst [vmem:[#allocation25_spill] sm:$0xff] %v5788_v55  ;;  %v5800_v51 = vmul.f32 %v5615_v13, %v6818_v32  ;;  %v5804_v5 = vmul.f32 %v5615_v13, %v6820_v57  ;;  %v2148_v55 = vadd.f32 %v5748_v42, %v2066_v8 }
 0x49a   :  { %6815 = vst [vmem:[#allocation30_spill] sm:$0xff] %v5792_v27  ;;  %6817 = vst [vmem:[#allocation31_spill] sm:$0xff] %v5796_v36  ;;  %v2146_v27 = vadd.f32 %v5748_v42, %v2064_v62  ;;  %v2147_v60 = vadd.f32 %v5748_v42, %v2065_v4  ;;  %v2150_v36 = vadd.f32 %v5748_v42, %v2068_v56  ;;  %v2226_v56 = vmax.f32 %v2151_v22, 0.0 }
 0x49b   :  { %6819 = vst [vmem:[#allocation32_spill] sm:$0xff] %v5800_v51  ;;  %6821 = vst [vmem:[#allocation33_spill] sm:$0xff] %v5804_v5  ;;  %v5815_v32 = vmul.f32 %v5615_v13, %v5542_v33  ;;  %v5818_v57 = vadd.f32 %v5748_v42, %v2138_v6  ;;  %v2223_v5 = vmax.f32 %v2148_v55, 0.0  ;;  %v2224_v51 = vmax.f32 %v2149_v44, 0.0 }
 0x49c   :  { %v2221_v8 = vmax.f32 %v2146_v27, 0.0  ;;  %v2222_v47 = vmax.f32 %v2147_v60, 0.0  ;;  %v2225_v37 = vmax.f32 %v2150_v36, 0.0  ;;  %v5823_v62 = vmul.f32 %v5615_v13, %v6822_v43 }
 0x49d   :  { %v5827_v4 = vmul.f32 %v5615_v13, %v5554_v49  ;;  %v5831_v33 = vmul.f32 %v5615_v13, %v5560_v59  ;;  %v2297_v55 = vpack.c.bf16 %v2224_v51, %v2223_v5  ;;  %v2153_v27 = vadd.f32 %v5748_v42, %v5639_v58 }
 0x49e   :  { %v2296_v6 = vpack.c.bf16 %v2222_v47, %v2221_v8  ;;  %v5839_v43 = vmul.f32 %v5615_v13, %v5566_v53  ;;  %v5843_v49 = vmul.f32 %v5615_v13, %v5155_v18  ;;  %v2154_v59 = vadd.f32 %v5748_v42, %v5643_v46 }
 0x49f   :  { %v2155_v47 = vadd.f32 %v5748_v42, %v5647_v63  ;;  %v5855_v58 = vmul.f32 %v5615_v13, %v5161_v25  ;;  %v5859_v53 = vmul.f32 %v5615_v13, %v5164_v34  ;;  %v2298_v18 = vpack.c.bf16 %v2226_v56, %v2225_v37 }
 0x4a0   :  { %3225 = vmatprep.mubr.bf16.mxu0 %v2296_v6  ;;  %v5863_v46 = vmul.f32 %v5615_v13, %v5167_v20  ;;  %v5867_v63 = vmul.f32 %v5615_v13, %v5170_v19  ;;  %v5875_v25 = vmul.f32 %v5615_v13, %v5176_v1  ;;  %v5879_v34 = vmul.f32 %v5615_v13, %v5179_v9 }
 0x4a1   :  { %3226 = vmatmul.mubr.bf16.vlgmr.msra.gmra.mxu0 %v2297_v55  ;;  %v2227_v20 = vmax.f32 %v2152_v21, 0.0  ;;  %v2228_v36 = vmax.f32 %v2153_v27, 0.0  ;;  %v2156_v19 = vadd.f32 %v5748_v42, %v5651_v48  ;;  %v2229_v51 = vmax.f32 %v2154_v59, 0.0 }
 0x4a2   :  { %3229 = vmatprep.mubr.bf16.mxu0 %v2298_v18  ;;  %v2230_v5 = vmax.f32 %v2155_v47, 0.0  ;;  %v2157_v7 = vadd.f32 %v5748_v42, %v5655_v38  ;;  %v2158_v1 = vadd.f32 %v5748_v42, %v5659_v16  ;;  %v2159_v44 = vadd.f32 %v5748_v42, %v5663_v10 }
 0x4a3   :  { %v2160_v9 = vadd.f32 %v5748_v42, %v5667_v35  ;;  %v2161_v60 = vadd.f32 %v5748_v42, %v5671_v52  ;;  %v2162_v48 = vadd.f32 %v5748_v42, %v5675_v41  ;;  %v5897_v22 = vmul.f32 %v5615_v13, %v5182_v3  ;;  %v6823_v35 = vld [vmem:[#allocation16_spill] sm:$0xff] }
 0x4a4   :  { %v2163_v38 = vadd.f32 %v5748_v42, %v5679_v28  ;;  %v2164_v16 = vadd.f32 %v5748_v42, %v5683_v0  ;;  %v2165_v10 = vadd.f32 %v5748_v42, %v5687_v40  ;;  %v5907_v8 = vmul.f32 %v5615_v13, %v6823_v35 }
 0x4a5   :  { %v2299_v52 = vpack.c.bf16 %v2228_v36, %v2227_v20  ;;  %v2166_v41 = vadd.f32 %v5748_v42, %v5691_v31  ;;  %v2167_v3 = vadd.f32 %v5748_v42, %v5695_v24  ;;  %v2300_v37 = vpack.c.bf16 %v2230_v5, %v2229_v51  ;;  %v6824_v31 = vld [vmem:[#allocation17_spill] sm:$0xff]  ;;  %v6825_v51 = vld [vmem:[#allocation18_spill] sm:$0xff] }
 0x4a6   :  { %v2231_v56 = vmax.f32 %v2156_v19, 0.0  ;;  %v2232_v28 = vmax.f32 %v2157_v7, 0.0  ;;  %v2233_v55 = vmax.f32 %v2158_v1, 0.0  ;;  %v2234_v6 = vmax.f32 %v2159_v44, 0.0  ;;  %v6826_v7 = vld [vmem:[#allocation19_spill] sm:$0xff] }
 0x4a7   :  { %v2235_v0 = vmax.f32 %v2160_v9, 0.0  ;;  %v2236_v21 = vmax.f32 %v2161_v60, 0.0  ;;  %v2237_v27 = vmax.f32 %v2162_v48, 0.0  ;;  %v2238_v40 = vmax.f32 %v2163_v38, 0.0  ;;  %v6828_v9 = vld [vmem:[#allocation37_spill] sm:$0xff] }
 0x4a8   :  { %v2239_v59 = vmax.f32 %v2164_v16, 0.0  ;;  %v2240_v47 = vmax.f32 %v2165_v10, 0.0  ;;  %v5915_v18 = vadd.f32 %v5748_v42, %v5699_v26  ;;  %v5919_v20 = vmul.f32 %v5615_v13, %v6824_v31  ;;  %v6827_v26 = vld [vmem:[#allocation36_spill] sm:$0xff] }
 0x4a9   :  { %3230 = vmatmul.mubr.bf16.gmra.mxu0 %v2299_v52  ;;  %v2241_v24 = vmax.f32 %v2166_v41, 0.0  ;;  %v2242_v36 = vmax.f32 %v2167_v3, 0.0  ;;  %v5923_v19 = vadd.f32 %v5748_v42, %v5703_v29  ;;  %v5927_v5 = vmul.f32 %v5615_v13, %v6825_v51 }
 0x4aa   :  { %3233 = vmatprep.mubr.bf16.mxu0 %v2300_v37  ;;  %v5931_v1 = vmul.f32 %v5615_v13, %v6826_v7  ;;  %v5935_v44 = vmul.f32 %v5615_v13, %v6827_v26  ;;  %v5939_v60 = vmul.f32 %v5615_v13, %v6828_v9  ;;  %v2301_v48 = vpack.c.bf16 %v2232_v28, %v2231_v56  ;;  %v6831_v7 = vld [vmem:[#allocation26_spill] sm:$0xff] }
 0x4ab   :  { %v2302_v38 = vpack.c.bf16 %v2234_v6, %v2233_v55  ;;  %v2303_v29 = vpack.c.bf16 %v2236_v21, %v2235_v0  ;;  %v5943_v16 = vadd.f32 %v5748_v42, %v5707_v2  ;;  %v2304_v10 = vpack.c.bf16 %v2238_v40, %v2237_v27 }
 0x4ac   :  { %v5945_v35 = vpack.c.bf16 %v2240_v47, %v2239_v59  ;;  %v2243_v52 = vmax.f32 %v5915_v18, 0.0  ;;  %v5950_v41 = vadd.f32 %v5748_v42, %v5711_v45  ;;  %v5952_v3 = vpack.c.bf16 %v2242_v36, %v2241_v24  ;;  %v6829_v47 = vld [vmem:[#allocation28_spill] sm:$0xff]  ;;  %v6830_v36 = vld [vmem:[#allocation29_spill] sm:$0xff] }
 0x4ad   :  { %v2244_v37 = vmax.f32 %v5923_v19, 0.0  ;;  %v2180_v56 = vadd.f32 %v5748_v42, %v5731_v54  ;;  %v2181_v2 = vadd.f32 %v5748_v42, %v5735_v30  ;;  %v5961_v28 = vadd.f32 %v5748_v42, %v5715_v12 }
 0x4ae   :  { %v5965_v55 = vadd.f32 %v5748_v42, %v5719_v17  ;;  %v2182_v45 = vadd.f32 %v5748_v42, %v5739_v14  ;;  %v2183_v6 = vadd.f32 %v5748_v42, %v5743_v15  ;;  %v2245_v0 = vmax.f32 %v5943_v16, 0.0 }
 0x4af   :  { %v2255_v54 = vmax.f32 %v2180_v56, 0.0  ;;  %v2256_v21 = vmax.f32 %v2181_v2, 0.0  ;;  %v2184_v30 = vadd.f32 %v5748_v42, %v5752_v11  ;;  %v2246_v12 = vmax.f32 %v5950_v41, 0.0  ;;  %v6833_v56 = vld [vmem:[#allocation23_spill] sm:$0xff] }
 0x4b0   :  { %v2257_v27 = vmax.f32 %v2182_v45, 0.0  ;;  %v2258_v40 = vmax.f32 %v2183_v6, 0.0  ;;  %v2185_v17 = vadd.f32 %v5748_v42, %v5756_v23  ;;  %v2186_v15 = vadd.f32 %v5748_v42, %v5760_v50 }
 0x4b1   :  { %3234 = vmatmul.mubr.bf16.gmra.mxu0 %v2301_v48  ;;  %v5977_v14 = vpack.c.bf16 %v2256_v21, %v2255_v54  ;;  %v2259_v59 = vmax.f32 %v2184_v30, 0.0  ;;  %v2187_v31 = vadd.f32 %v5748_v42, %v6829_v47  ;;  %v2188_v51 = vadd.f32 %v5748_v42, %v6830_v36  ;;  %v6832_v48 = vld [vmem:[#allocation14_spill] sm:$0xff]  ;;  %v6834_v54 = vld [vmem:[#allocation24_spill] sm:$0xff] }
 0x4b2   :  { %3237 = vmatprep.mubr.bf16.mxu0 %v2302_v38  ;;  %v5983_v24 = vpack.c.bf16 %v2258_v40, %v2257_v27  ;;  %v2260_v11 = vmax.f32 %v2185_v17, 0.0  ;;  %v2189_v26 = vadd.f32 %v5748_v42, %v6831_v7  ;;  %v2261_v23 = vmax.f32 %v2186_v15, 0.0  ;;  %v6835_v17 = vld [vmem:[#allocation25_spill] sm:$0xff]  ;;  %v6836_v36 = vld [vmem:[#allocation30_spill] sm:$0xff] }
 0x4b3   :  { %v2262_v9 = vmax.f32 %v2187_v31, 0.0  ;;  %v2190_v38 = vadd.f32 %v5748_v42, %v6832_v48  ;;  %v2191_v50 = vadd.f32 %v5748_v42, %v6833_v56  ;;  %v2263_v45 = vmax.f32 %v2188_v51, 0.0  ;;  %v6838_v48 = vld [vmem:[#allocation32_spill] sm:$0xff] }
 0x4b4   :  { %v5993_v2 = vpack.c.bf16 %v2260_v11, %v2259_v59  ;;  %v2264_v6 = vmax.f32 %v2189_v26, 0.0  ;;  %v2192_v21 = vadd.f32 %v5748_v42, %v6834_v54  ;;  %v2193_v15 = vadd.f32 %v5748_v42, %v6835_v17  ;;  %v6837_v59 = vld [vmem:[#allocation31_spill] sm:$0xff] }
 0x4b5   :  { %v5997_v30 = vpack.c.bf16 %v2262_v9, %v2261_v23  ;;  %v2265_v27 = vmax.f32 %v2190_v38, 0.0  ;;  %v2266_v40 = vmax.f32 %v2191_v50, 0.0  ;;  %v2194_v7 = vadd.f32 %v5748_v42, %v6836_v36  ;;  %v6839_v9 = vld [vmem:[#allocation33_spill] sm:$0xff] }
 0x4b6   :  { %v6001_v47 = vpack.c.bf16 %v2264_v6, %v2263_v45  ;;  %v2267_v31 = vmax.f32 %v2192_v21, 0.0  ;;  %v2195_v11 = vadd.f32 %v5748_v42, %v6837_v59  ;;  %v2268_v26 = vmax.f32 %v2193_v15, 0.0 }
 0x4b7   :  { %v6007_v51 = vpack.c.bf16 %v2266_v40, %v2265_v27  ;;  %v2196_v23 = vadd.f32 %v5748_v42, %v6838_v48  ;;  %v2197_v38 = vadd.f32 %v5748_v42, %v6839_v9  ;;  %v2269_v56 = vmax.f32 %v2194_v7, 0.0 }
 0x4b8   :  { %v2270_v50 = vmax.f32 %v2195_v11, 0.0  ;;  %v2198_v45 = vadd.f32 %v5748_v42, %v5815_v32  ;;  %v2199_v6 = vadd.f32 %v5748_v42, %v5823_v62  ;;  %v6017_v54 = vpack.c.bf16 %v2268_v26, %v2267_v31 }
 0x4b9   :  { %3238 = vmatmul.mubr.bf16.gmra.mxu0 %v2303_v29  ;;  %v2271_v21 = vmax.f32 %v2196_v23, 0.0  ;;  %v2272_v27 = vmax.f32 %v2197_v38, 0.0  ;;  %v2200_v40 = vadd.f32 %v5748_v42, %v5827_v4  ;;  %v2201_v36 = vadd.f32 %v5748_v42, %v5831_v33 }
 0x4ba   :  { %3241 = vmatprep.mubr.bf16.mxu0 %v2304_v10  ;;  %v6021_v17 = vpack.c.bf16 %v2270_v50, %v2269_v56  ;;  %v2273_v15 = vmax.f32 %v2198_v45, 0.0  ;;  %v2274_v29 = vmax.f32 %v2199_v6, 0.0  ;;  %v2202_v62 = vadd.f32 %v5748_v42, %v5839_v43 }
 0x4bb   :  { %v6025_v7 = vpack.c.bf16 %v2272_v27, %v2271_v21  ;;  %v2275_v32 = vmax.f32 %v2200_v40, 0.0  ;;  %v2203_v10 = vadd.f32 %v5748_v42, %v5843_v49  ;;  %v2276_v59 = vmax.f32 %v2201_v36, 0.0 }
 0x4bc   :  { %v6031_v31 = vpack.c.bf16 %v2274_v29, %v2273_v15  ;;  %v2204_v4 = vadd.f32 %v5748_v42, %v5851_v61  ;;  %v2205_v11 = vadd.f32 %v5748_v42, %v5855_v58  ;;  %v2277_v26 = vmax.f32 %v2202_v62, 0.0 }
 0x4bd   :  { %v2278_v33 = vmax.f32 %v2203_v10, 0.0  ;;  %v2206_v48 = vadd.f32 %v5748_v42, %v5859_v53  ;;  %v2207_v43 = vadd.f32 %v5748_v42, %v5863_v46  ;;  %v6041_v23 = vpack.c.bf16 %v2276_v59, %v2275_v32 }
 0x4be   :  { %v2279_v49 = vmax.f32 %v2204_v4, 0.0  ;;  %v2280_v9 = vmax.f32 %v2205_v11, 0.0  ;;  %v2208_v38 = vadd.f32 %v5748_v42, %v5867_v63  ;;  %v2209_v58 = vadd.f32 %v5748_v42, %v5871_v39  ;;  %v6840_v4 = vld [vmem:[#allocation12_spill] sm:$0xff] }
 0x4bf   :  { %v6045_v56 = vpack.c.bf16 %v2278_v33, %v2277_v26  ;;  %v2281_v61 = vmax.f32 %v2206_v48, 0.0  ;;  %v2282_v50 = vmax.f32 %v2207_v43, 0.0  ;;  %v2210_v46 = vadd.f32 %v5748_v42, %v5875_v25  ;;  %v6842_v43 = vld [vmem:[#allocation27_spill] sm:$0xff] }
 0x4c0   :  { %v6050_v53 = vpack.c.bf16 %v2280_v9, %v2279_v49  ;;  %v2283_v45 = vmax.f32 %v2208_v38, 0.0  ;;  %v2211_v6 = vadd.f32 %v5748_v42, %v5879_v34  ;;  %v2284_v21 = vmax.f32 %v2209_v58, 0.0  ;;  %v6844_v38 = vld [vmem:[#allocation20_spill] sm:$0xff] }
 0x4c1   :  { %3242 = vmatmul.mubr.bf16.gmra.mxu0 %v5945_v35  ;;  %v6057_v63 = vpack.c.bf16 %v2282_v50, %v2281_v61  ;;  %v2212_v27 = vadd.f32 %v5748_v42, %v5897_v22  ;;  %v2213_v39 = vadd.f32 %v5748_v42, %v5907_v8  ;;  %v2285_v35 = vmax.f32 %v2210_v46, 0.0  ;;  %v6846_v50 = vld [vmem:[#allocation22_spill] sm:$0xff] }
 0x4c2   :  { %3245 = vmatprep.mubr.bf16.mxu0 %v5952_v3  ;;  %v2286_v40 = vmax.f32 %v2211_v6, 0.0  ;;  %v2214_v15 = vadd.f32 %v5748_v42, %v5919_v20  ;;  %v2215_v25 = vadd.f32 %v5748_v42, %v5927_v5  ;;  %v2327_v34 = vpack.c.bf16 %v2284_v21, %v2283_v45 }
 0x4c3   :  { %v2287_v29 = vmax.f32 %v2212_v27, 0.0  ;;  %v2288_v3 = vmax.f32 %v2213_v39, 0.0  ;;  %v2216_v36 = vadd.f32 %v5748_v42, %v5931_v1  ;;  %v2217_v8 = vadd.f32 %v5748_v42, %v5935_v44  ;;  %v6841_v1 = vld [vmem:[#allocation13_spill] sm:$0xff] }
 0x4c4   :  { %v2328_v32 = vpack.c.bf16 %v2286_v40, %v2285_v35  ;;  %v2289_v62 = vmax.f32 %v2214_v15, 0.0  ;;  %v2290_v22 = vmax.f32 %v2215_v25, 0.0  ;;  %v2218_v20 = vadd.f32 %v5748_v42, %v5939_v60 }
 0x4c5   :  { %v2329_v10 = vpack.c.bf16 %v2288_v3, %v2287_v29  ;;  %v2291_v59 = vmax.f32 %v2216_v36, 0.0  ;;  %v2219_v5 = vadd.f32 %v5748_v42, %v6840_v4  ;;  %v2307_v11 = vpack.c.bf16 %v2244_v37, %v2243_v52  ;;  %v6843_v52 = vld [vmem:[#allocation15_spill] sm:$0xff] }
 0x4c6   :  { %v2174_v26 = vadd.f32 %v5748_v42, %v6841_v1  ;;  %v2330_v33 = vpack.c.bf16 %v2290_v22, %v2289_v62  ;;  %v2292_v48 = vmax.f32 %v2217_v8, 0.0  ;;  %v2308_v44 = vpack.c.bf16 %v2246_v12, %v2245_v0  ;;  %v6845_v0 = vld [vmem:[#allocation21_spill] sm:$0xff] }
 0x4c7   :  { %v2175_v60 = vadd.f32 %v5748_v42, %v6842_v43  ;;  %v2293_v49 = vmax.f32 %v2218_v20, 0.0  ;;  %v2294_v9 = vmax.f32 %v2219_v5, 0.0  ;;  %v2094_v37 = vmul.f32 %v5615_v13, %v6843_v52 }
 0x4c8   :  { %v2331_v18 = vpack.c.bf16 %v2292_v48, %v2291_v59  ;;  %v2095_v61 = vmul.f32 %v5615_v13, %v6844_v38  ;;  %v2247_v16 = vmax.f32 %v5961_v28, 0.0  ;;  %v2248_v41 = vmax.f32 %v5965_v55, 0.0 }
 0x4c9   :  { %3246 = vmatmul.mubr.bf16.gmra.mxu0 %v2307_v11  ;;  %v2332_v19 = vpack.c.bf16 %v2294_v9, %v2293_v49  ;;  %v2096_v12 = vmul.f32 %v5615_v13, %v6845_v0  ;;  %v2097_v58 = vmul.f32 %v5615_v13, %v6846_v50  ;;  %v2249_v45 = vmax.f32 %v2174_v26, 0.0 }
 0x4ca   :  { %3249 = vmatprep.mubr.bf16.mxu0 %v2308_v44  ;;  %v2250_v46 = vmax.f32 %v2175_v60, 0.0  ;;  %v2309_v6 = vpack.c.bf16 %v2248_v41, %v2247_v16  ;;  %v2176_v21 = vadd.f32 %v5748_v42, %v2094_v37  ;;  %v2177_v27 = vadd.f32 %v5748_v42, %v2095_v61 }
 0x4cb   :  { %v2178_v35 = vadd.f32 %v5748_v42, %v2096_v12  ;;  %v2179_v28 = vadd.f32 %v5748_v42, %v2097_v58  ;;  %v2295_v42 = vmax.f32 %v5818_v57, 0.0 }
 0x4cc   :  { %v2310_v39 = vpack.c.bf16 %v2250_v46, %v2249_v45  ;;  %v2251_v55 = vmax.f32 %v2176_v21, 0.0  ;;  %v2252_v40 = vmax.f32 %v2177_v27, 0.0 }
 0x4cd   :  { %v2253_v15 = vmax.f32 %v2178_v35, 0.0  ;;  %v2254_v25 = vmax.f32 %v2179_v28, 0.0 }
 0x4ce   :  { %v2311_v29 = vpack.c.bf16 %v2252_v40, %v2251_v55 }
 0x4cf   :  { %v2312_v13 = vpack.c.bf16 %v2254_v25, %v2253_v15 }
 0x4d1   :  { %3250 = vmatmul.mubr.bf16.gmra.mxu0 %v2309_v6 }
 0x4d2   :  { %3253 = vmatprep.mubr.bf16.mxu0 %v2310_v39 }
 0x4d9   :  { %3254 = vmatmul.mubr.bf16.gmra.mxu0 %v2311_v29 }
 0x4da   :  { %3257 = vmatprep.mubr.bf16.mxu0 %v2312_v13 }
 0x4e1   :  { %3258 = vmatmul.mubr.bf16.gmra.mxu0 %v5977_v14  ;;  %v2333_v14 = vpack.c.bf16 %v2295_v42, %v2295_v42 }
 0x4e2   :  { %3261 = vmatprep.mubr.bf16.mxu0 %v5983_v24  ;;  %v6119_v24 = vld [vmem:[%s6431_s6] ss:$0 sm:$0xff] }
 0x4e9   :  { %3262 = vmatmul.mubr.bf16.gmra.mxu0 %v5993_v2 }
 0x4ea   :  { %3265 = vmatprep.mubr.bf16.mxu0 %v5997_v30 }
 0x4f1   :  { %3266 = vmatmul.mubr.bf16.gmra.mxu0 %v6001_v47 }
 0x4f2   :  { %3269 = vmatprep.mubr.bf16.mxu0 %v6007_v51 }
 0x4f9   :  { %3270 = vmatmul.mubr.bf16.gmra.mxu0 %v6017_v54 }
 0x4fa   :  { %3273 = vmatprep.mubr.bf16.mxu0 %v6021_v17 }
 0x501   :  { %3274 = vmatmul.mubr.bf16.gmra.mxu0 %v6025_v7 }
 0x502   :  { %3277 = vmatprep.mubr.bf16.mxu0 %v6031_v31 }
 0x509   :  { %3278 = vmatmul.mubr.bf16.gmra.mxu0 %v6041_v23 }
 0x50a   :  { %3281 = vmatprep.mubr.bf16.mxu0 %v6045_v56 }
 0x511   :  { %3282 = vmatmul.mubr.bf16.gmra.mxu0 %v6050_v53 }
 0x512   :  { %3285 = vmatprep.mubr.bf16.mxu0 %v6057_v63 }
 0x519   :  { %3286 = vmatmul.mubr.bf16.gmra.mxu0 %v2327_v34 }
 0x51a   :  { %3289 = vmatprep.mubr.bf16.mxu0 %v2328_v32 }
 0x521   :  { %3290 = vmatmul.mubr.bf16.gmra.mxu0 %v2329_v10 }
 0x522   :  { %3293 = vmatprep.mubr.bf16.mxu0 %v2330_v33 }
 0x529   :  { %3294 = vmatmul.mubr.bf16.gmra.mxu0 %v2331_v18 }
 0x52a   :  { %3297 = vmatprep.mubr.bf16.mxu0 %v2332_v19 }
 0x531   :  { %3298 = vmatmul.mubr.bf16.gmra.mxu0 %v2333_v14 }
 0x561   :  { %v3227_v2 = vpop.f32.mrf.mxu0 }
 0x562   :  { %v2448_v30 = vadd.f32 %v3227_v2, %v6119_v24 }
 0x563   :  { %v2439_v47 = vpop.f32.mrf.mxu0 }
 0x564   :  { %2743 = vst [vmem:[%s6432_s11 + $0x10] sm:$0xff] %v2448_v30  ;;  %v2440_v51 = vadd.f32 %v6119_v24, %v2439_v47 }
 0x565   :  { %v3228_v54 = vpop.f32.mrf.mxu0 }
 0x566   :  { %2741 = vst [vmem:[%s6432_s11] sm:$0xff] %v2440_v51  ;;  %v2451_v57 = vadd.f32 %v3228_v54, %v6119_v24 }
 0x567   :  { %v2442_v17 = vpop.f32.mrf.mxu0 }
 0x568   :  { %2744 = vst [vmem:[%s6432_s11 + $0x18] sm:$0xff] %v2451_v57  ;;  %v2443_v7 = vadd.f32 %v6119_v24, %v2442_v17 }
 0x569   :  { %v3231_v31 = vpop.f32.mrf.mxu0 }
 0x56a   :  { %2742 = vst [vmem:[%s6432_s11 + $0x8] sm:$0xff] %v2443_v7  ;;  %v2464_v23 = vadd.f32 %v3231_v31, %v6119_v24 }
 0x56b   :  { %v2455_v56 = vpop.f32.mrf.mxu0 }
 0x56c   :  { %2747 = vst [vmem:[%s6432_s11 + $0x30] sm:$0xff] %v2464_v23  ;;  %v2456_v53 = vadd.f32 %v6119_v24, %v2455_v56 }
 0x56d   :  { %v3232_v63 = vpop.f32.mrf.mxu0 }
 0x56e   :  { %2745 = vst [vmem:[%s6432_s11 + $0x20] sm:$0xff] %v2456_v53  ;;  %v2467_v34 = vadd.f32 %v3232_v63, %v6119_v24 }
 0x56f   :  { %v2458_v3 = vpop.f32.mrf.mxu0 }
 0x570   :  { %2748 = vst [vmem:[%s6432_s11 + $0x38] sm:$0xff] %v2467_v34  ;;  %v2459_v36 = vadd.f32 %v6119_v24, %v2458_v3 }
 0x571   :  { %v3235_v32 = vpop.f32.mrf.mxu0 }
 0x572   :  { %2746 = vst [vmem:[%s6432_s11 + $0x28] sm:$0xff] %v2459_v36  ;;  %v2480_v62 = vadd.f32 %v3235_v32, %v6119_v24 }
 0x573   :  { %v2471_v22 = vpop.f32.mrf.mxu0 }
 0x574   :  { %2751 = vst [vmem:[%s6432_s11 + $0x50] sm:$0xff] %v2480_v62  ;;  %v2472_v8 = vadd.f32 %v6119_v24, %v2471_v22 }
 0x575   :  { %v3236_v10 = vpop.f32.mrf.mxu0 }
 0x576   :  { %2749 = vst [vmem:[%s6432_s11 + $0x40] sm:$0xff] %v2472_v8  ;;  %v2483_v59 = vadd.f32 %v3236_v10, %v6119_v24 }
 0x577   :  { %v2474_v20 = vpop.f32.mrf.mxu0 }
 0x578   :  { %2752 = vst [vmem:[%s6432_s11 + $0x58] sm:$0xff] %v2483_v59  ;;  %v2475_v4 = vadd.f32 %v6119_v24, %v2474_v20 }
 0x579   :  { %v3239_v5 = vpop.f32.mrf.mxu0 }
 0x57a   :  { %2750 = vst [vmem:[%s6432_s11 + $0x48] sm:$0xff] %v2475_v4  ;;  %v2496_v11 = vadd.f32 %v3239_v5, %v6119_v24 }
 0x57b   :  { %v2487_v1 = vpop.f32.mrf.mxu0 }
 0x57c   :  { %2755 = vst [vmem:[%s6432_s11 + $0x70] sm:$0xff] %v2496_v11  ;;  %v2488_v26 = vadd.f32 %v6119_v24, %v2487_v1 }
 0x57d   :  { %v3240_v33 = vpop.f32.mrf.mxu0 }
 0x57e   :  { %2753 = vst [vmem:[%s6432_s11 + $0x60] sm:$0xff] %v2488_v26  ;;  %v2499_v48 = vadd.f32 %v3240_v33, %v6119_v24 }
 0x57f   :  { %v2490_v44 = vpop.f32.mrf.mxu0 }
 0x580   :  { %2756 = vst [vmem:[%s6432_s11 + $0x78] sm:$0xff] %v2499_v48  ;;  %v2491_v43 = vadd.f32 %v6119_v24, %v2490_v44 }
 0x581   :  { %v3243_v60 = vpop.f32.mrf.mxu0 }
 0x582   :  { %2754 = vst [vmem:[%s6432_s11 + $0x68] sm:$0xff] %v2491_v43  ;;  %v2512_v49 = vadd.f32 %v3243_v60, %v6119_v24 }
 0x583   :  { %v2503_v9 = vpop.f32.mrf.mxu0 }
 0x584   :  { %2759 = vst [vmem:[%s6432_s11 + $0x90] sm:$0xff] %v2512_v49  ;;  %v2504_v18 = vadd.f32 %v6119_v24, %v2503_v9 }
 0x585   :  { %v3244_v19 = vpop.f32.mrf.mxu0 }
 0x586   :  { %2757 = vst [vmem:[%s6432_s11 + $0x80] sm:$0xff] %v2504_v18  ;;  %v2515_v52 = vadd.f32 %v3244_v19, %v6119_v24 }
 0x587   :  { %v2506_v37 = vpop.f32.mrf.mxu0 }
 0x588   :  { %2760 = vst [vmem:[%s6432_s11 + $0x98] sm:$0xff] %v2515_v52  ;;  %v2507_v38 = vadd.f32 %v6119_v24, %v2506_v37 }
 0x589   :  { %v3247_v61 = vpop.f32.mrf.mxu0 }
 0x58a   :  { %2758 = vst [vmem:[%s6432_s11 + $0x88] sm:$0xff] %v2507_v38  ;;  %v2528_v16 = vadd.f32 %v3247_v61, %v6119_v24 }
 0x58b   :  { %v2519_v41 = vpop.f32.mrf.mxu0 }
 0x58c   :  { %2763 = vst [vmem:[%s6432_s11 + $0xb0] sm:$0xff] %v2528_v16  ;;  %v2520_v0 = vadd.f32 %v6119_v24, %v2519_v41 }
 0x58d   :  { %v3248_v12 = vpop.f32.mrf.mxu0 }
 0x58e   :  { %2761 = vst [vmem:[%s6432_s11 + $0xa0] sm:$0xff] %v2520_v0  ;;  %v2531_v50 = vadd.f32 %v3248_v12, %v6119_v24 }
 0x58f   :  { %v2522_v58 = vpop.f32.mrf.mxu0 }
 0x590   :  { %2764 = vst [vmem:[%s6432_s11 + $0xb8] sm:$0xff] %v2531_v50  ;;  %v2523_v45 = vadd.f32 %v6119_v24, %v2522_v58 }
 0x591   :  { %v3251_v46 = vpop.f32.mrf.mxu0 }
 0x592   :  { %2762 = vst [vmem:[%s6432_s11 + $0xa8] sm:$0xff] %v2523_v45  ;;  %v2544_v6 = vadd.f32 %v3251_v46, %v6119_v24 }
 0x593   :  { %v2535_v21 = vpop.f32.mrf.mxu0 }
 0x594   :  { %2767 = vst [vmem:[%s6432_s11 + $0xd0] sm:$0xff] %v2544_v6  ;;  %v2536_v27 = vadd.f32 %v6119_v24, %v2535_v21 }
 0x595   :  { %v3252_v39 = vpop.f32.mrf.mxu0 }
 0x596   :  { %2765 = vst [vmem:[%s6432_s11 + $0xc0] sm:$0xff] %v2536_v27  ;;  %v2547_v35 = vadd.f32 %v3252_v39, %v6119_v24 }
 0x597   :  { %v2538_v28 = vpop.f32.mrf.mxu0 }
 0x598   :  { %2768 = vst [vmem:[%s6432_s11 + $0xd8] sm:$0xff] %v2547_v35  ;;  %v2539_v55 = vadd.f32 %v6119_v24, %v2538_v28 }
 0x599   :  { %v3255_v40 = vpop.f32.mrf.mxu0 }
 0x59a   :  { %2766 = vst [vmem:[%s6432_s11 + $0xc8] sm:$0xff] %v2539_v55  ;;  %v2560_v15 = vadd.f32 %v3255_v40, %v6119_v24 }
 0x59b   :  { %v2551_v25 = vpop.f32.mrf.mxu0 }
 0x59c   :  { %2771 = vst [vmem:[%s6432_s11 + $0xf0] sm:$0xff] %v2560_v15  ;;  %v2552_v29 = vadd.f32 %v6119_v24, %v2551_v25 }
 0x59d   :  { %v3256_v13 = vpop.f32.mrf.mxu0 }
 0x59e   :  { %2769 = vst [vmem:[%s6432_s11 + $0xe0] sm:$0xff] %v2552_v29  ;;  %v2563_v42 = vadd.f32 %v3256_v13, %v6119_v24 }
 0x59f   :  { %v2554_v14 = vpop.f32.mrf.mxu0 }
 0x5a0   :  { %2772 = vst [vmem:[%s6432_s11 + $0xf8] sm:$0xff] %v2563_v42  ;;  %v2555_v2 = vadd.f32 %v6119_v24, %v2554_v14 }
 0x5a1   :  { %v3259_v30 = vpop.f32.mrf.mxu0 }
 0x5a2   :  { %2770 = vst [vmem:[%s6432_s11 + $0xe8] sm:$0xff] %v2555_v2  ;;  %v2576_v47 = vadd.f32 %v3259_v30, %v6119_v24 }
 0x5a3   :  { %v2567_v51 = vpop.f32.mrf.mxu0 }
 0x5a4   :  { %2775 = vst [vmem:[%s6432_s11 + $0x110] sm:$0xff] %v2576_v47  ;;  %v2568_v54 = vadd.f32 %v6119_v24, %v2567_v51 }
 0x5a5   :  { %v3260_v57 = vpop.f32.mrf.mxu0 }
 0x5a6   :  { %2773 = vst [vmem:[%s6432_s11 + $0x100] sm:$0xff] %v2568_v54  ;;  %v2579_v17 = vadd.f32 %v3260_v57, %v6119_v24 }
 0x5a7   :  { %v2570_v7 = vpop.f32.mrf.mxu0 }
 0x5a8   :  { %2776 = vst [vmem:[%s6432_s11 + $0x118] sm:$0xff] %v2579_v17  ;;  %v2571_v31 = vadd.f32 %v6119_v24, %v2570_v7 }
 0x5a9   :  { %v3263_v23 = vpop.f32.mrf.mxu0 }
 0x5aa   :  { %2774 = vst [vmem:[%s6432_s11 + $0x108] sm:$0xff] %v2571_v31  ;;  %v2592_v56 = vadd.f32 %v3263_v23, %v6119_v24 }
 0x5ab   :  { %v2583_v53 = vpop.f32.mrf.mxu0 }
 0x5ac   :  { %2779 = vst [vmem:[%s6432_s11 + $0x130] sm:$0xff] %v2592_v56  ;;  %v2584_v63 = vadd.f32 %v6119_v24, %v2583_v53 }
 0x5ad   :  { %v3264_v34 = vpop.f32.mrf.mxu0 }
 0x5ae   :  { %2777 = vst [vmem:[%s6432_s11 + $0x120] sm:$0xff] %v2584_v63  ;;  %v2595_v3 = vadd.f32 %v3264_v34, %v6119_v24 }
 0x5af   :  { %v2586_v36 = vpop.f32.mrf.mxu0 }
 0x5b0   :  { %2780 = vst [vmem:[%s6432_s11 + $0x138] sm:$0xff] %v2595_v3  ;;  %v2587_v32 = vadd.f32 %v6119_v24, %v2586_v36 }
 0x5b1   :  { %v3267_v62 = vpop.f32.mrf.mxu0 }
 0x5b2   :  { %2778 = vst [vmem:[%s6432_s11 + $0x128] sm:$0xff] %v2587_v32  ;;  %v2608_v22 = vadd.f32 %v3267_v62, %v6119_v24 }
 0x5b3   :  { %v2599_v8 = vpop.f32.mrf.mxu0 }
 0x5b4   :  { %2783 = vst [vmem:[%s6432_s11 + $0x150] sm:$0xff] %v2608_v22  ;;  %v2600_v10 = vadd.f32 %v6119_v24, %v2599_v8 }
 0x5b5   :  { %v3268_v59 = vpop.f32.mrf.mxu0 }
 0x5b6   :  { %2781 = vst [vmem:[%s6432_s11 + $0x140] sm:$0xff] %v2600_v10  ;;  %v2611_v20 = vadd.f32 %v3268_v59, %v6119_v24 }
 0x5b7   :  { %v2602_v4 = vpop.f32.mrf.mxu0 }
 0x5b8   :  { %2784 = vst [vmem:[%s6432_s11 + $0x158] sm:$0xff] %v2611_v20  ;;  %v2603_v5 = vadd.f32 %v6119_v24, %v2602_v4 }
 0x5b9   :  { %v3271_v11 = vpop.f32.mrf.mxu0 }
 0x5ba   :  { %2782 = vst [vmem:[%s6432_s11 + $0x148] sm:$0xff] %v2603_v5  ;;  %v2624_v1 = vadd.f32 %v3271_v11, %v6119_v24 }
 0x5bb   :  { %v2615_v26 = vpop.f32.mrf.mxu0 }
 0x5bc   :  { %2787 = vst [vmem:[%s6432_s11 + $0x170] sm:$0xff] %v2624_v1  ;;  %v2616_v33 = vadd.f32 %v6119_v24, %v2615_v26 }
 0x5bd   :  { %v3272_v48 = vpop.f32.mrf.mxu0 }
 0x5be   :  { %2785 = vst [vmem:[%s6432_s11 + $0x160] sm:$0xff] %v2616_v33  ;;  %v2627_v44 = vadd.f32 %v3272_v48, %v6119_v24 }
 0x5bf   :  { %v2618_v43 = vpop.f32.mrf.mxu0 }
 0x5c0   :  { %2788 = vst [vmem:[%s6432_s11 + $0x178] sm:$0xff] %v2627_v44  ;;  %v2619_v60 = vadd.f32 %v6119_v24, %v2618_v43 }
 0x5c1   :  { %v3275_v49 = vpop.f32.mrf.mxu0 }
 0x5c2   :  { %2786 = vst [vmem:[%s6432_s11 + $0x168] sm:$0xff] %v2619_v60  ;;  %v2640_v9 = vadd.f32 %v3275_v49, %v6119_v24 }
 0x5c3   :  { %v2631_v18 = vpop.f32.mrf.mxu0 }
 0x5c4   :  { %2791 = vst [vmem:[%s6432_s11 + $0x190] sm:$0xff] %v2640_v9  ;;  %v2632_v19 = vadd.f32 %v6119_v24, %v2631_v18 }
 0x5c5   :  { %v3276_v52 = vpop.f32.mrf.mxu0 }
 0x5c6   :  { %2789 = vst [vmem:[%s6432_s11 + $0x180] sm:$0xff] %v2632_v19  ;;  %v2643_v37 = vadd.f32 %v3276_v52, %v6119_v24 }
 0x5c7   :  { %v2634_v38 = vpop.f32.mrf.mxu0 }
 0x5c8   :  { %2792 = vst [vmem:[%s6432_s11 + $0x198] sm:$0xff] %v2643_v37  ;;  %v2635_v61 = vadd.f32 %v6119_v24, %v2634_v38 }
 0x5c9   :  { %v3279_v16 = vpop.f32.mrf.mxu0 }
 0x5ca   :  { %2790 = vst [vmem:[%s6432_s11 + $0x188] sm:$0xff] %v2635_v61  ;;  %v2656_v41 = vadd.f32 %v3279_v16, %v6119_v24 }
 0x5cb   :  { %v2647_v0 = vpop.f32.mrf.mxu0 }
 0x5cc   :  { %2795 = vst [vmem:[%s6432_s11 + $0x1b0] sm:$0xff] %v2656_v41  ;;  %v2648_v12 = vadd.f32 %v6119_v24, %v2647_v0 }
 0x5cd   :  { %v3280_v50 = vpop.f32.mrf.mxu0 }
 0x5ce   :  { %2793 = vst [vmem:[%s6432_s11 + $0x1a0] sm:$0xff] %v2648_v12  ;;  %v2659_v58 = vadd.f32 %v3280_v50, %v6119_v24 }
 0x5cf   :  { %v2650_v45 = vpop.f32.mrf.mxu0 }
 0x5d0   :  { %2796 = vst [vmem:[%s6432_s11 + $0x1b8] sm:$0xff] %v2659_v58  ;;  %v2651_v46 = vadd.f32 %v6119_v24, %v2650_v45 }
 0x5d1   :  { %v3283_v6 = vpop.f32.mrf.mxu0 }
 0x5d2   :  { %2794 = vst [vmem:[%s6432_s11 + $0x1a8] sm:$0xff] %v2651_v46  ;;  %v2672_v21 = vadd.f32 %v3283_v6, %v6119_v24 }
 0x5d3   :  { %v2663_v27 = vpop.f32.mrf.mxu0 }
 0x5d4   :  { %2799 = vst [vmem:[%s6432_s11 + $0x1d0] sm:$0xff] %v2672_v21  ;;  %v2664_v39 = vadd.f32 %v6119_v24, %v2663_v27 }
 0x5d5   :  { %v3284_v35 = vpop.f32.mrf.mxu0 }
 0x5d6   :  { %2797 = vst [vmem:[%s6432_s11 + $0x1c0] sm:$0xff] %v2664_v39  ;;  %v2675_v28 = vadd.f32 %v3284_v35, %v6119_v24 }
 0x5d7   :  { %v2666_v55 = vpop.f32.mrf.mxu0 }
 0x5d8   :  { %2800 = vst [vmem:[%s6432_s11 + $0x1d8] sm:$0xff] %v2675_v28  ;;  %v2667_v40 = vadd.f32 %v6119_v24, %v2666_v55 }
 0x5d9   :  { %v3287_v15 = vpop.f32.mrf.mxu0 }
 0x5da   :  { %2798 = vst [vmem:[%s6432_s11 + $0x1c8] sm:$0xff] %v2667_v40  ;;  %v2688_v25 = vadd.f32 %v3287_v15, %v6119_v24 }
 0x5db   :  { %v2679_v29 = vpop.f32.mrf.mxu0 }
 0x5dc   :  { %2803 = vst [vmem:[%s6432_s11 + $0x1f0] sm:$0xff] %v2688_v25  ;;  %v2680_v13 = vadd.f32 %v6119_v24, %v2679_v29 }
 0x5dd   :  { %v3288_v42 = vpop.f32.mrf.mxu0 }
 0x5de   :  { %2801 = vst [vmem:[%s6432_s11 + $0x1e0] sm:$0xff] %v2680_v13  ;;  %v2691_v14 = vadd.f32 %v3288_v42, %v6119_v24 }
 0x5df   :  { %v2682_v2 = vpop.f32.mrf.mxu0 }
 0x5e0   :  { %2804 = vst [vmem:[%s6432_s11 + $0x1f8] sm:$0xff] %v2691_v14  ;;  %v2683_v30 = vadd.f32 %v6119_v24, %v2682_v2 }
 0x5e1   :  { %v3291_v47 = vpop.f32.mrf.mxu0 }
 0x5e2   :  { %2802 = vst [vmem:[%s6432_s11 + $0x1e8] sm:$0xff] %v2683_v30  ;;  %v2704_v51 = vadd.f32 %v3291_v47, %v6119_v24 }
 0x5e3   :  { %v2695_v54 = vpop.f32.mrf.mxu0 }
 0x5e4   :  { %2807 = vst [vmem:[%s6432_s11 + $0x210] sm:$0xff] %v2704_v51  ;;  %v2696_v57 = vadd.f32 %v6119_v24, %v2695_v54 }
 0x5e5   :  { %v3292_v17 = vpop.f32.mrf.mxu0 }
 0x5e6   :  { %2805 = vst [vmem:[%s6432_s11 + $0x200] sm:$0xff] %v2696_v57  ;;  %v2707_v7 = vadd.f32 %v3292_v17, %v6119_v24 }
 0x5e7   :  { %v2698_v31 = vpop.f32.mrf.mxu0 }
 0x5e8   :  { %2808 = vst [vmem:[%s6432_s11 + $0x218] sm:$0xff] %v2707_v7  ;;  %v2699_v23 = vadd.f32 %v6119_v24, %v2698_v31 }
 0x5e9   :  { %v3295_v56 = vpop.f32.mrf.mxu0 }
 0x5ea   :  { %2806 = vst [vmem:[%s6432_s11 + $0x208] sm:$0xff] %v2699_v23  ;;  %v2720_v53 = vadd.f32 %v3295_v56, %v6119_v24 }
 0x5eb   :  { %v2711_v63 = vpop.f32.mrf.mxu0 }
 0x5ec   :  { %2811 = vst [vmem:[%s6432_s11 + $0x230] sm:$0xff] %v2720_v53  ;;  %v2712_v34 = vadd.f32 %v6119_v24, %v2711_v63 }
 0x5ed   :  { %v3296_v3 = vpop.f32.mrf.mxu0 }
 0x5ee   :  { %2809 = vst [vmem:[%s6432_s11 + $0x220] sm:$0xff] %v2712_v34  ;;  %v2723_v36 = vadd.f32 %v3296_v3, %v6119_v24 }
 0x5ef   :  { %v2714_v32 = vpop.f32.mrf.mxu0 }
 0x5f0   :  { %2812 = vst [vmem:[%s6432_s11 + $0x238] sm:$0xff] %v2723_v36  ;;  %v2715_v62 = vadd.f32 %v6119_v24, %v2714_v32 }
 0x5f1   :  { %v3299_v22 = vpop.f32.mrf.mxu0 }
 0x5f2   :  { %2810 = vst [vmem:[%s6432_s11 + $0x228] sm:$0xff] %v2715_v62  ;;  %v2736_v8 = vadd.f32 %v3299_v22, %v6119_v24 }
 0x5f3   :  { %v2727_v10 = vpop.f32.mrf.mxu0 }
 0x5f4   :  { %2815 = vst [vmem:[%s6432_s11 + $0x250] sm:$0xff] %v2736_v8  ;;  %v2728_v59 = vadd.f32 %v6119_v24, %v2727_v10 }
 0x5f5   :  { %v3300_v20 = vpop.f32.mrf.mxu0 }
 0x5f6   :  { %2813 = vst [vmem:[%s6432_s11 + $0x240] sm:$0xff] %v2728_v59 }
 0x5f7   :  { %v2730_v4 = vpop.f32.mrf.mxu0 }
 0x5f8   :  { %v2731_v5 = vadd.f32 %v6119_v24, %v2730_v4 }
 0x5fa   :  { %2814 = vst [vmem:[%s6432_s11 + $0x248] sm:$0xff] %v2731_v5 }

</bundles_post_ra>
